<compile_context>
chip_gen: v7x
topology: tpu7x:2x2x1
jax: 0.10.0
libtpu: 0.0.40
codegen_flags: <defaults>
</compile_context>

<pallas_src>
import functools

import jax
import jax.numpy as jnp
from jax.experimental import pallas as pl
from jax.experimental.pallas import tpu as pltpu

HIDDEN_IN = 3072   # intermediate size (Linear in_features)
HIDDEN_OUT = 768   # model hidden size (Linear out_features)
LN_EPS = 1e-12


def bert_output_kernel(x_ref, w_ref, b_ref, res_ref, gamma_ref, beta_ref, o_ref):
    """Fused per-M-tile: y = LayerNorm((x @ W + b) + residual).

    x_ref:   (tm, K)  bf16
    w_ref:   (K, N)   bf16  (resident: constant index_map)
    b_ref/gamma_ref/beta_ref: (1, N) f32
    res_ref: (tm, N)  (input dtype)
    o_ref:   (tm, N)
    """
    # MXU matmul, bf16 operands, f32 accumulation.
    h = jnp.dot(x_ref[...], w_ref[...], preferred_element_type=jnp.float32)
    h = h + b_ref[...]                       # bias (1, N) broadcast
    # TODO(synk): dropout(p=0.1) is identity in eval/inference mode; training-time
    # stochastic dropout would use pltpu.prng_seed / prng_random_bits here.
    h = h + res_ref[...].astype(jnp.float32)  # residual add

    # BertLayerNorm (TF style: eps inside the rsqrt), all f32.
    u = jnp.mean(h, axis=-1, keepdims=True)
    d = h - u
    s = jnp.mean(d * d, axis=-1, keepdims=True)
    xn = d * jax.lax.rsqrt(s + LN_EPS)
    y = gamma_ref[...] * xn + beta_ref[...]
    o_ref[...] = y.astype(o_ref.dtype)


def _round_up(a, b):
    return (a + b - 1) // b * b


@functools.partial(jax.jit, static_argnames=("tm",))
def bert_output(hidden_states, input_tensor, w, b, gamma, beta, *, tm=256):
    """hidden_states: [B, S, 3072], input_tensor: [B, S, 768] -> [B, S, 768]."""
    B, S, K = hidden_states.shape
    N = input_tensor.shape[-1]
    assert w.shape == (K, N), (w.shape, K, N)
    assert N % 128 == 0, N  # lane-dense output block
    M = B * S

    # bf16 matmul operands (full-rate MXU), everything else f32.
    x2 = hidden_states.reshape(M, K).astype(jnp.bfloat16)
    wb = w.astype(jnp.bfloat16)
    res2 = input_tensor.reshape(M, N)

    # Row tile: full M when small, otherwise tm (multiple of 8); pad the tail.
    tm_eff = M if M < tm else tm
    M_pad = _round_up(M, tm_eff)
    if M_pad != M:
        x2 = jnp.pad(x2, ((0, M_pad - M), (0, 0)))
        res2 = jnp.pad(res2, ((0, M_pad - M), (0, 0)))

    b2 = b.reshape(1, N).astype(jnp.float32)
    g2 = gamma.reshape(1, N).astype(jnp.float32)
    be2 = beta.reshape(1, N).astype(jnp.float32)

    out = pl.pallas_call(
        bert_output_kernel,
        out_shape=jax.ShapeDtypeStruct((M_pad, N), hidden_states.dtype),
        grid_spec=pltpu.PrefetchScalarGridSpec(
            num_scalar_prefetch=0,
            grid=(M_pad // tm_eff,),
            in_specs=[
                pl.BlockSpec((tm_eff, K), lambda i: (i, 0)),   # x rows (bf16)
                pl.BlockSpec((K, N), lambda i: (0, 0)),        # resident W (bf16)
                pl.BlockSpec((1, N), lambda i: (0, 0)),        # bias
                pl.BlockSpec((tm_eff, N), lambda i: (i, 0)),   # residual
                pl.BlockSpec((1, N), lambda i: (0, 0)),        # LN weight
                pl.BlockSpec((1, N), lambda i: (0, 0)),        # LN bias
            ],
            out_specs=pl.BlockSpec((tm_eff, N), lambda i: (i, 0)),
        ),
        compiler_params=pltpu.CompilerParams(
            dimension_semantics=("parallel",),      # megacore-shards M on v7x
            vmem_limit_bytes=32 * 1024 * 1024,      # explicit (v5e default is 16 MiB)
        ),
    )(x2, wb, b2, res2, g2, be2)

    return out[:M].reshape(B, S, N)


def reference(hidden_states, input_tensor, w, b, gamma, beta):
    # Same operand precision as the kernel: bf16-rounded operands, f32 math.
    x = hidden_states.astype(jnp.bfloat16).astype(jnp.float32)
    wf = w.astype(jnp.bfloat16).astype(jnp.float32)
    h = jnp.einsum("bsk,kn->bsn", x, wf) + b
    h = h + input_tensor.astype(jnp.float32)
    u = jnp.mean(h, axis=-1, keepdims=True)
    s = jnp.mean((h - u) ** 2, axis=-1, keepdims=True)
    xn = (h - u) / jnp.sqrt(s + LN_EPS)
    return gamma * xn + beta


if __name__ == "__main__":
    key = jax.random.PRNGKey(0)
    k1, k2, k3, k4 = jax.random.split(key, 4)

    B, S = 2, 8
    hidden_states = jax.random.normal(k1, (B, S, HIDDEN_IN), dtype=jnp.float32)
    input_tensor = jax.random.normal(k2, (B, S, HIDDEN_OUT), dtype=jnp.float32)

    # Deterministic parameter init (Linear weight stored as [in, out] for x @ W).
    bound = 1.0 / (HIDDEN_IN ** 0.5)
    w = jax.random.uniform(k3, (HIDDEN_IN, HIDDEN_OUT),
                           minval=-bound, maxval=bound, dtype=jnp.float32)
    b = jax.random.uniform(k4, (HIDDEN_OUT,),
                           minval=-bound, maxval=bound, dtype=jnp.float32)
    gamma = jnp.ones((HIDDEN_OUT,), dtype=jnp.float32)   # LayerNorm weight
    beta = jnp.zeros((HIDDEN_OUT,), dtype=jnp.float32)   # LayerNorm bias

    out = bert_output(hidden_states, input_tensor, w, b, gamma, beta)
    out = jax.block_until_ready(out)

    ref = reference(hidden_states, input_tensor, w, b, gamma, beta)
    assert out.shape == (B, S, HIDDEN_OUT), out.shape
    assert jnp.allclose(out, ref, atol=5e-3, rtol=5e-3), \
        float(jnp.max(jnp.abs(out - ref)))

    print("KERNEL_OK")
</pallas_src>

<mosaic_0001>
module attributes {stable_mosaic.version = 11 : i64} {
  func.func @bert_output_kernel(%arg0: i32, %arg1: memref<16x3072xbf16, #tpu.memory_space<vmem>>, %arg2: memref<3072x768xbf16, #tpu.memory_space<vmem>>, %arg3: memref<1x768xf32, #tpu.memory_space<vmem>>, %arg4: memref<16x768xf32, #tpu.memory_space<vmem>>, %arg5: memref<1x768xf32, #tpu.memory_space<vmem>>, %arg6: memref<1x768xf32, #tpu.memory_space<vmem>>, %arg7: memref<16x768xf32, #tpu.memory_space<vmem>>) attributes {dimension_semantics = [#tpu.dimension_semantics<parallel>], iteration_bounds = array<i64: 1>, scalar_prefetch = 0 : i64, scratch_operands = 0 : i64, tpu.core_type = #tpu.core_type<tc>, window_params = [{transform_indices = @transform_0, window_bounds = array<i64: 16, 3072>}, {pipeline_mode = #tpu.pipeline_mode<synchronous>, transform_indices = @transform_1, window_bounds = array<i64: 3072, 768>}, {pipeline_mode = #tpu.pipeline_mode<synchronous>, transform_indices = @transform_2, window_bounds = array<i64: 1, 768>}, {transform_indices = @transform_3, window_bounds = array<i64: 16, 768>}, {pipeline_mode = #tpu.pipeline_mode<synchronous>, transform_indices = @transform_4, window_bounds = array<i64: 1, 768>}, {pipeline_mode = #tpu.pipeline_mode<synchronous>, transform_indices = @transform_5, window_bounds = array<i64: 1, 768>}, {transform_indices = @transform_6, window_bounds = array<i64: 16, 768>}]} {
    %c0 = arith.constant 0 : index
    %c0_0 = arith.constant 0 : index
    %0 = vector.load %arg1[%c0, %c0_0] : memref<16x3072xbf16, #tpu.memory_space<vmem>>, vector<16x3072xbf16>
    %c0_1 = arith.constant 0 : index
    %c0_2 = arith.constant 0 : index
    %1 = vector.load %arg2[%c0_1, %c0_2] : memref<3072x768xbf16, #tpu.memory_space<vmem>>, vector<3072x768xbf16>
    %cst = arith.constant dense<0.000000e+00> : vector<16x768xf32>
    %2 = tpu.matmul %0, %1, %cst {dimension_numbers = #tpu.dot_dimension_numbers<[1], [0], [0], [1], [0, 0, 1, 1], [], []>} : vector<16x3072xbf16>, vector<3072x768xbf16>, vector<16x768xf32> -> vector<16x768xf32>
    %c0_3 = arith.constant 0 : index
    %c0_4 = arith.constant 0 : index
    %3 = vector.load %arg3[%c0_3, %c0_4] : memref<1x768xf32, #tpu.memory_space<vmem>>, vector<1x768xf32>
    %4 = vector.broadcast %3 : vector<1x768xf32> to vector<16x768xf32>
    %5 = arith.addf %2, %4 : vector<16x768xf32>
    %c0_5 = arith.constant 0 : index
    %c0_6 = arith.constant 0 : index
    %6 = vector.load %arg4[%c0_5, %c0_6] : memref<16x768xf32, #tpu.memory_space<vmem>>, vector<16x768xf32>
    %7 = arith.addf %5, %6 : vector<16x768xf32>
    %cst_7 = arith.constant dense<0.000000e+00> : vector<16xf32>
    %8 = vector.multi_reduction <add>, %7, %cst_7 [1] : vector<16x768xf32> to vector<16xf32>
    %9 = vector.shape_cast %8 : vector<16xf32> to vector<16x1xf32>
    %cst_8 = arith.constant 7.680000e+02 : f32
    %10 = vector.broadcast %cst_8 : f32 to vector<16x1xf32>
    %11 = arith.divf %9, %10 : vector<16x1xf32>
    %12 = vector.broadcast %11 : vector<16x1xf32> to vector<16x768xf32>
    %13 = arith.subf %7, %12 : vector<16x768xf32>
    %14 = arith.mulf %13, %13 : vector<16x768xf32>
    %cst_9 = arith.constant dense<0.000000e+00> : vector<16xf32>
    %15 = vector.multi_reduction <add>, %14, %cst_9 [1] : vector<16x768xf32> to vector<16xf32>
    %16 = vector.shape_cast %15 : vector<16xf32> to vector<16x1xf32>
    %cst_10 = arith.constant 7.680000e+02 : f32
    %17 = vector.broadcast %cst_10 : f32 to vector<16x1xf32>
    %18 = arith.divf %16, %17 : vector<16x1xf32>
    %cst_11 = arith.constant 9.99999996E-13 : f32
    %19 = vector.broadcast %cst_11 : f32 to vector<16x1xf32>
    %20 = arith.addf %18, %19 : vector<16x1xf32>
    %21 = math.rsqrt %20 : vector<16x1xf32>
    %22 = vector.broadcast %21 : vector<16x1xf32> to vector<16x768xf32>
    %23 = arith.mulf %13, %22 : vector<16x768xf32>
    %c0_12 = arith.constant 0 : index
    %c0_13 = arith.constant 0 : index
    %24 = vector.load %arg5[%c0_12, %c0_13] : memref<1x768xf32, #tpu.memory_space<vmem>>, vector<1x768xf32>
    %25 = vector.broadcast %24 : vector<1x768xf32> to vector<16x768xf32>
    %26 = arith.mulf %25, %23 : vector<16x768xf32>
    %c0_14 = arith.constant 0 : index
    %c0_15 = arith.constant 0 : index
    %27 = vector.load %arg6[%c0_14, %c0_15] : memref<1x768xf32, #tpu.memory_space<vmem>>, vector<1x768xf32>
    %28 = vector.broadcast %27 : vector<1x768xf32> to vector<16x768xf32>
    %29 = arith.addf %26, %28 : vector<16x768xf32>
    %c0_16 = arith.constant 0 : index
    %c0_17 = arith.constant 0 : index
    %30 = vector.load %arg7[%c0_16, %c0_17] : memref<16x768xf32, #tpu.memory_space<vmem>>, vector<16x768xf32>
    tpu.vector_store %arg7[%c0_16, %c0_17], %29 {strides = array<i32>} : memref<16x768xf32, #tpu.memory_space<vmem>>, vector<16x768xf32>,
    return
  }
  func.func @transform_0(%arg0: i32) -> (i32, i32) {
    %c0_i32 = arith.constant 0 : i32
    %c0_i32_0 = arith.constant 0 : i32
    return %arg0, %c0_i32 : i32, i32
  }
  func.func @transform_1(%arg0: i32) -> (i32, i32) {
    %c0_i32 = arith.constant 0 : i32
    %c0_i32_0 = arith.constant 0 : i32
    %c0_i32_1 = arith.constant 0 : i32
    return %c0_i32, %c0_i32_0 : i32, i32
  }
  func.func @transform_2(%arg0: i32) -> (i32, i32) {
    %c0_i32 = arith.constant 0 : i32
    %c0_i32_0 = arith.constant 0 : i32
    %c0_i32_1 = arith.constant 0 : i32
    return %c0_i32, %c0_i32_0 : i32, i32
  }
  func.func @transform_3(%arg0: i32) -> (i32, i32) {
    %c0_i32 = arith.constant 0 : i32
    %c0_i32_0 = arith.constant 0 : i32
    return %arg0, %c0_i32 : i32, i32
  }
  func.func @transform_4(%arg0: i32) -> (i32, i32) {
    %c0_i32 = arith.constant 0 : i32
    %c0_i32_0 = arith.constant 0 : i32
    %c0_i32_1 = arith.constant 0 : i32
    return %c0_i32, %c0_i32_0 : i32, i32
  }
  func.func @transform_5(%arg0: i32) -> (i32, i32) {
    %c0_i32 = arith.constant 0 : i32
    %c0_i32_0 = arith.constant 0 : i32
    %c0_i32_1 = arith.constant 0 : i32
    return %c0_i32, %c0_i32_0 : i32, i32
  }
  func.func @transform_6(%arg0: i32) -> (i32, i32) {
    %c0_i32 = arith.constant 0 : i32
    %c0_i32_0 = arith.constant 0 : i32
    return %arg0, %c0_i32 : i32, i32
  }
}

</mosaic_0001>

<bundles_post_ra>
// kernel: bert_output.1
= control target key start
LH: loop header
LB: loop body
LE: loop exit
PB: predicated region body
PF: predicated region fallthrough
CT: control target
= control target key end

     0   :  { %s15844_s0 = inlined_call_operand.vmem [shape: bf16[16,3072], index: 0, kind: input, shape index: {}]   ;;  %s15845_s1 = inlined_call_operand.vmem [shape: bf16[3072,768], index: 1, kind: input, shape index: {}]   ;;  %s15846_s2 = inlined_call_operand.vmem [shape: f32[1,768], index: 2, kind: input, shape index: {}]   ;;  %s15847_s3 = inlined_call_operand.vmem [shape: f32[16,768], index: 3, kind: input, shape index: {}]   ;;  %s15848_s4 = inlined_call_operand.vmem [shape: f32[1,768], index: 4, kind: input, shape index: {}]   ;;  %s15849_s5 = inlined_call_operand.vmem [shape: f32[1,768], index: 5, kind: input, shape index: {}]   ;;  %s15850_s6 = inlined_call_operand.hbm [shape: f32[16,768], index: 6, kind: output, shape index: {}]  }
   0x1   :  { %v10196_v0 = vld [vmem:[%s15845_s1 + $0x4] ss:$24 sps:$4 sm:$0xff]   ;;  %v10200_v2 = vld [vmem:[%s15845_s1] ss:$24 sps:$4 sm:$0xff]   ;;  %v10202_v4 = vld [vmem:[%s15845_s1 + $0x34] ss:$24 sps:$4 sm:$0xff]  }
   0x2   :  { %v10198_v1 = vld [vmem:[%s15845_s1 + $0x1204] ss:$24 sps:$4 sm:$0xff]   ;;  %7112 = vmatprep.subr.bf16.mxu1 %v10196_v0  ;;  %v10201_v3 = vld [vmem:[%s15845_s1 + $0x1200] ss:$24 sps:$4 sm:$0xff]   ;;  %v10204_v5 = vld [vmem:[%s15845_s1 + $0x1234] ss:$24 sps:$4 sm:$0xff]  }
   0x3   :  { %7370 = vmatprep.subr.bf16.mxu0 %v10198_v1  ;;  %7113 = vmatpush1.bf16.msra.mxu1 %v10200_v2  ;;  %v10206_v6 = vld [vmem:[%s15845_s1 + $0x30] ss:$24 sps:$4 sm:$0xff]   ;;  %v10208_v8 = vld [vmem:[%s15845_s1 + $0x64] ss:$24 sps:$4 sm:$0xff]   ;;  %v10212_v10 = vld [vmem:[%s15845_s1 + $0x60] ss:$24 sps:$4 sm:$0xff]  }
   0x4   :  { %7371 = vmatpush1.bf16.msra.mxu0 %v10201_v3  ;;  %7114 = vmatprep.subr.bf16.mxu1 %v10202_v4  ;;  %v10207_v7 = vld [vmem:[%s15845_s1 + $0x1230] ss:$24 sps:$4 sm:$0xff]   ;;  %v10210_v9 = vld [vmem:[%s15845_s1 + $0x1264] ss:$24 sps:$4 sm:$0xff]   ;;  %v10213_v11 = vld [vmem:[%s15845_s1 + $0x1260] ss:$24 sps:$4 sm:$0xff]  }
   0x5   :  { %7372 = vmatprep.subr.bf16.mxu0 %v10204_v5  ;;  %v10214_v12 = vld [vmem:[%s15845_s1 + $0x94] ss:$24 sps:$4 sm:$0xff]   ;;  %v10218_v14 = vld [vmem:[%s15845_s1 + $0x90] ss:$24 sps:$4 sm:$0xff]   ;;  %v10220_v16 = vld [vmem:[%s15845_s1 + $0xc4] ss:$24 sps:$4 sm:$0xff]  }
   0x6   :  { %v10216_v13 = vld [vmem:[%s15845_s1 + $0x1294] ss:$24 sps:$4 sm:$0xff]   ;;  %v10219_v15 = vld [vmem:[%s15845_s1 + $0x1290] ss:$24 sps:$4 sm:$0xff]   ;;  %v10222_v17 = vld [vmem:[%s15845_s1 + $0x12c4] ss:$24 sps:$4 sm:$0xff]  }
   0x7   :  { %7115 = vmatpush1.bf16.msra.mxu1 %v10206_v6  ;;  %v10224_v18 = vld [vmem:[%s15845_s1 + $0xc0] ss:$24 sps:$4 sm:$0xff]   ;;  %v10226_v20 = vld [vmem:[%s15845_s1 + $0xf4] ss:$24 sps:$4 sm:$0xff]   ;;  %v10230_v22 = vld [vmem:[%s15845_s1 + $0xf0] ss:$24 sps:$4 sm:$0xff]  }
   0x8   :  { %7373 = vmatpush1.bf16.msra.mxu0 %v10207_v7  ;;  %7116 = vmatprep.subr.bf16.mxu1 %v10208_v8  ;;  %v10225_v19 = vld [vmem:[%s15845_s1 + $0x12c0] ss:$24 sps:$4 sm:$0xff]   ;;  %v10228_v21 = vld [vmem:[%s15845_s1 + $0x12f4] ss:$24 sps:$4 sm:$0xff]   ;;  %v10231_v23 = vld [vmem:[%s15845_s1 + $0x12f0] ss:$24 sps:$4 sm:$0xff]  }
   0x9   :  { %7374 = vmatprep.subr.bf16.mxu0 %v10210_v9  ;;  %v10232_v24 = vld [vmem:[%s15845_s1 + $0x124] ss:$24 sps:$4 sm:$0xff]   ;;  %v10236_v26 = vld [vmem:[%s15845_s1 + $0x120] ss:$24 sps:$4 sm:$0xff]   ;;  %v10238_v28 = vld [vmem:[%s15845_s1 + $0x154] ss:$24 sps:$4 sm:$0xff]  }
   0xa   :  { %v10234_v25 = vld [vmem:[%s15845_s1 + $0x1324] ss:$24 sps:$4 sm:$0xff]   ;;  %v10237_v27 = vld [vmem:[%s15845_s1 + $0x1320] ss:$24 sps:$4 sm:$0xff]   ;;  %v10240_v29 = vld [vmem:[%s15845_s1 + $0x1354] ss:$24 sps:$4 sm:$0xff]  }
   0xb   :  { %7117 = vmatpush1.bf16.msra.mxu1 %v10212_v10  ;;  %v10242_v30 = vld [vmem:[%s15845_s1 + $0x150] ss:$24 sps:$4 sm:$0xff]   ;;  %v10244_v32 = vld [vmem:[%s15845_s1 + $0x184] ss:$24 sps:$4 sm:$0xff]   ;;  %v10248_v34 = vld [vmem:[%s15845_s1 + $0x180] ss:$24 sps:$4 sm:$0xff]  }
   0xc   :  { %7375 = vmatpush1.bf16.msra.mxu0 %v10213_v11  ;;  %7118 = vmatprep.subr.bf16.mxu1 %v10214_v12  ;;  %v10243_v31 = vld [vmem:[%s15845_s1 + $0x1350] ss:$24 sps:$4 sm:$0xff]   ;;  %v10246_v33 = vld [vmem:[%s15845_s1 + $0x1384] ss:$24 sps:$4 sm:$0xff]   ;;  %v10249_v35 = vld [vmem:[%s15845_s1 + $0x1380] ss:$24 sps:$4 sm:$0xff]  }
   0xd   :  { %7376 = vmatprep.subr.bf16.mxu0 %v10216_v13  ;;  %v10250_v36 = vld [vmem:[%s15845_s1 + $0x1b4] ss:$24 sps:$4 sm:$0xff]   ;;  %v10254_v38 = vld [vmem:[%s15845_s1 + $0x1b0] ss:$24 sps:$4 sm:$0xff]   ;;  %v10256_v40 = vld [vmem:[%s15845_s1 + $0x1e4] ss:$24 sps:$4 sm:$0xff]  }
   0xe   :  { %v10252_v37 = vld [vmem:[%s15845_s1 + $0x13b4] ss:$24 sps:$4 sm:$0xff]   ;;  %v10255_v39 = vld [vmem:[%s15845_s1 + $0x13b0] ss:$24 sps:$4 sm:$0xff]   ;;  %v10258_v41 = vld [vmem:[%s15845_s1 + $0x13e4] ss:$24 sps:$4 sm:$0xff]  }
   0xf   :  { %7119 = vmatpush1.bf16.msra.mxu1 %v10218_v14  ;;  %v10260_v42 = vld [vmem:[%s15845_s1 + $0x1e0] ss:$24 sps:$4 sm:$0xff]   ;;  %v10262_v44 = vld [vmem:[%s15845_s1 + $0x214] ss:$24 sps:$4 sm:$0xff]   ;;  %v10266_v46 = vld [vmem:[%s15845_s1 + $0x210] ss:$24 sps:$4 sm:$0xff]  }
  0x10   :  { %7377 = vmatpush1.bf16.msra.mxu0 %v10219_v15  ;;  %7120 = vmatprep.subr.bf16.mxu1 %v10220_v16  ;;  %v10261_v43 = vld [vmem:[%s15845_s1 + $0x13e0] ss:$24 sps:$4 sm:$0xff]   ;;  %v10264_v45 = vld [vmem:[%s15845_s1 + $0x1414] ss:$24 sps:$4 sm:$0xff]   ;;  %v10267_v47 = vld [vmem:[%s15845_s1 + $0x1410] ss:$24 sps:$4 sm:$0xff]  }
  0x11   :  { %7378 = vmatprep.subr.bf16.mxu0 %v10222_v17  ;;  %v24_v48 = vld [vmem:[%s15844_s0] sm:$0xff]  ;;  %v30_v53 = vld [vmem:[%s15844_s0 + $0x30] sm:$0xff] }
  0x12   :  { %v36_v49 = vld [vmem:[%s15844_s0 + $0x60] sm:$0xff]  ;;  %v42_v54 = vld [vmem:[%s15844_s0 + $0x90] sm:$0xff] }
  0x13   :  { %7121 = vmatpush1.bf16.msra.mxu1 %v10224_v18  ;;  %v10268_v50 = vld [vmem:[%s15845_s1 + $0x244] ss:$24 sps:$4 sm:$0xff]   ;;  %v12147_v52 = vcombine.high %v24_v48, %v36_v49  ;;  %v12156_v55 = vcombine.high %v30_v53, %v42_v54  ;;  %v10272_v56 = vld [vmem:[%s15845_s1 + $0x240] ss:$24 sps:$4 sm:$0xff]   ;;  %v10274_v58 = vld [vmem:[%s15845_s1 + $0x274] ss:$24 sps:$4 sm:$0xff]   ;;  %v12213_v10 = vcombine.low %v24_v48, %v36_v49  ;;  %v12215_v11 = vcombine.low %v30_v53, %v42_v54 }
  0x14   :  { %7379 = vmatpush1.bf16.msra.mxu0 %v10225_v19  ;;  %7122 = vmatprep.subr.bf16.mxu1 %v10226_v20  ;;  %v10270_v51 = vld [vmem:[%s15845_s1 + $0x1444] ss:$24 sps:$4 sm:$0xff]   ;;  %v10273_v57 = vld [vmem:[%s15845_s1 + $0x1440] ss:$24 sps:$4 sm:$0xff]   ;;  %v10276_v59 = vld [vmem:[%s15845_s1 + $0x1474] ss:$24 sps:$4 sm:$0xff]  }
  0x15   :  { %7380 = vmatprep.subr.bf16.mxu0 %v10228_v21  ;;  %7144 = vmatprep.mubr.bf16.mxu1 %v12147_v52  ;;  %v10278_v60 = vld [vmem:[%s15845_s1 + $0x270] ss:$24 sps:$4 sm:$0xff]   ;;  %v10280_v62 = vld [vmem:[%s15845_s1 + $0x2a4] ss:$24 sps:$4 sm:$0xff]   ;;  %v10284_v0 = vld [vmem:[%s15845_s1 + $0x2a0] ss:$24 sps:$4 sm:$0xff]  }
  0x16   :  { %7402 = vmatprep.mubr.bf16.mxu0 %v12156_v55  ;;  %v10279_v61 = vld [vmem:[%s15845_s1 + $0x1470] ss:$24 sps:$4 sm:$0xff]   ;;  %v10282_v63 = vld [vmem:[%s15845_s1 + $0x14a4] ss:$24 sps:$4 sm:$0xff]   ;;  %v10285_v1 = vld [vmem:[%s15845_s1 + $0x14a0] ss:$24 sps:$4 sm:$0xff]  }
  0x17   :  { %7123 = vmatpush1.bf16.msra.mxu1 %v10230_v22  ;;  %v10286_v2 = vld [vmem:[%s15845_s1 + $0x2d4] ss:$24 sps:$4 sm:$0xff]   ;;  %v10290_v4 = vld [vmem:[%s15845_s1 + $0x2d0] ss:$24 sps:$4 sm:$0xff]   ;;  %v10294_v6 = vld [vmem:[%s15845_s1 + $0x304] ss:$24 sps:$4 sm:$0xff]  }
  0x18   :  { %7381 = vmatpush1.bf16.msra.mxu0 %v10231_v23  ;;  %7124 = vmatprep.subr.bf16.mxu1 %v10232_v24  ;;  %v10288_v3 = vld [vmem:[%s15845_s1 + $0x14d4] ss:$24 sps:$4 sm:$0xff]   ;;  %v10291_v5 = vld [vmem:[%s15845_s1 + $0x14d0] ss:$24 sps:$4 sm:$0xff]   ;;  %v10297_v7 = vld [vmem:[%s15845_s1 + $0x1504] ss:$24 sps:$4 sm:$0xff]  }
  0x19   :  { %7382 = vmatprep.subr.bf16.mxu0 %v10234_v25  ;;  %v10292_v8 = vld [vmem:[%s15845_s1 + $0x300] ss:$24 sps:$4 sm:$0xff]   ;;  %v10300_v12 = vld [vmem:[%s15845_s1 + $0x334] ss:$24 sps:$4 sm:$0xff]   ;;  %v10298_v14 = vld [vmem:[%s15845_s1 + $0x330] ss:$24 sps:$4 sm:$0xff]  }
  0x1a   :  { %v10295_v9 = vld [vmem:[%s15845_s1 + $0x1500] ss:$24 sps:$4 sm:$0xff]   ;;  %v10303_v13 = vld [vmem:[%s15845_s1 + $0x1534] ss:$24 sps:$4 sm:$0xff]   ;;  %v10301_v15 = vld [vmem:[%s15845_s1 + $0x1530] ss:$24 sps:$4 sm:$0xff]  }
  0x1b   :  { %7125 = vmatpush1.bf16.msra.mxu1 %v10236_v26  ;;  %v10306_v16 = vld [vmem:[%s15845_s1 + $0x364] ss:$24 sps:$4 sm:$0xff]   ;;  %v10304_v18 = vld [vmem:[%s15845_s1 + $0x360] ss:$24 sps:$4 sm:$0xff]   ;;  %v10312_v20 = vld [vmem:[%s15845_s1 + $0x394] ss:$24 sps:$4 sm:$0xff]  }
  0x1c   :  { %7383 = vmatpush1.bf16.msra.mxu0 %v10237_v27  ;;  %7126 = vmatprep.subr.bf16.mxu1 %v10238_v28  ;;  %v10309_v17 = vld [vmem:[%s15845_s1 + $0x1564] ss:$24 sps:$4 sm:$0xff]   ;;  %v10307_v19 = vld [vmem:[%s15845_s1 + $0x1560] ss:$24 sps:$4 sm:$0xff]   ;;  %v10315_v21 = vld [vmem:[%s15845_s1 + $0x1594] ss:$24 sps:$4 sm:$0xff]  }
  0x1d   :  { %7384 = vmatprep.subr.bf16.mxu0 %v10240_v29  ;;  %v10310_v22 = vld [vmem:[%s15845_s1 + $0x390] ss:$24 sps:$4 sm:$0xff]   ;;  %v10318_v24 = vld [vmem:[%s15845_s1 + $0x3c4] ss:$24 sps:$4 sm:$0xff]   ;;  %v10316_v26 = vld [vmem:[%s15845_s1 + $0x3c0] ss:$24 sps:$4 sm:$0xff]  }
  0x1e   :  { %v10313_v23 = vld [vmem:[%s15845_s1 + $0x1590] ss:$24 sps:$4 sm:$0xff]   ;;  %v10321_v25 = vld [vmem:[%s15845_s1 + $0x15c4] ss:$24 sps:$4 sm:$0xff]   ;;  %v10319_v27 = vld [vmem:[%s15845_s1 + $0x15c0] ss:$24 sps:$4 sm:$0xff]  }
  0x1f   :  { %7127 = vmatpush1.bf16.msra.mxu1 %v10242_v30  ;;  %v10324_v28 = vld [vmem:[%s15845_s1 + $0x3f4] ss:$24 sps:$4 sm:$0xff]   ;;  %v10322_v30 = vld [vmem:[%s15845_s1 + $0x3f0] ss:$24 sps:$4 sm:$0xff]   ;;  %v10340_v48 = vld [vmem:[%s15845_s1 + $0x480] ss:$24 sps:$4 sm:$0xff]  }
  0x20   :  { %7385 = vmatpush1.bf16.msra.mxu0 %v10243_v31  ;;  %7128 = vmatprep.subr.bf16.mxu1 %v10244_v32  ;;  %v10327_v29 = vld [vmem:[%s15845_s1 + $0x15f4] ss:$24 sps:$4 sm:$0xff]   ;;  %v10325_v31 = vld [vmem:[%s15845_s1 + $0x15f0] ss:$24 sps:$4 sm:$0xff]   ;;  %v10330_v32 = vld [vmem:[%s15845_s1 + $0x424] ss:$24 sps:$4 sm:$0xff]  }
  0x21   :  { %7386 = vmatprep.subr.bf16.mxu0 %v10246_v33  ;;  %v10333_v33 = vld [vmem:[%s15845_s1 + $0x1624] ss:$24 sps:$4 sm:$0xff]   ;;  %v10343_v49 = vld [vmem:[%s15845_s1 + $0x1680] ss:$24 sps:$4 sm:$0xff]   ;;  %v10346_v53 = vld [vmem:[%s15845_s1 + $0x4b0] ss:$24 sps:$4 sm:$0xff]  }
  0x22   :  { %v10349_v54 = vld [vmem:[%s15845_s1 + $0x16b0] ss:$24 sps:$4 sm:$0xff]  }
  0x23   :  { %7129 = vmatpush1.bf16.msra.mxu1 %v10248_v34  ;;  %v10328_v34 = vld [vmem:[%s15845_s1 + $0x420] ss:$24 sps:$4 sm:$0xff]  }
  0x24   :  { %7387 = vmatpush1.bf16.msra.mxu0 %v10249_v35  ;;  %7130 = vmatprep.subr.bf16.mxu1 %v10250_v36  ;;  %v10331_v35 = vld [vmem:[%s15845_s1 + $0x1620] ss:$24 sps:$4 sm:$0xff]   ;;  %v12294_v36 = vld [vmem:[%s15844_s0 + $0x8] sm:$0xff] }
  0x25   :  { %7388 = vmatprep.subr.bf16.mxu0 %v10252_v37  ;;  %v12299_v37 = vld [vmem:[%s15844_s0 + $0x68] sm:$0xff] }
  0x27   :  { %7131 = vmatpush1.bf16.msra.mxu1 %v10254_v38  ;;  %v10336_v38 = vld [vmem:[%s15845_s1 + $0x454] ss:$24 sps:$4 sm:$0xff]  }
  0x28   :  { %7389 = vmatpush1.bf16.msra.mxu0 %v10255_v39  ;;  %7132 = vmatprep.subr.bf16.mxu1 %v10256_v40  ;;  %v10339_v39 = vld [vmem:[%s15845_s1 + $0x1654] ss:$24 sps:$4 sm:$0xff]   ;;  %v12309_v40 = vcombine.high %v12294_v36, %v12299_v37 }
  0x29   :  { %7390 = vmatprep.subr.bf16.mxu0 %v10258_v41  ;;  %v12314_v41 = vld [vmem:[%s15844_s0 + $0x38] sm:$0xff] }
  0x2b   :  { %7133 = vmatpush1.bf16.msra.mxu1 %v10260_v42  ;;  %v12319_v42 = vld [vmem:[%s15844_s0 + $0x98] sm:$0xff] }
  0x2c   :  { %7391 = vmatpush1.bf16.msra.mxu0 %v10261_v43  ;;  %7134 = vmatprep.subr.bf16.mxu1 %v10262_v44  ;;  %v12324_v43 = vcombine.high %v12314_v41, %v12319_v42  ;;  %v10334_v44 = vld [vmem:[%s15845_s1 + $0x450] ss:$24 sps:$4 sm:$0xff]  }
  0x2d   :  { %7392 = vmatprep.subr.bf16.mxu0 %v10264_v45  ;;  %v10337_v45 = vld [vmem:[%s15845_s1 + $0x1650] ss:$24 sps:$4 sm:$0xff]  }
  0x2f   :  { %7135 = vmatpush1.bf16.msra.mxu1 %v10266_v46  ;;  %v10342_v46 = vld [vmem:[%s15845_s1 + $0x484] ss:$24 sps:$4 sm:$0xff]  }
  0x30   :  { %7393 = vmatpush1.bf16.msra.mxu0 %v10267_v47  ;;  %7136 = vmatprep.subr.bf16.mxu1 %v10268_v50  ;;  %v10345_v47 = vld [vmem:[%s15845_s1 + $0x1684] ss:$24 sps:$4 sm:$0xff]   ;;  %v10348_v50 = vld [vmem:[%s15845_s1 + $0x4b4] ss:$24 sps:$4 sm:$0xff]  }
  0x31   :  { %7394 = vmatprep.subr.bf16.mxu0 %v10270_v51  ;;  %v10351_v51 = vld [vmem:[%s15845_s1 + $0x16b4] ss:$24 sps:$4 sm:$0xff]  }
  0x33   :  { %7137 = vmatpush1.bf16.msra.mxu1 %v10272_v56  ;;  %v10354_v56 = vld [vmem:[%s15845_s1 + $0x4e4] ss:$24 sps:$4 sm:$0xff]  }
  0x34   :  { %7395 = vmatpush1.bf16.msra.mxu0 %v10273_v57  ;;  %7138 = vmatprep.subr.bf16.mxu1 %v10274_v58  ;;  %v10357_v57 = vld [vmem:[%s15845_s1 + $0x16e4] ss:$24 sps:$4 sm:$0xff]   ;;  %v10352_v58 = vld [vmem:[%s15845_s1 + $0x4e0] ss:$24 sps:$4 sm:$0xff]  }
  0x35   :  { %7396 = vmatprep.subr.bf16.mxu0 %v10276_v59  ;;  %v10355_v59 = vld [vmem:[%s15845_s1 + $0x16e0] ss:$24 sps:$4 sm:$0xff]  }
  0x37   :  { %7139 = vmatpush1.bf16.msra.mxu1 %v10278_v60  ;;  %v10360_v60 = vld [vmem:[%s15845_s1 + $0x514] ss:$24 sps:$4 sm:$0xff]  }
  0x38   :  { %7397 = vmatpush1.bf16.msra.mxu0 %v10279_v61  ;;  %7140 = vmatprep.subr.bf16.mxu1 %v10280_v62  ;;  %v10363_v61 = vld [vmem:[%s15845_s1 + $0x1714] ss:$24 sps:$4 sm:$0xff]   ;;  %v10358_v62 = vld [vmem:[%s15845_s1 + $0x510] ss:$24 sps:$4 sm:$0xff]  }
  0x39   :  { %7398 = vmatprep.subr.bf16.mxu0 %v10282_v63  ;;  %v10361_v63 = vld [vmem:[%s15845_s1 + $0x1710] ss:$24 sps:$4 sm:$0xff]  }
  0x3b   :  { %7141 = vmatpush1.bf16.msra.mxu1 %v10284_v0  ;;  %v10366_v0 = vld [vmem:[%s15845_s1 + $0x544] ss:$24 sps:$4 sm:$0xff]  }
  0x3c   :  { %7399 = vmatpush1.bf16.msra.mxu0 %v10285_v1  ;;  %7142 = vmatprep.subr.bf16.mxu1 %v10286_v2  ;;  %v10369_v1 = vld [vmem:[%s15845_s1 + $0x1744] ss:$24 sps:$4 sm:$0xff]   ;;  %v10364_v2 = vld [vmem:[%s15845_s1 + $0x540] ss:$24 sps:$4 sm:$0xff]  }
  0x3d   :  { %7400 = vmatprep.subr.bf16.mxu0 %v10288_v3  ;;  %v10367_v3 = vld [vmem:[%s15845_s1 + $0x1740] ss:$24 sps:$4 sm:$0xff]  }
  0x3f   :  { %7143 = vmatpush1.bf16.msra.mxu1 %v10290_v4  ;;  %v10372_v4 = vld [vmem:[%s15845_s1 + $0x574] ss:$24 sps:$4 sm:$0xff]  }
  0x40   :  { %7401 = vmatpush1.bf16.msra.mxu0 %v10291_v5  ;;  %7155 = vmatprep.subr.bf16.mxu1 %v10294_v6  ;;  %v10375_v5 = vld [vmem:[%s15845_s1 + $0x1774] ss:$24 sps:$4 sm:$0xff]   ;;  %v10370_v6 = vld [vmem:[%s15845_s1 + $0x570] ss:$24 sps:$4 sm:$0xff]  }
  0x41   :  { %7413 = vmatprep.subr.bf16.mxu0 %v10297_v7  ;;  %v10373_v7 = vld [vmem:[%s15845_s1 + $0x1770] ss:$24 sps:$4 sm:$0xff]  }
  0x42   :  { %7145 = vmatmul.mubr.bf16.vlgmr.msra.gmra.mrb[0].mxu1 %v12213_v10 }
  0x43   :  { %7403 = vmatmul.mubr.bf16.vlgmr.msra.gmra.mrb[0].mxu0 %v12215_v11  ;;  %7156 = vmatpush1.bf16.msra.mxu1 %v10292_v8  ;;  %v10378_v8 = vld [vmem:[%s15845_s1 + $0x5a4] ss:$24 sps:$4 sm:$0xff]  }
  0x44   :  { %7414 = vmatpush1.bf16.msra.mxu0 %v10295_v9  ;;  %7157 = vmatprep.subr.bf16.mxu1 %v10300_v12  ;;  %v10381_v9 = vld [vmem:[%s15845_s1 + $0x17a4] ss:$24 sps:$4 sm:$0xff]   ;;  %v10376_v12 = vld [vmem:[%s15845_s1 + $0x5a0] ss:$24 sps:$4 sm:$0xff]  }
  0x45   :  { %7415 = vmatprep.subr.bf16.mxu0 %v10303_v13  ;;  %7187 = vmatprep.mubr.bf16.mxu1 %v12309_v40  ;;  %v10379_v13 = vld [vmem:[%s15845_s1 + $0x17a0] ss:$24 sps:$4 sm:$0xff]  }
  0x46   :  { %7445 = vmatprep.mubr.bf16.mxu0 %v12324_v43 }
  0x47   :  { %7158 = vmatpush1.bf16.msra.mxu1 %v10298_v14  ;;  %v10384_v14 = vld [vmem:[%s15845_s1 + $0x5d4] ss:$24 sps:$4 sm:$0xff]  }
  0x48   :  { %7416 = vmatpush1.bf16.msra.mxu0 %v10301_v15  ;;  %7159 = vmatprep.subr.bf16.mxu1 %v10306_v16  ;;  %v10387_v15 = vld [vmem:[%s15845_s1 + $0x17d4] ss:$24 sps:$4 sm:$0xff]   ;;  %v10382_v16 = vld [vmem:[%s15845_s1 + $0x5d0] ss:$24 sps:$4 sm:$0xff]  }
  0x49   :  { %7417 = vmatprep.subr.bf16.mxu0 %v10309_v17  ;;  %v10385_v17 = vld [vmem:[%s15845_s1 + $0x17d0] ss:$24 sps:$4 sm:$0xff]  }
  0x4b   :  { %7160 = vmatpush1.bf16.msra.mxu1 %v10304_v18  ;;  %v10390_v18 = vld [vmem:[%s15845_s1 + $0x604] ss:$24 sps:$4 sm:$0xff]  }
  0x4c   :  { %7418 = vmatpush1.bf16.msra.mxu0 %v10307_v19  ;;  %7161 = vmatprep.subr.bf16.mxu1 %v10312_v20  ;;  %v10393_v19 = vld [vmem:[%s15845_s1 + $0x1804] ss:$24 sps:$4 sm:$0xff]   ;;  %v12437_v20 = vcombine.low %v12294_v36, %v12299_v37  ;;  %v10400_v36 = vld [vmem:[%s15845_s1 + $0x660] ss:$24 sps:$4 sm:$0xff]  }
  0x4d   :  { %7419 = vmatprep.subr.bf16.mxu0 %v10315_v21  ;;  %v10388_v21 = vld [vmem:[%s15845_s1 + $0x600] ss:$24 sps:$4 sm:$0xff]  }
  0x4e   :  { %v10403_v37 = vld [vmem:[%s15845_s1 + $0x1860] ss:$24 sps:$4 sm:$0xff]  }
  0x4f   :  { %7162 = vmatpush1.bf16.msra.mxu1 %v10310_v22  ;;  %v12444_v22 = vcombine.low %v12314_v41, %v12319_v42  ;;  %v10406_v41 = vld [vmem:[%s15845_s1 + $0x690] ss:$24 sps:$4 sm:$0xff]  }
  0x50   :  { %7420 = vmatpush1.bf16.msra.mxu0 %v10313_v23  ;;  %7163 = vmatprep.subr.bf16.mxu1 %v10318_v24  ;;  %v10391_v23 = vld [vmem:[%s15845_s1 + $0x1800] ss:$24 sps:$4 sm:$0xff]   ;;  %v10396_v24 = vld [vmem:[%s15845_s1 + $0x634] ss:$24 sps:$4 sm:$0xff]   ;;  %v10409_v42 = vld [vmem:[%s15845_s1 + $0x1890] ss:$24 sps:$4 sm:$0xff]  }
  0x51   :  { %7421 = vmatprep.subr.bf16.mxu0 %v10321_v25  ;;  %v10399_v25 = vld [vmem:[%s15845_s1 + $0x1834] ss:$24 sps:$4 sm:$0xff]  }
  0x53   :  { %7164 = vmatpush1.bf16.msra.mxu1 %v10316_v26  ;;  %v10394_v26 = vld [vmem:[%s15845_s1 + $0x630] ss:$24 sps:$4 sm:$0xff]  }
  0x54   :  { %7422 = vmatpush1.bf16.msra.mxu0 %v10319_v27  ;;  %7165 = vmatprep.subr.bf16.mxu1 %v10324_v28  ;;  %v10397_v27 = vld [vmem:[%s15845_s1 + $0x1830] ss:$24 sps:$4 sm:$0xff]  }
  0x55   :  { %7423 = vmatprep.subr.bf16.mxu0 %v10327_v29  ;;  %v12464_v28 = vld [vmem:[%s15844_s0 + $0x10] sm:$0xff] }
  0x56   :  { %v12471_v29 = vld [vmem:[%s15844_s0 + $0x70] sm:$0xff] }
  0x57   :  { %7166 = vmatpush1.bf16.msra.mxu1 %v10322_v30  ;;  %v10402_v30 = vld [vmem:[%s15845_s1 + $0x664] ss:$24 sps:$4 sm:$0xff]  }
  0x58   :  { %7424 = vmatpush1.bf16.msra.mxu0 %v10325_v31  ;;  %7167 = vmatprep.subr.bf16.mxu1 %v10330_v32  ;;  %v10405_v31 = vld [vmem:[%s15845_s1 + $0x1864] ss:$24 sps:$4 sm:$0xff]   ;;  %v12481_v32 = vcombine.high %v12464_v28, %v12471_v29 }
  0x59   :  { %7425 = vmatprep.subr.bf16.mxu0 %v10333_v33  ;;  %v12486_v33 = vld [vmem:[%s15844_s0 + $0x40] sm:$0xff] }
  0x5b   :  { %7168 = vmatpush1.bf16.msra.mxu1 %v10328_v34  ;;  %v12491_v34 = vld [vmem:[%s15844_s0 + $0xa0] sm:$0xff] }
  0x5c   :  { %7426 = vmatpush1.bf16.msra.mxu0 %v10331_v35  ;;  %7169 = vmatprep.subr.bf16.mxu1 %v10336_v38  ;;  %v12496_v35 = vcombine.high %v12486_v33, %v12491_v34  ;;  %v10408_v38 = vld [vmem:[%s15845_s1 + $0x694] ss:$24 sps:$4 sm:$0xff]  }
  0x5d   :  { %7427 = vmatprep.subr.bf16.mxu0 %v10339_v39  ;;  %v10411_v39 = vld [vmem:[%s15845_s1 + $0x1894] ss:$24 sps:$4 sm:$0xff]  }
  0x5f   :  { %7170 = vmatpush1.bf16.msra.mxu1 %v10334_v44  ;;  %v10414_v44 = vld [vmem:[%s15845_s1 + $0x6c4] ss:$24 sps:$4 sm:$0xff]  }
  0x60   :  { %7428 = vmatpush1.bf16.msra.mxu0 %v10337_v45  ;;  %7171 = vmatprep.subr.bf16.mxu1 %v10342_v46  ;;  %v10417_v45 = vld [vmem:[%s15845_s1 + $0x18c4] ss:$24 sps:$4 sm:$0xff]   ;;  %v10412_v46 = vld [vmem:[%s15845_s1 + $0x6c0] ss:$24 sps:$4 sm:$0xff]  }
  0x61   :  { %7429 = vmatprep.subr.bf16.mxu0 %v10345_v47  ;;  %v10415_v47 = vld [vmem:[%s15845_s1 + $0x18c0] ss:$24 sps:$4 sm:$0xff]  }
  0x63   :  { %7172 = vmatpush1.bf16.msra.mxu1 %v10340_v48  ;;  %v10420_v48 = vld [vmem:[%s15845_s1 + $0x6f4] ss:$24 sps:$4 sm:$0xff]  }
  0x64   :  { %7430 = vmatpush1.bf16.msra.mxu0 %v10343_v49  ;;  %7173 = vmatprep.subr.bf16.mxu1 %v10348_v50  ;;  %v10423_v49 = vld [vmem:[%s15845_s1 + $0x18f4] ss:$24 sps:$4 sm:$0xff]   ;;  %v10418_v50 = vld [vmem:[%s15845_s1 + $0x6f0] ss:$24 sps:$4 sm:$0xff]  }
  0x65   :  { %7431 = vmatprep.subr.bf16.mxu0 %v10351_v51  ;;  %v10421_v51 = vld [vmem:[%s15845_s1 + $0x18f0] ss:$24 sps:$4 sm:$0xff]  }
  0x67   :  { %7174 = vmatpush1.bf16.msra.mxu1 %v10346_v53  ;;  %v10426_v53 = vld [vmem:[%s15845_s1 + $0x724] ss:$24 sps:$4 sm:$0xff]  }
  0x68   :  { %7432 = vmatpush1.bf16.msra.mxu0 %v10349_v54  ;;  %7175 = vmatprep.subr.bf16.mxu1 %v10354_v56  ;;  %v10429_v54 = vld [vmem:[%s15845_s1 + $0x1924] ss:$24 sps:$4 sm:$0xff]   ;;  %v10424_v56 = vld [vmem:[%s15845_s1 + $0x720] ss:$24 sps:$4 sm:$0xff]  }
  0x69   :  { %7433 = vmatprep.subr.bf16.mxu0 %v10357_v57  ;;  %v10427_v57 = vld [vmem:[%s15845_s1 + $0x1920] ss:$24 sps:$4 sm:$0xff]  }
  0x6b   :  { %7176 = vmatpush1.bf16.msra.mxu1 %v10352_v58  ;;  %v10432_v58 = vld [vmem:[%s15845_s1 + $0x754] ss:$24 sps:$4 sm:$0xff]  }
  0x6c   :  { %7434 = vmatpush1.bf16.msra.mxu0 %v10355_v59  ;;  %7177 = vmatprep.subr.bf16.mxu1 %v10360_v60  ;;  %v10435_v59 = vld [vmem:[%s15845_s1 + $0x1954] ss:$24 sps:$4 sm:$0xff]   ;;  %v10430_v60 = vld [vmem:[%s15845_s1 + $0x750] ss:$24 sps:$4 sm:$0xff]  }
  0x6d   :  { %7435 = vmatprep.subr.bf16.mxu0 %v10363_v61  ;;  %v10433_v61 = vld [vmem:[%s15845_s1 + $0x1950] ss:$24 sps:$4 sm:$0xff]  }
  0x6f   :  { %7178 = vmatpush1.bf16.msra.mxu1 %v10358_v62  ;;  %v10438_v62 = vld [vmem:[%s15845_s1 + $0x784] ss:$24 sps:$4 sm:$0xff]  }
  0x70   :  { %7436 = vmatpush1.bf16.msra.mxu0 %v10361_v63  ;;  %7179 = vmatprep.subr.bf16.mxu1 %v10366_v0  ;;  %v10441_v63 = vld [vmem:[%s15845_s1 + $0x1984] ss:$24 sps:$4 sm:$0xff]   ;;  %v10436_v0 = vld [vmem:[%s15845_s1 + $0x780] ss:$24 sps:$4 sm:$0xff]  }
  0x71   :  { %7437 = vmatprep.subr.bf16.mxu0 %v10369_v1  ;;  %v10439_v1 = vld [vmem:[%s15845_s1 + $0x1980] ss:$24 sps:$4 sm:$0xff]  }
  0x73   :  { %7180 = vmatpush1.bf16.msra.mxu1 %v10364_v2  ;;  %v10444_v2 = vld [vmem:[%s15845_s1 + $0x7b4] ss:$24 sps:$4 sm:$0xff]  }
  0x74   :  { %7438 = vmatpush1.bf16.msra.mxu0 %v10367_v3  ;;  %7181 = vmatprep.subr.bf16.mxu1 %v10372_v4  ;;  %v10447_v3 = vld [vmem:[%s15845_s1 + $0x19b4] ss:$24 sps:$4 sm:$0xff]   ;;  %v10442_v4 = vld [vmem:[%s15845_s1 + $0x7b0] ss:$24 sps:$4 sm:$0xff]  }
  0x75   :  { %7439 = vmatprep.subr.bf16.mxu0 %v10375_v5  ;;  %v10445_v5 = vld [vmem:[%s15845_s1 + $0x19b0] ss:$24 sps:$4 sm:$0xff]  }
  0x77   :  { %7182 = vmatpush1.bf16.msra.mxu1 %v10370_v6  ;;  %v10450_v6 = vld [vmem:[%s15845_s1 + $0x7e4] ss:$24 sps:$4 sm:$0xff]  }
  0x78   :  { %7440 = vmatpush1.bf16.msra.mxu0 %v10373_v7  ;;  %7183 = vmatprep.subr.bf16.mxu1 %v10378_v8  ;;  %v10453_v7 = vld [vmem:[%s15845_s1 + $0x19e4] ss:$24 sps:$4 sm:$0xff]   ;;  %v10448_v8 = vld [vmem:[%s15845_s1 + $0x7e0] ss:$24 sps:$4 sm:$0xff]  }
  0x79   :  { %7441 = vmatprep.subr.bf16.mxu0 %v10381_v9  ;;  %v10451_v9 = vld [vmem:[%s15845_s1 + $0x19e0] ss:$24 sps:$4 sm:$0xff]  }
  0x7b   :  { %7184 = vmatpush1.bf16.msra.mxu1 %v10376_v12  ;;  %v10456_v12 = vld [vmem:[%s15845_s1 + $0x814] ss:$24 sps:$4 sm:$0xff]  }
  0x7c   :  { %7442 = vmatpush1.bf16.msra.mxu0 %v10379_v13  ;;  %7185 = vmatprep.subr.bf16.mxu1 %v10384_v14  ;;  %v10459_v13 = vld [vmem:[%s15845_s1 + $0x1a14] ss:$24 sps:$4 sm:$0xff]   ;;  %v10454_v14 = vld [vmem:[%s15845_s1 + $0x810] ss:$24 sps:$4 sm:$0xff]  }
  0x7d   :  { %7443 = vmatprep.subr.bf16.mxu0 %v10387_v15  ;;  %v10457_v15 = vld [vmem:[%s15845_s1 + $0x1a10] ss:$24 sps:$4 sm:$0xff]  }
  0x7f   :  { %7186 = vmatpush1.bf16.msra.mxu1 %v10382_v16  ;;  %v10462_v16 = vld [vmem:[%s15845_s1 + $0x844] ss:$24 sps:$4 sm:$0xff]  }
  0x80   :  { %7444 = vmatpush1.bf16.msra.mxu0 %v10385_v17  ;;  %7198 = vmatprep.subr.bf16.mxu1 %v10390_v18  ;;  %v10465_v17 = vld [vmem:[%s15845_s1 + $0x1a44] ss:$24 sps:$4 sm:$0xff]   ;;  %v10460_v18 = vld [vmem:[%s15845_s1 + $0x840] ss:$24 sps:$4 sm:$0xff]  }
  0x81   :  { %7456 = vmatprep.subr.bf16.mxu0 %v10393_v19  ;;  %v10463_v19 = vld [vmem:[%s15845_s1 + $0x1a40] ss:$24 sps:$4 sm:$0xff]  }
  0x82   :  { %7188 = vmatmul.mubr.bf16.vlgmr.msra.gmra.mrb[0].mxu1 %v12437_v20 }
  0x83   :  { %7446 = vmatmul.mubr.bf16.vlgmr.msra.gmra.mrb[0].mxu0 %v12444_v22  ;;  %7199 = vmatpush1.bf16.msra.mxu1 %v10388_v21  ;;  %v10468_v21 = vld [vmem:[%s15845_s1 + $0x874] ss:$24 sps:$4 sm:$0xff]  }
  0x84   :  { %7457 = vmatpush1.bf16.msra.mxu0 %v10391_v23  ;;  %7200 = vmatprep.subr.bf16.mxu1 %v10396_v24  ;;  %v10471_v23 = vld [vmem:[%s15845_s1 + $0x1a74] ss:$24 sps:$4 sm:$0xff]   ;;  %v10466_v24 = vld [vmem:[%s15845_s1 + $0x870] ss:$24 sps:$4 sm:$0xff]  }
  0x85   :  { %7458 = vmatprep.subr.bf16.mxu0 %v10399_v25  ;;  %7230 = vmatprep.mubr.bf16.mxu1 %v12481_v32  ;;  %v10469_v25 = vld [vmem:[%s15845_s1 + $0x1a70] ss:$24 sps:$4 sm:$0xff]  }
  0x86   :  { %7488 = vmatprep.mubr.bf16.mxu0 %v12496_v35 }
  0x87   :  { %7201 = vmatpush1.bf16.msra.mxu1 %v10394_v26  ;;  %v10474_v26 = vld [vmem:[%s15845_s1 + $0x8a4] ss:$24 sps:$4 sm:$0xff]  }
  0x88   :  { %7459 = vmatpush1.bf16.msra.mxu0 %v10397_v27  ;;  %7202 = vmatprep.subr.bf16.mxu1 %v10402_v30  ;;  %v10477_v27 = vld [vmem:[%s15845_s1 + $0x1aa4] ss:$24 sps:$4 sm:$0xff]   ;;  %v10472_v30 = vld [vmem:[%s15845_s1 + $0x8a0] ss:$24 sps:$4 sm:$0xff]  }
  0x89   :  { %7460 = vmatprep.subr.bf16.mxu0 %v10405_v31  ;;  %v10475_v31 = vld [vmem:[%s15845_s1 + $0x1aa0] ss:$24 sps:$4 sm:$0xff]  }
  0x8b   :  { %7203 = vmatpush1.bf16.msra.mxu1 %v10400_v36  ;;  %v10480_v36 = vld [vmem:[%s15845_s1 + $0x8d4] ss:$24 sps:$4 sm:$0xff]  }
  0x8c   :  { %7461 = vmatpush1.bf16.msra.mxu0 %v10403_v37  ;;  %7204 = vmatprep.subr.bf16.mxu1 %v10408_v38  ;;  %v10483_v37 = vld [vmem:[%s15845_s1 + $0x1ad4] ss:$24 sps:$4 sm:$0xff]   ;;  %v10478_v38 = vld [vmem:[%s15845_s1 + $0x8d0] ss:$24 sps:$4 sm:$0xff]  }
  0x8d   :  { %7462 = vmatprep.subr.bf16.mxu0 %v10411_v39  ;;  %v10481_v39 = vld [vmem:[%s15845_s1 + $0x1ad0] ss:$24 sps:$4 sm:$0xff]  }
  0x8f   :  { %7205 = vmatpush1.bf16.msra.mxu1 %v10406_v41  ;;  %v10486_v41 = vld [vmem:[%s15845_s1 + $0x904] ss:$24 sps:$4 sm:$0xff]  }
  0x90   :  { %7463 = vmatpush1.bf16.msra.mxu0 %v10409_v42  ;;  %7206 = vmatprep.subr.bf16.mxu1 %v10414_v44  ;;  %v10489_v42 = vld [vmem:[%s15845_s1 + $0x1b04] ss:$24 sps:$4 sm:$0xff]   ;;  %v10484_v44 = vld [vmem:[%s15845_s1 + $0x900] ss:$24 sps:$4 sm:$0xff]  }
  0x91   :  { %7464 = vmatprep.subr.bf16.mxu0 %v10417_v45  ;;  %v10487_v45 = vld [vmem:[%s15845_s1 + $0x1b00] ss:$24 sps:$4 sm:$0xff]  }
  0x93   :  { %7207 = vmatpush1.bf16.msra.mxu1 %v10412_v46  ;;  %v12676_v46 = vld [vmem:[%s15844_s0 + $0x18] sm:$0xff] }
  0x94   :  { %7465 = vmatpush1.bf16.msra.mxu0 %v10415_v47  ;;  %7208 = vmatprep.subr.bf16.mxu1 %v10420_v48  ;;  %v12681_v47 = vld [vmem:[%s15844_s0 + $0x78] sm:$0xff]  ;;  %v12685_v48 = vcombine.low %v12464_v28, %v12471_v29  ;;  %v10492_v28 = vld [vmem:[%s15845_s1 + $0x934] ss:$24 sps:$4 sm:$0xff]  }
  0x95   :  { %7466 = vmatprep.subr.bf16.mxu0 %v10423_v49  ;;  %v12689_v49 = vcombine.low %v12486_v33, %v12491_v34  ;;  %v10495_v29 = vld [vmem:[%s15845_s1 + $0x1b34] ss:$24 sps:$4 sm:$0xff]   ;;  %v12709_v33 = vcombine.high %v12676_v46, %v12681_v47 }
  0x97   :  { %7209 = vmatpush1.bf16.msra.mxu1 %v10418_v50  ;;  %v12694_v50 = vld [vmem:[%s15844_s0 + $0x48] sm:$0xff] }
  0x98   :  { %7467 = vmatpush1.bf16.msra.mxu0 %v10421_v51  ;;  %7210 = vmatprep.subr.bf16.mxu1 %v10426_v53  ;;  %v12699_v51 = vld [vmem:[%s15844_s0 + $0xa8] sm:$0xff] }
  0x99   :  { %7468 = vmatprep.subr.bf16.mxu0 %v10429_v54  ;;  %v12713_v34 = vcombine.high %v12694_v50, %v12699_v51  ;;  %v10490_v53 = vld [vmem:[%s15845_s1 + $0x930] ss:$24 sps:$4 sm:$0xff]  }
  0x9a   :  { %v10493_v54 = vld [vmem:[%s15845_s1 + $0x1b30] ss:$24 sps:$4 sm:$0xff]  }
  0x9b   :  { %7211 = vmatpush1.bf16.msra.mxu1 %v10424_v56  ;;  %v10498_v56 = vld [vmem:[%s15845_s1 + $0x964] ss:$24 sps:$4 sm:$0xff]  }
  0x9c   :  { %7469 = vmatpush1.bf16.msra.mxu0 %v10427_v57  ;;  %7212 = vmatprep.subr.bf16.mxu1 %v10432_v58  ;;  %v10501_v57 = vld [vmem:[%s15845_s1 + $0x1b64] ss:$24 sps:$4 sm:$0xff]   ;;  %v10496_v58 = vld [vmem:[%s15845_s1 + $0x960] ss:$24 sps:$4 sm:$0xff]  }
  0x9d   :  { %7470 = vmatprep.subr.bf16.mxu0 %v10435_v59  ;;  %v10499_v59 = vld [vmem:[%s15845_s1 + $0x1b60] ss:$24 sps:$4 sm:$0xff]  }
  0x9f   :  { %7213 = vmatpush1.bf16.msra.mxu1 %v10430_v60  ;;  %v10504_v60 = vld [vmem:[%s15845_s1 + $0x994] ss:$24 sps:$4 sm:$0xff]  }
  0xa0   :  { %7471 = vmatpush1.bf16.msra.mxu0 %v10433_v61  ;;  %7214 = vmatprep.subr.bf16.mxu1 %v10438_v62  ;;  %v10507_v61 = vld [vmem:[%s15845_s1 + $0x1b94] ss:$24 sps:$4 sm:$0xff]   ;;  %v10502_v62 = vld [vmem:[%s15845_s1 + $0x990] ss:$24 sps:$4 sm:$0xff]  }
  0xa1   :  { %7472 = vmatprep.subr.bf16.mxu0 %v10441_v63  ;;  %v10505_v63 = vld [vmem:[%s15845_s1 + $0x1b90] ss:$24 sps:$4 sm:$0xff]  }
  0xa3   :  { %7215 = vmatpush1.bf16.msra.mxu1 %v10436_v0  ;;  %v10510_v0 = vld [vmem:[%s15845_s1 + $0x9c4] ss:$24 sps:$4 sm:$0xff]  }
  0xa4   :  { %7473 = vmatpush1.bf16.msra.mxu0 %v10439_v1  ;;  %7216 = vmatprep.subr.bf16.mxu1 %v10444_v2  ;;  %v10513_v1 = vld [vmem:[%s15845_s1 + $0x1bc4] ss:$24 sps:$4 sm:$0xff]   ;;  %v10508_v2 = vld [vmem:[%s15845_s1 + $0x9c0] ss:$24 sps:$4 sm:$0xff]  }
  0xa5   :  { %7474 = vmatprep.subr.bf16.mxu0 %v10447_v3  ;;  %v10511_v3 = vld [vmem:[%s15845_s1 + $0x1bc0] ss:$24 sps:$4 sm:$0xff]  }
  0xa7   :  { %7217 = vmatpush1.bf16.msra.mxu1 %v10442_v4  ;;  %v10516_v4 = vld [vmem:[%s15845_s1 + $0x9f4] ss:$24 sps:$4 sm:$0xff]  }
  0xa8   :  { %7475 = vmatpush1.bf16.msra.mxu0 %v10445_v5  ;;  %7218 = vmatprep.subr.bf16.mxu1 %v10450_v6  ;;  %v10519_v5 = vld [vmem:[%s15845_s1 + $0x1bf4] ss:$24 sps:$4 sm:$0xff]   ;;  %v10514_v6 = vld [vmem:[%s15845_s1 + $0x9f0] ss:$24 sps:$4 sm:$0xff]  }
  0xa9   :  { %7476 = vmatprep.subr.bf16.mxu0 %v10453_v7  ;;  %v10517_v7 = vld [vmem:[%s15845_s1 + $0x1bf0] ss:$24 sps:$4 sm:$0xff]  }
  0xab   :  { %7219 = vmatpush1.bf16.msra.mxu1 %v10448_v8  ;;  %v10522_v8 = vld [vmem:[%s15845_s1 + $0xa24] ss:$24 sps:$4 sm:$0xff]  }
  0xac   :  { %7477 = vmatpush1.bf16.msra.mxu0 %v10451_v9  ;;  %7220 = vmatprep.subr.bf16.mxu1 %v10456_v12  ;;  %v10525_v9 = vld [vmem:[%s15845_s1 + $0x1c24] ss:$24 sps:$4 sm:$0xff]   ;;  %v10520_v12 = vld [vmem:[%s15845_s1 + $0xa20] ss:$24 sps:$4 sm:$0xff]  }
  0xad   :  { %7478 = vmatprep.subr.bf16.mxu0 %v10459_v13  ;;  %v10523_v13 = vld [vmem:[%s15845_s1 + $0x1c20] ss:$24 sps:$4 sm:$0xff]  }
  0xaf   :  { %7221 = vmatpush1.bf16.msra.mxu1 %v10454_v14  ;;  %v10528_v14 = vld [vmem:[%s15845_s1 + $0xa54] ss:$24 sps:$4 sm:$0xff]  }
  0xb0   :  { %7479 = vmatpush1.bf16.msra.mxu0 %v10457_v15  ;;  %7222 = vmatprep.subr.bf16.mxu1 %v10462_v16  ;;  %v10531_v15 = vld [vmem:[%s15845_s1 + $0x1c54] ss:$24 sps:$4 sm:$0xff]   ;;  %v10526_v16 = vld [vmem:[%s15845_s1 + $0xa50] ss:$24 sps:$4 sm:$0xff]  }
  0xb1   :  { %7480 = vmatprep.subr.bf16.mxu0 %v10465_v17  ;;  %v10529_v17 = vld [vmem:[%s15845_s1 + $0x1c50] ss:$24 sps:$4 sm:$0xff]  }
  0xb3   :  { %7223 = vmatpush1.bf16.msra.mxu1 %v10460_v18  ;;  %v10534_v18 = vld [vmem:[%s15845_s1 + $0xa84] ss:$24 sps:$4 sm:$0xff]  }
  0xb4   :  { %7481 = vmatpush1.bf16.msra.mxu0 %v10463_v19  ;;  %7224 = vmatprep.subr.bf16.mxu1 %v10468_v21  ;;  %v10537_v19 = vld [vmem:[%s15845_s1 + $0x1c84] ss:$24 sps:$4 sm:$0xff]   ;;  %v10532_v21 = vld [vmem:[%s15845_s1 + $0xa80] ss:$24 sps:$4 sm:$0xff]  }
  0xb5   :  { %7482 = vmatprep.subr.bf16.mxu0 %v10471_v23  ;;  %v10535_v23 = vld [vmem:[%s15845_s1 + $0x1c80] ss:$24 sps:$4 sm:$0xff]  }
  0xb7   :  { %7225 = vmatpush1.bf16.msra.mxu1 %v10466_v24  ;;  %v10540_v24 = vld [vmem:[%s15845_s1 + $0xab4] ss:$24 sps:$4 sm:$0xff]  }
  0xb8   :  { %7483 = vmatpush1.bf16.msra.mxu0 %v10469_v25  ;;  %7226 = vmatprep.subr.bf16.mxu1 %v10474_v26  ;;  %v10543_v25 = vld [vmem:[%s15845_s1 + $0x1cb4] ss:$24 sps:$4 sm:$0xff]   ;;  %v10538_v26 = vld [vmem:[%s15845_s1 + $0xab0] ss:$24 sps:$4 sm:$0xff]  }
  0xb9   :  { %7484 = vmatprep.subr.bf16.mxu0 %v10477_v27  ;;  %v10541_v27 = vld [vmem:[%s15845_s1 + $0x1cb0] ss:$24 sps:$4 sm:$0xff]  }
  0xbb   :  { %7227 = vmatpush1.bf16.msra.mxu1 %v10472_v30  ;;  %v10546_v30 = vld [vmem:[%s15845_s1 + $0xae4] ss:$24 sps:$4 sm:$0xff]  }
  0xbc   :  { %7485 = vmatpush1.bf16.msra.mxu0 %v10475_v31  ;;  %7228 = vmatprep.subr.bf16.mxu1 %v10480_v36  ;;  %v10549_v31 = vld [vmem:[%s15845_s1 + $0x1ce4] ss:$24 sps:$4 sm:$0xff]   ;;  %v10544_v36 = vld [vmem:[%s15845_s1 + $0xae0] ss:$24 sps:$4 sm:$0xff]  }
  0xbd   :  { %7486 = vmatprep.subr.bf16.mxu0 %v10483_v37  ;;  %v10547_v37 = vld [vmem:[%s15845_s1 + $0x1ce0] ss:$24 sps:$4 sm:$0xff]  }
  0xbf   :  { %7229 = vmatpush1.bf16.msra.mxu1 %v10478_v38  ;;  %v10552_v38 = vld [vmem:[%s15845_s1 + $0xb14] ss:$24 sps:$4 sm:$0xff]  }
  0xc0   :  { %7487 = vmatpush1.bf16.msra.mxu0 %v10481_v39  ;;  %7241 = vmatprep.subr.bf16.mxu1 %v10486_v41  ;;  %v10555_v39 = vld [vmem:[%s15845_s1 + $0x1d14] ss:$24 sps:$4 sm:$0xff]   ;;  %v10550_v41 = vld [vmem:[%s15845_s1 + $0xb10] ss:$24 sps:$4 sm:$0xff]  }
  0xc1   :  { %7499 = vmatprep.subr.bf16.mxu0 %v10489_v42  ;;  %v10553_v42 = vld [vmem:[%s15845_s1 + $0x1d10] ss:$24 sps:$4 sm:$0xff]  }
  0xc2   :  { %7231 = vmatmul.mubr.bf16.vlgmr.msra.gmra.mrb[0].mxu1 %v12685_v48 }
  0xc3   :  { %7489 = vmatmul.mubr.bf16.vlgmr.msra.gmra.mrb[0].mxu0 %v12689_v49  ;;  %7242 = vmatpush1.bf16.msra.mxu1 %v10484_v44  ;;  %v10558_v44 = vld [vmem:[%s15845_s1 + $0xb44] ss:$24 sps:$4 sm:$0xff]  }
  0xc4   :  { %7500 = vmatpush1.bf16.msra.mxu0 %v10487_v45  ;;  %7243 = vmatprep.subr.bf16.mxu1 %v10492_v28  ;;  %v10561_v45 = vld [vmem:[%s15845_s1 + $0x1d44] ss:$24 sps:$4 sm:$0xff]   ;;  %v10556_v28 = vld [vmem:[%s15845_s1 + $0xb40] ss:$24 sps:$4 sm:$0xff]  }
  0xc5   :  { %7501 = vmatprep.subr.bf16.mxu0 %v10495_v29  ;;  %7273 = vmatprep.mubr.bf16.mxu1 %v12709_v33  ;;  %v10559_v29 = vld [vmem:[%s15845_s1 + $0x1d40] ss:$24 sps:$4 sm:$0xff]  }
  0xc6   :  { %7531 = vmatprep.mubr.bf16.mxu0 %v12713_v34 }
  0xc7   :  { %7244 = vmatpush1.bf16.msra.mxu1 %v10490_v53  ;;  %v10564_v53 = vld [vmem:[%s15845_s1 + $0xb74] ss:$24 sps:$4 sm:$0xff]  }
  0xc8   :  { %7502 = vmatpush1.bf16.msra.mxu0 %v10493_v54  ;;  %7245 = vmatprep.subr.bf16.mxu1 %v10498_v56  ;;  %v10567_v54 = vld [vmem:[%s15845_s1 + $0x1d74] ss:$24 sps:$4 sm:$0xff]   ;;  %v10562_v56 = vld [vmem:[%s15845_s1 + $0xb70] ss:$24 sps:$4 sm:$0xff]  }
  0xc9   :  { %7503 = vmatprep.subr.bf16.mxu0 %v10501_v57  ;;  %v10565_v57 = vld [vmem:[%s15845_s1 + $0x1d70] ss:$24 sps:$4 sm:$0xff]  }
  0xcb   :  { %7246 = vmatpush1.bf16.msra.mxu1 %v10496_v58  ;;  %v10570_v58 = vld [vmem:[%s15845_s1 + $0xba4] ss:$24 sps:$4 sm:$0xff]  }
  0xcc   :  { %7504 = vmatpush1.bf16.msra.mxu0 %v10499_v59  ;;  %7247 = vmatprep.subr.bf16.mxu1 %v10504_v60  ;;  %v10573_v59 = vld [vmem:[%s15845_s1 + $0x1da4] ss:$24 sps:$4 sm:$0xff]   ;;  %v10568_v60 = vld [vmem:[%s15845_s1 + $0xba0] ss:$24 sps:$4 sm:$0xff]  }
  0xcd   :  { %7505 = vmatprep.subr.bf16.mxu0 %v10507_v61  ;;  %v10571_v61 = vld [vmem:[%s15845_s1 + $0x1da0] ss:$24 sps:$4 sm:$0xff]  }
  0xcf   :  { %7248 = vmatpush1.bf16.msra.mxu1 %v10502_v62  ;;  %v10576_v62 = vld [vmem:[%s15845_s1 + $0xbd4] ss:$24 sps:$4 sm:$0xff]  }
  0xd0   :  { %7506 = vmatpush1.bf16.msra.mxu0 %v10505_v63  ;;  %7249 = vmatprep.subr.bf16.mxu1 %v10510_v0  ;;  %v10579_v63 = vld [vmem:[%s15845_s1 + $0x1dd4] ss:$24 sps:$4 sm:$0xff]   ;;  %v10574_v0 = vld [vmem:[%s15845_s1 + $0xbd0] ss:$24 sps:$4 sm:$0xff]  }
  0xd1   :  { %7507 = vmatprep.subr.bf16.mxu0 %v10513_v1  ;;  %v10577_v1 = vld [vmem:[%s15845_s1 + $0x1dd0] ss:$24 sps:$4 sm:$0xff]  }
  0xd3   :  { %7250 = vmatpush1.bf16.msra.mxu1 %v10508_v2  ;;  %v10582_v2 = vld [vmem:[%s15845_s1 + $0xc04] ss:$24 sps:$4 sm:$0xff]  }
  0xd4   :  { %7508 = vmatpush1.bf16.msra.mxu0 %v10511_v3  ;;  %7251 = vmatprep.subr.bf16.mxu1 %v10516_v4  ;;  %v10585_v3 = vld [vmem:[%s15845_s1 + $0x1e04] ss:$24 sps:$4 sm:$0xff]   ;;  %v10580_v4 = vld [vmem:[%s15845_s1 + $0xc00] ss:$24 sps:$4 sm:$0xff]  }
  0xd5   :  { %7509 = vmatprep.subr.bf16.mxu0 %v10519_v5  ;;  %v10583_v5 = vld [vmem:[%s15845_s1 + $0x1e00] ss:$24 sps:$4 sm:$0xff]  }
  0xd7   :  { %7252 = vmatpush1.bf16.msra.mxu1 %v10514_v6  ;;  %v12908_v6 = vld [vmem:[%s15844_s0 + $0x20] sm:$0xff] }
  0xd8   :  { %7510 = vmatpush1.bf16.msra.mxu0 %v10517_v7  ;;  %7253 = vmatprep.subr.bf16.mxu1 %v10522_v8  ;;  %v12913_v7 = vld [vmem:[%s15844_s0 + $0x80] sm:$0xff]  ;;  %v12917_v8 = vcombine.low %v12676_v46, %v12681_v47  ;;  %v10588_v46 = vld [vmem:[%s15845_s1 + $0xc34] ss:$24 sps:$4 sm:$0xff]  }
  0xd9   :  { %7511 = vmatprep.subr.bf16.mxu0 %v10525_v9  ;;  %v12921_v9 = vcombine.low %v12694_v50, %v12699_v51  ;;  %v10591_v47 = vld [vmem:[%s15845_s1 + $0x1e34] ss:$24 sps:$4 sm:$0xff]   ;;  %v12941_v50 = vcombine.high %v12908_v6, %v12913_v7 }
  0xdb   :  { %7254 = vmatpush1.bf16.msra.mxu1 %v10520_v12  ;;  %v12926_v12 = vld [vmem:[%s15844_s0 + $0x50] sm:$0xff] }
  0xdc   :  { %7512 = vmatpush1.bf16.msra.mxu0 %v10523_v13  ;;  %7255 = vmatprep.subr.bf16.mxu1 %v10528_v14  ;;  %v12931_v13 = vld [vmem:[%s15844_s0 + $0xb0] sm:$0xff] }
  0xdd   :  { %7513 = vmatprep.subr.bf16.mxu0 %v10531_v15  ;;  %v12945_v51 = vcombine.high %v12926_v12, %v12931_v13  ;;  %v10586_v14 = vld [vmem:[%s15845_s1 + $0xc30] ss:$24 sps:$4 sm:$0xff]  }
  0xde   :  { %v10589_v15 = vld [vmem:[%s15845_s1 + $0x1e30] ss:$24 sps:$4 sm:$0xff]  }
  0xdf   :  { %7256 = vmatpush1.bf16.msra.mxu1 %v10526_v16  ;;  %v10594_v16 = vld [vmem:[%s15845_s1 + $0xc64] ss:$24 sps:$4 sm:$0xff]  }
  0xe0   :  { %7514 = vmatpush1.bf16.msra.mxu0 %v10529_v17  ;;  %7257 = vmatprep.subr.bf16.mxu1 %v10534_v18  ;;  %v10597_v17 = vld [vmem:[%s15845_s1 + $0x1e64] ss:$24 sps:$4 sm:$0xff]   ;;  %v10592_v18 = vld [vmem:[%s15845_s1 + $0xc60] ss:$24 sps:$4 sm:$0xff]  }
  0xe1   :  { %7515 = vmatprep.subr.bf16.mxu0 %v10537_v19  ;;  %v10595_v19 = vld [vmem:[%s15845_s1 + $0x1e60] ss:$24 sps:$4 sm:$0xff]  }
  0xe3   :  { %7258 = vmatpush1.bf16.msra.mxu1 %v10532_v21  ;;  %v10600_v21 = vld [vmem:[%s15845_s1 + $0xc94] ss:$24 sps:$4 sm:$0xff]  }
  0xe4   :  { %7516 = vmatpush1.bf16.msra.mxu0 %v10535_v23  ;;  %7259 = vmatprep.subr.bf16.mxu1 %v10540_v24  ;;  %v10603_v23 = vld [vmem:[%s15845_s1 + $0x1e94] ss:$24 sps:$4 sm:$0xff]   ;;  %v10598_v24 = vld [vmem:[%s15845_s1 + $0xc90] ss:$24 sps:$4 sm:$0xff]  }
  0xe5   :  { %7517 = vmatprep.subr.bf16.mxu0 %v10543_v25  ;;  %v10601_v25 = vld [vmem:[%s15845_s1 + $0x1e90] ss:$24 sps:$4 sm:$0xff]  }
  0xe7   :  { %7260 = vmatpush1.bf16.msra.mxu1 %v10538_v26  ;;  %v10606_v26 = vld [vmem:[%s15845_s1 + $0xcc4] ss:$24 sps:$4 sm:$0xff]  }
  0xe8   :  { %7518 = vmatpush1.bf16.msra.mxu0 %v10541_v27  ;;  %7261 = vmatprep.subr.bf16.mxu1 %v10546_v30  ;;  %v10609_v27 = vld [vmem:[%s15845_s1 + $0x1ec4] ss:$24 sps:$4 sm:$0xff]   ;;  %v10604_v30 = vld [vmem:[%s15845_s1 + $0xcc0] ss:$24 sps:$4 sm:$0xff]  }
  0xe9   :  { %7519 = vmatprep.subr.bf16.mxu0 %v10549_v31  ;;  %v10607_v31 = vld [vmem:[%s15845_s1 + $0x1ec0] ss:$24 sps:$4 sm:$0xff]  }
  0xeb   :  { %7262 = vmatpush1.bf16.msra.mxu1 %v10544_v36  ;;  %v10612_v36 = vld [vmem:[%s15845_s1 + $0xcf4] ss:$24 sps:$4 sm:$0xff]  }
  0xec   :  { %7520 = vmatpush1.bf16.msra.mxu0 %v10547_v37  ;;  %7263 = vmatprep.subr.bf16.mxu1 %v10552_v38  ;;  %v10615_v37 = vld [vmem:[%s15845_s1 + $0x1ef4] ss:$24 sps:$4 sm:$0xff]   ;;  %v10610_v38 = vld [vmem:[%s15845_s1 + $0xcf0] ss:$24 sps:$4 sm:$0xff]  }
  0xed   :  { %7521 = vmatprep.subr.bf16.mxu0 %v10555_v39  ;;  %v10613_v39 = vld [vmem:[%s15845_s1 + $0x1ef0] ss:$24 sps:$4 sm:$0xff]  }
  0xef   :  { %7264 = vmatpush1.bf16.msra.mxu1 %v10550_v41  ;;  %v10618_v41 = vld [vmem:[%s15845_s1 + $0xd24] ss:$24 sps:$4 sm:$0xff]  }
  0xf0   :  { %7522 = vmatpush1.bf16.msra.mxu0 %v10553_v42  ;;  %7265 = vmatprep.subr.bf16.mxu1 %v10558_v44  ;;  %v10621_v42 = vld [vmem:[%s15845_s1 + $0x1f24] ss:$24 sps:$4 sm:$0xff]   ;;  %v10616_v44 = vld [vmem:[%s15845_s1 + $0xd20] ss:$24 sps:$4 sm:$0xff]  }
  0xf1   :  { %7523 = vmatprep.subr.bf16.mxu0 %v10561_v45  ;;  %v10619_v45 = vld [vmem:[%s15845_s1 + $0x1f20] ss:$24 sps:$4 sm:$0xff]  }
  0xf3   :  { %7266 = vmatpush1.bf16.msra.mxu1 %v10556_v28  ;;  %v10624_v28 = vld [vmem:[%s15845_s1 + $0xd54] ss:$24 sps:$4 sm:$0xff]  }
  0xf4   :  { %7524 = vmatpush1.bf16.msra.mxu0 %v10559_v29  ;;  %7267 = vmatprep.subr.bf16.mxu1 %v10564_v53  ;;  %v10627_v29 = vld [vmem:[%s15845_s1 + $0x1f54] ss:$24 sps:$4 sm:$0xff]   ;;  %v10622_v53 = vld [vmem:[%s15845_s1 + $0xd50] ss:$24 sps:$4 sm:$0xff]  }
  0xf5   :  { %7525 = vmatprep.subr.bf16.mxu0 %v10567_v54  ;;  %v10625_v54 = vld [vmem:[%s15845_s1 + $0x1f50] ss:$24 sps:$4 sm:$0xff]  }
  0xf7   :  { %7268 = vmatpush1.bf16.msra.mxu1 %v10562_v56  ;;  %v10630_v56 = vld [vmem:[%s15845_s1 + $0xd84] ss:$24 sps:$4 sm:$0xff]  }
  0xf8   :  { %7526 = vmatpush1.bf16.msra.mxu0 %v10565_v57  ;;  %7269 = vmatprep.subr.bf16.mxu1 %v10570_v58  ;;  %v10633_v57 = vld [vmem:[%s15845_s1 + $0x1f84] ss:$24 sps:$4 sm:$0xff]   ;;  %v10628_v58 = vld [vmem:[%s15845_s1 + $0xd80] ss:$24 sps:$4 sm:$0xff]  }
  0xf9   :  { %7527 = vmatprep.subr.bf16.mxu0 %v10573_v59  ;;  %v10631_v59 = vld [vmem:[%s15845_s1 + $0x1f80] ss:$24 sps:$4 sm:$0xff]  }
  0xfb   :  { %7270 = vmatpush1.bf16.msra.mxu1 %v10568_v60  ;;  %v10636_v60 = vld [vmem:[%s15845_s1 + $0xdb4] ss:$24 sps:$4 sm:$0xff]  }
  0xfc   :  { %7528 = vmatpush1.bf16.msra.mxu0 %v10571_v61  ;;  %7271 = vmatprep.subr.bf16.mxu1 %v10576_v62  ;;  %v10639_v61 = vld [vmem:[%s15845_s1 + $0x1fb4] ss:$24 sps:$4 sm:$0xff]   ;;  %v10634_v62 = vld [vmem:[%s15845_s1 + $0xdb0] ss:$24 sps:$4 sm:$0xff]  }
  0xfd   :  { %7529 = vmatprep.subr.bf16.mxu0 %v10579_v63  ;;  %v10637_v63 = vld [vmem:[%s15845_s1 + $0x1fb0] ss:$24 sps:$4 sm:$0xff]  }
  0xff   :  { %7272 = vmatpush1.bf16.msra.mxu1 %v10574_v0  ;;  %v10642_v0 = vld [vmem:[%s15845_s1 + $0xde4] ss:$24 sps:$4 sm:$0xff]  }
 0x100   :  { %7530 = vmatpush1.bf16.msra.mxu0 %v10577_v1  ;;  %7284 = vmatprep.subr.bf16.mxu1 %v10582_v2  ;;  %v10645_v1 = vld [vmem:[%s15845_s1 + $0x1fe4] ss:$24 sps:$4 sm:$0xff]   ;;  %v10640_v2 = vld [vmem:[%s15845_s1 + $0xde0] ss:$24 sps:$4 sm:$0xff]  }
 0x101   :  { %7542 = vmatprep.subr.bf16.mxu0 %v10585_v3  ;;  %v10643_v3 = vld [vmem:[%s15845_s1 + $0x1fe0] ss:$24 sps:$4 sm:$0xff]  }
 0x102   :  { %7274 = vmatmul.mubr.bf16.vlgmr.msra.gmra.mrb[0].mxu1 %v12917_v8 }
 0x103   :  { %7532 = vmatmul.mubr.bf16.vlgmr.msra.gmra.mrb[0].mxu0 %v12921_v9  ;;  %7285 = vmatpush1.bf16.msra.mxu1 %v10580_v4  ;;  %v10648_v4 = vld [vmem:[%s15845_s1 + $0xe14] ss:$24 sps:$4 sm:$0xff]  }
 0x104   :  { %7543 = vmatpush1.bf16.msra.mxu0 %v10583_v5  ;;  %7286 = vmatprep.subr.bf16.mxu1 %v10588_v46  ;;  %v10651_v5 = vld [vmem:[%s15845_s1 + $0x2014] ss:$24 sps:$4 sm:$0xff]   ;;  %v10646_v46 = vld [vmem:[%s15845_s1 + $0xe10] ss:$24 sps:$4 sm:$0xff]  }
 0x105   :  { %7544 = vmatprep.subr.bf16.mxu0 %v10591_v47  ;;  %7316 = vmatprep.mubr.bf16.mxu1 %v12941_v50  ;;  %v10649_v47 = vld [vmem:[%s15845_s1 + $0x2010] ss:$24 sps:$4 sm:$0xff]  }
 0x106   :  { %7574 = vmatprep.mubr.bf16.mxu0 %v12945_v51 }
 0x107   :  { %7287 = vmatpush1.bf16.msra.mxu1 %v10586_v14  ;;  %v10654_v14 = vld [vmem:[%s15845_s1 + $0xe44] ss:$24 sps:$4 sm:$0xff]  }
 0x108   :  { %7545 = vmatpush1.bf16.msra.mxu0 %v10589_v15  ;;  %7288 = vmatprep.subr.bf16.mxu1 %v10594_v16  ;;  %v10657_v15 = vld [vmem:[%s15845_s1 + $0x2044] ss:$24 sps:$4 sm:$0xff]   ;;  %v10652_v16 = vld [vmem:[%s15845_s1 + $0xe40] ss:$24 sps:$4 sm:$0xff]  }
 0x109   :  { %7546 = vmatprep.subr.bf16.mxu0 %v10597_v17  ;;  %v10655_v17 = vld [vmem:[%s15845_s1 + $0x2040] ss:$24 sps:$4 sm:$0xff]  }
 0x10b   :  { %7289 = vmatpush1.bf16.msra.mxu1 %v10592_v18  ;;  %v10660_v18 = vld [vmem:[%s15845_s1 + $0xe74] ss:$24 sps:$4 sm:$0xff]  }
 0x10c   :  { %7547 = vmatpush1.bf16.msra.mxu0 %v10595_v19  ;;  %7290 = vmatprep.subr.bf16.mxu1 %v10600_v21  ;;  %v10663_v19 = vld [vmem:[%s15845_s1 + $0x2074] ss:$24 sps:$4 sm:$0xff]   ;;  %v10658_v21 = vld [vmem:[%s15845_s1 + $0xe70] ss:$24 sps:$4 sm:$0xff]  }
 0x10d   :  { %7548 = vmatprep.subr.bf16.mxu0 %v10603_v23  ;;  %v10661_v23 = vld [vmem:[%s15845_s1 + $0x2070] ss:$24 sps:$4 sm:$0xff]  }
 0x10f   :  { %7291 = vmatpush1.bf16.msra.mxu1 %v10598_v24  ;;  %v10666_v24 = vld [vmem:[%s15845_s1 + $0xea4] ss:$24 sps:$4 sm:$0xff]  }
 0x110   :  { %7549 = vmatpush1.bf16.msra.mxu0 %v10601_v25  ;;  %7292 = vmatprep.subr.bf16.mxu1 %v10606_v26  ;;  %v10669_v25 = vld [vmem:[%s15845_s1 + $0x20a4] ss:$24 sps:$4 sm:$0xff]   ;;  %v10664_v26 = vld [vmem:[%s15845_s1 + $0xea0] ss:$24 sps:$4 sm:$0xff]  }
 0x111   :  { %7550 = vmatprep.subr.bf16.mxu0 %v10609_v27  ;;  %v10667_v27 = vld [vmem:[%s15845_s1 + $0x20a0] ss:$24 sps:$4 sm:$0xff]  }
 0x113   :  { %7293 = vmatpush1.bf16.msra.mxu1 %v10604_v30  ;;  %v10672_v30 = vld [vmem:[%s15845_s1 + $0xed4] ss:$24 sps:$4 sm:$0xff]  }
 0x114   :  { %7551 = vmatpush1.bf16.msra.mxu0 %v10607_v31  ;;  %7294 = vmatprep.subr.bf16.mxu1 %v10612_v36  ;;  %v10675_v31 = vld [vmem:[%s15845_s1 + $0x20d4] ss:$24 sps:$4 sm:$0xff]   ;;  %v10670_v36 = vld [vmem:[%s15845_s1 + $0xed0] ss:$24 sps:$4 sm:$0xff]  }
 0x115   :  { %7552 = vmatprep.subr.bf16.mxu0 %v10615_v37  ;;  %v10673_v37 = vld [vmem:[%s15845_s1 + $0x20d0] ss:$24 sps:$4 sm:$0xff]  }
 0x117   :  { %7295 = vmatpush1.bf16.msra.mxu1 %v10610_v38  ;;  %v10678_v38 = vld [vmem:[%s15845_s1 + $0xf04] ss:$24 sps:$4 sm:$0xff]  }
 0x118   :  { %7553 = vmatpush1.bf16.msra.mxu0 %v10613_v39  ;;  %7296 = vmatprep.subr.bf16.mxu1 %v10618_v41  ;;  %v10681_v39 = vld [vmem:[%s15845_s1 + $0x2104] ss:$24 sps:$4 sm:$0xff]   ;;  %v13134_v41 = vld [vmem:[%s15844_s0 + $0x28] sm:$0xff] }
 0x119   :  { %7554 = vmatprep.subr.bf16.mxu0 %v10621_v42  ;;  %v13139_v42 = vld [vmem:[%s15844_s0 + $0x88] sm:$0xff] }
 0x11b   :  { %7297 = vmatpush1.bf16.msra.mxu1 %v10616_v44  ;;  %v13144_v44 = vld [vmem:[%s15844_s0 + $0x58] sm:$0xff] }
 0x11c   :  { %7555 = vmatpush1.bf16.msra.mxu0 %v10619_v45  ;;  %7298 = vmatprep.subr.bf16.mxu1 %v10624_v28  ;;  %v13149_v45 = vld [vmem:[%s15844_s0 + $0xb8] sm:$0xff]  ;;  %v13153_v28 = vcombine.low %v12908_v6, %v12913_v7  ;;  %v10684_v6 = vld [vmem:[%s15845_s1 + $0xf34] ss:$24 sps:$4 sm:$0xff]  }
 0x11d   :  { %7556 = vmatprep.subr.bf16.mxu0 %v10627_v29  ;;  %v13157_v29 = vcombine.low %v12926_v12, %v12931_v13  ;;  %v10687_v7 = vld [vmem:[%s15845_s1 + $0x2134] ss:$24 sps:$4 sm:$0xff]   ;;  %v13173_v12 = vcombine.high %v13134_v41, %v13139_v42  ;;  %v13177_v13 = vcombine.high %v13144_v44, %v13149_v45 }
 0x11f   :  { %7299 = vmatpush1.bf16.msra.mxu1 %v10622_v53  ;;  %v10676_v53 = vld [vmem:[%s15845_s1 + $0xf00] ss:$24 sps:$4 sm:$0xff]  }
 0x120   :  { %7557 = vmatpush1.bf16.msra.mxu0 %v10625_v54  ;;  %7300 = vmatprep.subr.bf16.mxu1 %v10630_v56  ;;  %v10679_v54 = vld [vmem:[%s15845_s1 + $0x2100] ss:$24 sps:$4 sm:$0xff]   ;;  %v10682_v56 = vld [vmem:[%s15845_s1 + $0xf30] ss:$24 sps:$4 sm:$0xff]  }
 0x121   :  { %7558 = vmatprep.subr.bf16.mxu0 %v10633_v57  ;;  %v10685_v57 = vld [vmem:[%s15845_s1 + $0x2130] ss:$24 sps:$4 sm:$0xff]  }
 0x123   :  { %7301 = vmatpush1.bf16.msra.mxu1 %v10628_v58  ;;  %v10690_v58 = vld [vmem:[%s15845_s1 + $0xf64] ss:$24 sps:$4 sm:$0xff]  }
 0x124   :  { %7559 = vmatpush1.bf16.msra.mxu0 %v10631_v59  ;;  %7302 = vmatprep.subr.bf16.mxu1 %v10636_v60  ;;  %v10693_v59 = vld [vmem:[%s15845_s1 + $0x2164] ss:$24 sps:$4 sm:$0xff]   ;;  %v10688_v60 = vld [vmem:[%s15845_s1 + $0xf60] ss:$24 sps:$4 sm:$0xff]  }
 0x125   :  { %7560 = vmatprep.subr.bf16.mxu0 %v10639_v61  ;;  %v10691_v61 = vld [vmem:[%s15845_s1 + $0x2160] ss:$24 sps:$4 sm:$0xff]  }
 0x127   :  { %7303 = vmatpush1.bf16.msra.mxu1 %v10634_v62  ;;  %v10696_v62 = vld [vmem:[%s15845_s1 + $0xf94] ss:$24 sps:$4 sm:$0xff]  }
 0x128   :  { %7561 = vmatpush1.bf16.msra.mxu0 %v10637_v63  ;;  %7304 = vmatprep.subr.bf16.mxu1 %v10642_v0  ;;  %v10699_v63 = vld [vmem:[%s15845_s1 + $0x2194] ss:$24 sps:$4 sm:$0xff]   ;;  %v10694_v0 = vld [vmem:[%s15845_s1 + $0xf90] ss:$24 sps:$4 sm:$0xff]  }
 0x129   :  { %7562 = vmatprep.subr.bf16.mxu0 %v10645_v1  ;;  %v10697_v1 = vld [vmem:[%s15845_s1 + $0x2190] ss:$24 sps:$4 sm:$0xff]  }
 0x12b   :  { %7305 = vmatpush1.bf16.msra.mxu1 %v10640_v2  ;;  %v10702_v2 = vld [vmem:[%s15845_s1 + $0xfc4] ss:$24 sps:$4 sm:$0xff]  }
 0x12c   :  { %7563 = vmatpush1.bf16.msra.mxu0 %v10643_v3  ;;  %7306 = vmatprep.subr.bf16.mxu1 %v10648_v4  ;;  %v10705_v3 = vld [vmem:[%s15845_s1 + $0x21c4] ss:$24 sps:$4 sm:$0xff]   ;;  %v10700_v4 = vld [vmem:[%s15845_s1 + $0xfc0] ss:$24 sps:$4 sm:$0xff]  }
 0x12d   :  { %7564 = vmatprep.subr.bf16.mxu0 %v10651_v5  ;;  %v10703_v5 = vld [vmem:[%s15845_s1 + $0x21c0] ss:$24 sps:$4 sm:$0xff]  }
 0x12f   :  { %7307 = vmatpush1.bf16.msra.mxu1 %v10646_v46  ;;  %v10708_v46 = vld [vmem:[%s15845_s1 + $0xff4] ss:$24 sps:$4 sm:$0xff]  }
 0x130   :  { %7565 = vmatpush1.bf16.msra.mxu0 %v10649_v47  ;;  %7308 = vmatprep.subr.bf16.mxu1 %v10654_v14  ;;  %v10711_v47 = vld [vmem:[%s15845_s1 + $0x21f4] ss:$24 sps:$4 sm:$0xff]   ;;  %v10706_v14 = vld [vmem:[%s15845_s1 + $0xff0] ss:$24 sps:$4 sm:$0xff]  }
 0x131   :  { %7566 = vmatprep.subr.bf16.mxu0 %v10657_v15  ;;  %v10709_v15 = vld [vmem:[%s15845_s1 + $0x21f0] ss:$24 sps:$4 sm:$0xff]  }
 0x133   :  { %7309 = vmatpush1.bf16.msra.mxu1 %v10652_v16  ;;  %v10714_v16 = vld [vmem:[%s15845_s1 + $0x1024] ss:$24 sps:$4 sm:$0xff]  }
 0x134   :  { %7567 = vmatpush1.bf16.msra.mxu0 %v10655_v17  ;;  %7310 = vmatprep.subr.bf16.mxu1 %v10660_v18  ;;  %v10717_v17 = vld [vmem:[%s15845_s1 + $0x2224] ss:$24 sps:$4 sm:$0xff]   ;;  %v10712_v18 = vld [vmem:[%s15845_s1 + $0x1020] ss:$24 sps:$4 sm:$0xff]  }
 0x135   :  { %7568 = vmatprep.subr.bf16.mxu0 %v10663_v19  ;;  %v10715_v19 = vld [vmem:[%s15845_s1 + $0x2220] ss:$24 sps:$4 sm:$0xff]  }
 0x137   :  { %7311 = vmatpush1.bf16.msra.mxu1 %v10658_v21  ;;  %v10720_v21 = vld [vmem:[%s15845_s1 + $0x1054] ss:$24 sps:$4 sm:$0xff]  }
 0x138   :  { %7569 = vmatpush1.bf16.msra.mxu0 %v10661_v23  ;;  %7312 = vmatprep.subr.bf16.mxu1 %v10666_v24  ;;  %v10723_v23 = vld [vmem:[%s15845_s1 + $0x2254] ss:$24 sps:$4 sm:$0xff]   ;;  %v10718_v24 = vld [vmem:[%s15845_s1 + $0x1050] ss:$24 sps:$4 sm:$0xff]  }
 0x139   :  { %7570 = vmatprep.subr.bf16.mxu0 %v10669_v25  ;;  %v10721_v25 = vld [vmem:[%s15845_s1 + $0x2250] ss:$24 sps:$4 sm:$0xff]  }
 0x13b   :  { %7313 = vmatpush1.bf16.msra.mxu1 %v10664_v26  ;;  %v10726_v26 = vld [vmem:[%s15845_s1 + $0x1084] ss:$24 sps:$4 sm:$0xff]  }
 0x13c   :  { %7571 = vmatpush1.bf16.msra.mxu0 %v10667_v27  ;;  %7314 = vmatprep.subr.bf16.mxu1 %v10672_v30  ;;  %v10729_v27 = vld [vmem:[%s15845_s1 + $0x2284] ss:$24 sps:$4 sm:$0xff]   ;;  %v10724_v30 = vld [vmem:[%s15845_s1 + $0x1080] ss:$24 sps:$4 sm:$0xff]  }
 0x13d   :  { %7572 = vmatprep.subr.bf16.mxu0 %v10675_v31  ;;  %v10727_v31 = vld [vmem:[%s15845_s1 + $0x2280] ss:$24 sps:$4 sm:$0xff]  }
 0x13f   :  { %7315 = vmatpush1.bf16.msra.mxu1 %v10670_v36  ;;  %v10732_v36 = vld [vmem:[%s15845_s1 + $0x10b4] ss:$24 sps:$4 sm:$0xff]  }
 0x140   :  { %7573 = vmatpush1.bf16.msra.mxu0 %v10673_v37  ;;  %7327 = vmatprep.subr.bf16.mxu1 %v10678_v38  ;;  %v10735_v37 = vld [vmem:[%s15845_s1 + $0x22b4] ss:$24 sps:$4 sm:$0xff]   ;;  %v10730_v38 = vld [vmem:[%s15845_s1 + $0x10b0] ss:$24 sps:$4 sm:$0xff]  }
 0x141   :  { %7585 = vmatprep.subr.bf16.mxu0 %v10681_v39  ;;  %v10733_v39 = vld [vmem:[%s15845_s1 + $0x22b0] ss:$24 sps:$4 sm:$0xff]  }
 0x142   :  { %7317 = vmatmul.mubr.bf16.vlgmr.msra.gmra.mrb[0].mxu1 %v13153_v28 }
 0x143   :  { %7575 = vmatmul.mubr.bf16.vlgmr.msra.gmra.mrb[0].mxu0 %v13157_v29  ;;  %7328 = vmatpush1.bf16.msra.mxu1 %v10676_v53  ;;  %v10738_v53 = vld [vmem:[%s15845_s1 + $0x10e4] ss:$24 sps:$4 sm:$0xff]  }
 0x144   :  { %7586 = vmatpush1.bf16.msra.mxu0 %v10679_v54  ;;  %7329 = vmatprep.subr.bf16.mxu1 %v10684_v6  ;;  %v10741_v54 = vld [vmem:[%s15845_s1 + $0x22e4] ss:$24 sps:$4 sm:$0xff]   ;;  %v10736_v6 = vld [vmem:[%s15845_s1 + $0x10e0] ss:$24 sps:$4 sm:$0xff]  }
 0x145   :  { %7587 = vmatprep.subr.bf16.mxu0 %v10687_v7  ;;  %7359 = vmatprep.mubr.bf16.mxu1 %v13173_v12  ;;  %v10739_v7 = vld [vmem:[%s15845_s1 + $0x22e0] ss:$24 sps:$4 sm:$0xff]  }
 0x146   :  { %7617 = vmatprep.mubr.bf16.mxu0 %v13177_v13 }
 0x147   :  { %7330 = vmatpush1.bf16.msra.mxu1 %v10682_v56  ;;  %v10744_v56 = vld [vmem:[%s15845_s1 + $0x1114] ss:$24 sps:$4 sm:$0xff]  }
 0x148   :  { %7588 = vmatpush1.bf16.msra.mxu0 %v10685_v57  ;;  %7331 = vmatprep.subr.bf16.mxu1 %v10690_v58  ;;  %v10747_v57 = vld [vmem:[%s15845_s1 + $0x2314] ss:$24 sps:$4 sm:$0xff]   ;;  %v10742_v58 = vld [vmem:[%s15845_s1 + $0x1110] ss:$24 sps:$4 sm:$0xff]  }
 0x149   :  { %7589 = vmatprep.subr.bf16.mxu0 %v10693_v59  ;;  %v10745_v59 = vld [vmem:[%s15845_s1 + $0x2310] ss:$24 sps:$4 sm:$0xff]  }
 0x14b   :  { %7332 = vmatpush1.bf16.msra.mxu1 %v10688_v60  ;;  %v10750_v60 = vld [vmem:[%s15845_s1 + $0x1144] ss:$24 sps:$4 sm:$0xff]  }
 0x14c   :  { %7590 = vmatpush1.bf16.msra.mxu0 %v10691_v61  ;;  %7333 = vmatprep.subr.bf16.mxu1 %v10696_v62  ;;  %v10753_v61 = vld [vmem:[%s15845_s1 + $0x2344] ss:$24 sps:$4 sm:$0xff]   ;;  %v10748_v62 = vld [vmem:[%s15845_s1 + $0x1140] ss:$24 sps:$4 sm:$0xff]  }
 0x14d   :  { %7591 = vmatprep.subr.bf16.mxu0 %v10699_v63  ;;  %v10751_v63 = vld [vmem:[%s15845_s1 + $0x2340] ss:$24 sps:$4 sm:$0xff]  }
 0x14f   :  { %7334 = vmatpush1.bf16.msra.mxu1 %v10694_v0  ;;  %v10756_v0 = vld [vmem:[%s15845_s1 + $0x1174] ss:$24 sps:$4 sm:$0xff]  }
 0x150   :  { %7592 = vmatpush1.bf16.msra.mxu0 %v10697_v1  ;;  %7335 = vmatprep.subr.bf16.mxu1 %v10702_v2  ;;  %v10759_v1 = vld [vmem:[%s15845_s1 + $0x2374] ss:$24 sps:$4 sm:$0xff]   ;;  %v10754_v2 = vld [vmem:[%s15845_s1 + $0x1170] ss:$24 sps:$4 sm:$0xff]  }
 0x151   :  { %7593 = vmatprep.subr.bf16.mxu0 %v10705_v3  ;;  %v10757_v3 = vld [vmem:[%s15845_s1 + $0x2370] ss:$24 sps:$4 sm:$0xff]  }
 0x153   :  { %7336 = vmatpush1.bf16.msra.mxu1 %v10700_v4  ;;  %v10762_v4 = vld [vmem:[%s15845_s1 + $0x11a4] ss:$24 sps:$4 sm:$0xff]  }
 0x154   :  { %7594 = vmatpush1.bf16.msra.mxu0 %v10703_v5  ;;  %7337 = vmatprep.subr.bf16.mxu1 %v10708_v46  ;;  %v10765_v5 = vld [vmem:[%s15845_s1 + $0x23a4] ss:$24 sps:$4 sm:$0xff]   ;;  %v10760_v46 = vld [vmem:[%s15845_s1 + $0x11a0] ss:$24 sps:$4 sm:$0xff]  }
 0x155   :  { %7595 = vmatprep.subr.bf16.mxu0 %v10711_v47  ;;  %v10763_v47 = vld [vmem:[%s15845_s1 + $0x23a0] ss:$24 sps:$4 sm:$0xff]  }
 0x157   :  { %7338 = vmatpush1.bf16.msra.mxu1 %v10706_v14  ;;  %v10768_v14 = vld [vmem:[%s15845_s1 + $0x11d4] ss:$24 sps:$4 sm:$0xff]  }
 0x158   :  { %7596 = vmatpush1.bf16.msra.mxu0 %v10709_v15  ;;  %7339 = vmatprep.subr.bf16.mxu1 %v10714_v16  ;;  %v10771_v15 = vld [vmem:[%s15845_s1 + $0x23d4] ss:$24 sps:$4 sm:$0xff]   ;;  %v10766_v16 = vld [vmem:[%s15845_s1 + $0x11d0] ss:$24 sps:$4 sm:$0xff]  }
 0x159   :  { %7597 = vmatprep.subr.bf16.mxu0 %v10717_v17  ;;  %v10769_v17 = vld [vmem:[%s15845_s1 + $0x23d0] ss:$24 sps:$4 sm:$0xff]  }
 0x15b   :  { %7340 = vmatpush1.bf16.msra.mxu1 %v10712_v18  ;;  %v10774_v18 = vld [vmem:[%s15845_s1 + $0xc] ss:$24 sps:$4 sm:$0xff]  }
 0x15c   :  { %7598 = vmatpush1.bf16.msra.mxu0 %v10715_v19  ;;  %7341 = vmatprep.subr.bf16.mxu1 %v10720_v21  ;;  %v10777_v19 = vld [vmem:[%s15845_s1 + $0x14] ss:$24 sps:$4 sm:$0xff]   ;;  %v13365_v21 = vcombine.low %v13134_v41, %v13139_v42  ;;  %v10783_v42 = vld [vmem:[%s15845_s1 + $0x44] ss:$24 sps:$4 sm:$0xff]  }
 0x15d   :  { %7599 = vmatprep.subr.bf16.mxu0 %v10723_v23  ;;  %v13369_v23 = vcombine.low %v13144_v44, %v13149_v45  ;;  %v10780_v41 = vld [vmem:[%s15845_s1 + $0x3c] ss:$24 sps:$4 sm:$0xff]   ;;  %v10778_v44 = vld [vmem:[%s15845_s1 + $0x38] ss:$24 sps:$4 sm:$0xff]  }
 0x15e   :  { %v10781_v45 = vld [vmem:[%s15845_s1 + $0x40] ss:$24 sps:$4 sm:$0xff]  }
 0x15f   :  { %7342 = vmatpush1.bf16.msra.mxu1 %v10718_v24  ;;  %v10772_v24 = vld [vmem:[%s15845_s1 + $0x8] ss:$24 sps:$4 sm:$0xff]  }
 0x160   :  { %7600 = vmatpush1.bf16.msra.mxu0 %v10721_v25  ;;  %7343 = vmatprep.subr.bf16.mxu1 %v10726_v26  ;;  %v10775_v25 = vld [vmem:[%s15845_s1 + $0x10] ss:$24 sps:$4 sm:$0xff]   ;;  %v10786_v26 = vld [vmem:[%s15845_s1 + $0x6c] ss:$24 sps:$4 sm:$0xff]  }
 0x161   :  { %7601 = vmatprep.subr.bf16.mxu0 %v10729_v27  ;;  %v10789_v27 = vld [vmem:[%s15845_s1 + $0x74] ss:$24 sps:$4 sm:$0xff]  }
 0x163   :  { %7344 = vmatpush1.bf16.msra.mxu1 %v10724_v30  ;;  %v10784_v30 = vld [vmem:[%s15845_s1 + $0x68] ss:$24 sps:$4 sm:$0xff]  }
 0x164   :  { %7602 = vmatpush1.bf16.msra.mxu0 %v10727_v31  ;;  %7345 = vmatprep.subr.bf16.mxu1 %v10732_v36  ;;  %v10787_v31 = vld [vmem:[%s15845_s1 + $0x70] ss:$24 sps:$4 sm:$0xff]   ;;  %v10792_v36 = vld [vmem:[%s15845_s1 + $0x9c] ss:$24 sps:$4 sm:$0xff]  }
 0x165   :  { %7603 = vmatprep.subr.bf16.mxu0 %v10735_v37  ;;  %v10790_v37 = vld [vmem:[%s15845_s1 + $0x98] ss:$24 sps:$4 sm:$0xff]  }
 0x167   :  { %7346 = vmatpush1.bf16.msra.mxu1 %v10730_v38  ;;  %v10793_v38 = vld [vmem:[%s15845_s1 + $0xa0] ss:$24 sps:$4 sm:$0xff]  }
 0x168   :  { %7604 = vmatpush1.bf16.msra.mxu0 %v10733_v39  ;;  %7347 = vmatprep.subr.bf16.mxu1 %v10738_v53  ;;  %v10798_v39 = vld [vmem:[%s15845_s1 + $0xcc] ss:$24 sps:$4 sm:$0xff]  }
 0x169   :  { %7605 = vmatprep.subr.bf16.mxu0 %v10741_v54  ;;  %v10801_v53 = vld [vmem:[%s15845_s1 + $0xd4] ss:$24 sps:$4 sm:$0xff]   ;;  %v10796_v54 = vld [vmem:[%s15845_s1 + $0xc8] ss:$24 sps:$4 sm:$0xff]  }
 0x16b   :  { %7348 = vmatpush1.bf16.msra.mxu1 %v10736_v6  ;;  %v10799_v6 = vld [vmem:[%s15845_s1 + $0xd0] ss:$24 sps:$4 sm:$0xff]  }
 0x16c   :  { %7606 = vmatpush1.bf16.msra.mxu0 %v10739_v7  ;;  %7349 = vmatprep.subr.bf16.mxu1 %v10744_v56  ;;  %v10804_v7 = vld [vmem:[%s15845_s1 + $0xfc] ss:$24 sps:$4 sm:$0xff]  }
 0x16d   :  { %7607 = vmatprep.subr.bf16.mxu0 %v10747_v57  ;;  %v10807_v56 = vld [vmem:[%s15845_s1 + $0x104] ss:$24 sps:$4 sm:$0xff]   ;;  %v10802_v57 = vld [vmem:[%s15845_s1 + $0xf8] ss:$24 sps:$4 sm:$0xff]  }
 0x16f   :  { %7350 = vmatpush1.bf16.msra.mxu1 %v10742_v58  ;;  %v10805_v58 = vld [vmem:[%s15845_s1 + $0x100] ss:$24 sps:$4 sm:$0xff]  }
 0x170   :  { %7608 = vmatpush1.bf16.msra.mxu0 %v10745_v59  ;;  %7351 = vmatprep.subr.bf16.mxu1 %v10750_v60  ;;  %v10810_v59 = vld [vmem:[%s15845_s1 + $0x12c] ss:$24 sps:$4 sm:$0xff]  }
 0x171   :  { %7609 = vmatprep.subr.bf16.mxu0 %v10753_v61  ;;  %v10813_v60 = vld [vmem:[%s15845_s1 + $0x134] ss:$24 sps:$4 sm:$0xff]   ;;  %v10808_v61 = vld [vmem:[%s15845_s1 + $0x128] ss:$24 sps:$4 sm:$0xff]  }
 0x173   :  { %7352 = vmatpush1.bf16.msra.mxu1 %v10748_v62  ;;  %v10811_v62 = vld [vmem:[%s15845_s1 + $0x130] ss:$24 sps:$4 sm:$0xff]  }
 0x174   :  { %7610 = vmatpush1.bf16.msra.mxu0 %v10751_v63  ;;  %7353 = vmatprep.subr.bf16.mxu1 %v10756_v0  ;;  %v10816_v63 = vld [vmem:[%s15845_s1 + $0x15c] ss:$24 sps:$4 sm:$0xff]  }
 0x175   :  { %7611 = vmatprep.subr.bf16.mxu0 %v10759_v1  ;;  %v10819_v0 = vld [vmem:[%s15845_s1 + $0x164] ss:$24 sps:$4 sm:$0xff]   ;;  %v10814_v1 = vld [vmem:[%s15845_s1 + $0x158] ss:$24 sps:$4 sm:$0xff]  }
 0x177   :  { %7354 = vmatpush1.bf16.msra.mxu1 %v10754_v2  ;;  %v10817_v2 = vld [vmem:[%s15845_s1 + $0x160] ss:$24 sps:$4 sm:$0xff]  }
 0x178   :  { %7612 = vmatpush1.bf16.msra.mxu0 %v10757_v3  ;;  %7355 = vmatprep.subr.bf16.mxu1 %v10762_v4  ;;  %v10822_v3 = vld [vmem:[%s15845_s1 + $0x18c] ss:$24 sps:$4 sm:$0xff]  }
 0x179   :  { %7613 = vmatprep.subr.bf16.mxu0 %v10765_v5  ;;  %v10825_v4 = vld [vmem:[%s15845_s1 + $0x194] ss:$24 sps:$4 sm:$0xff]   ;;  %v10820_v5 = vld [vmem:[%s15845_s1 + $0x188] ss:$24 sps:$4 sm:$0xff]  }
 0x17b   :  { %7356 = vmatpush1.bf16.msra.mxu1 %v10760_v46  ;;  %v10823_v46 = vld [vmem:[%s15845_s1 + $0x190] ss:$24 sps:$4 sm:$0xff]  }
 0x17c   :  { %7614 = vmatpush1.bf16.msra.mxu0 %v10763_v47  ;;  %7357 = vmatprep.subr.bf16.mxu1 %v10768_v14  ;;  %v10828_v47 = vld [vmem:[%s15845_s1 + $0x1bc] ss:$24 sps:$4 sm:$0xff]  }
 0x17d   :  { %7615 = vmatprep.subr.bf16.mxu0 %v10771_v15  ;;  %v10831_v14 = vld [vmem:[%s15845_s1 + $0x1c4] ss:$24 sps:$4 sm:$0xff]   ;;  %v10826_v15 = vld [vmem:[%s15845_s1 + $0x1b8] ss:$24 sps:$4 sm:$0xff]  }
 0x17f   :  { %7358 = vmatpush1.bf16.msra.mxu1 %v10766_v16  ;;  %v10829_v16 = vld [vmem:[%s15845_s1 + $0x1c0] ss:$24 sps:$4 sm:$0xff]  }
 0x180   :  { %7616 = vmatpush1.bf16.msra.mxu0 %v10769_v17  ;;  %7628 = vmatprep.subr.bf16.mxu1 %v10774_v18  ;;  %v10834_v17 = vld [vmem:[%s15845_s1 + $0x1ec] ss:$24 sps:$4 sm:$0xff]  }
 0x181   :  { %8144 = vmatprep.subr.bf16.mxu0 %v10777_v19  ;;  %v10837_v18 = vld [vmem:[%s15845_s1 + $0x1f4] ss:$24 sps:$4 sm:$0xff]   ;;  %v10832_v19 = vld [vmem:[%s15845_s1 + $0x1e8] ss:$24 sps:$4 sm:$0xff]  }
 0x182   :  { %7360 = vmatmul.mubr.bf16.vlgmr.msra.gmra.mrb[0].mxu1 %v13365_v21 }
 0x183   :  { %7618 = vmatmul.mubr.bf16.vlgmr.msra.gmra.mrb[0].mxu0 %v13369_v23  ;;  %7629 = vmatpush1.bf16.msra.mxu1 %v10772_v24  ;;  %v10835_v24 = vld [vmem:[%s15845_s1 + $0x1f0] ss:$24 sps:$4 sm:$0xff]  }
 0x184   :  { %8145 = vmatpush1.bf16.msra.mxu0 %v10775_v25  ;;  %7630 = vmatprep.subr.bf16.mxu1 %v10780_v41  ;;  %v10840_v25 = vld [vmem:[%s15845_s1 + $0x21c] ss:$24 sps:$4 sm:$0xff]  }
 0x185   :  { %8146 = vmatprep.subr.bf16.mxu0 %v10783_v42  ;;  %7660 = vmatprep.mubr.bf16.mxu1 %v12147_v52  ;;  %v10843_v41 = vld [vmem:[%s15845_s1 + $0x224] ss:$24 sps:$4 sm:$0xff]   ;;  %v10838_v42 = vld [vmem:[%s15845_s1 + $0x218] ss:$24 sps:$4 sm:$0xff]  }
 0x186   :  { %8176 = vmatprep.mubr.bf16.mxu0 %v12147_v52  ;;  %v10795_v52 = vld [vmem:[%s15845_s1 + $0xa4] ss:$24 sps:$4 sm:$0xff]  }
 0x187   :  { %7631 = vmatpush1.bf16.msra.mxu1 %v10778_v44  ;;  %v10841_v44 = vld [vmem:[%s15845_s1 + $0x220] ss:$24 sps:$4 sm:$0xff]  }
 0x188   :  { %8147 = vmatpush1.bf16.msra.mxu0 %v10781_v45  ;;  %7632 = vmatprep.subr.bf16.mxu1 %v10786_v26  ;;  %v10846_v45 = vld [vmem:[%s15845_s1 + $0x24c] ss:$24 sps:$4 sm:$0xff]  }
 0x189   :  { %8148 = vmatprep.subr.bf16.mxu0 %v10789_v27  ;;  %v10849_v26 = vld [vmem:[%s15845_s1 + $0x254] ss:$24 sps:$4 sm:$0xff]   ;;  %v10844_v27 = vld [vmem:[%s15845_s1 + $0x248] ss:$24 sps:$4 sm:$0xff]  }
 0x18b   :  { %7633 = vmatpush1.bf16.msra.mxu1 %v10784_v30  ;;  %v10847_v30 = vld [vmem:[%s15845_s1 + $0x250] ss:$24 sps:$4 sm:$0xff]  }
 0x18c   :  { %8149 = vmatpush1.bf16.msra.mxu0 %v10787_v31  ;;  %7634 = vmatprep.subr.bf16.mxu1 %v10792_v36  ;;  %v10852_v31 = vld [vmem:[%s15845_s1 + $0x27c] ss:$24 sps:$4 sm:$0xff]  }
 0x18d   :  { %8150 = vmatprep.subr.bf16.mxu0 %v10795_v52  ;;  %v10855_v36 = vld [vmem:[%s15845_s1 + $0x284] ss:$24 sps:$4 sm:$0xff]   ;;  %v10850_v52 = vld [vmem:[%s15845_s1 + $0x278] ss:$24 sps:$4 sm:$0xff]  }
 0x18f   :  { %7635 = vmatpush1.bf16.msra.mxu1 %v10790_v37  ;;  %v10853_v37 = vld [vmem:[%s15845_s1 + $0x280] ss:$24 sps:$4 sm:$0xff]  }
 0x190   :  { %8151 = vmatpush1.bf16.msra.mxu0 %v10793_v38  ;;  %7636 = vmatprep.subr.bf16.mxu1 %v10798_v39  ;;  %v10858_v38 = vld [vmem:[%s15845_s1 + $0x2ac] ss:$24 sps:$4 sm:$0xff]  }
 0x191   :  { %8152 = vmatprep.subr.bf16.mxu0 %v10801_v53  ;;  %v10861_v39 = vld [vmem:[%s15845_s1 + $0x2b4] ss:$24 sps:$4 sm:$0xff]   ;;  %v10856_v53 = vld [vmem:[%s15845_s1 + $0x2a8] ss:$24 sps:$4 sm:$0xff]  }
 0x193   :  { %7637 = vmatpush1.bf16.msra.mxu1 %v10796_v54  ;;  %v10859_v54 = vld [vmem:[%s15845_s1 + $0x2b0] ss:$24 sps:$4 sm:$0xff]  }
 0x194   :  { %8153 = vmatpush1.bf16.msra.mxu0 %v10799_v6  ;;  %7638 = vmatprep.subr.bf16.mxu1 %v10804_v7  ;;  %v10864_v6 = vld [vmem:[%s15845_s1 + $0x2dc] ss:$24 sps:$4 sm:$0xff]  }
 0x195   :  { %8154 = vmatprep.subr.bf16.mxu0 %v10807_v56  ;;  %v10867_v7 = vld [vmem:[%s15845_s1 + $0x2e4] ss:$24 sps:$4 sm:$0xff]   ;;  %v10862_v56 = vld [vmem:[%s15845_s1 + $0x2d8] ss:$24 sps:$4 sm:$0xff]  }
 0x197   :  { %7639 = vmatpush1.bf16.msra.mxu1 %v10802_v57  ;;  %v10865_v57 = vld [vmem:[%s15845_s1 + $0x2e0] ss:$24 sps:$4 sm:$0xff]  }
 0x198   :  { %8155 = vmatpush1.bf16.msra.mxu0 %v10805_v58  ;;  %7640 = vmatprep.subr.bf16.mxu1 %v10810_v59  ;;  %v10870_v58 = vld [vmem:[%s15845_s1 + $0x30c] ss:$24 sps:$4 sm:$0xff]  }
 0x199   :  { %8156 = vmatprep.subr.bf16.mxu0 %v10813_v60  ;;  %v10873_v59 = vld [vmem:[%s15845_s1 + $0x314] ss:$24 sps:$4 sm:$0xff]   ;;  %v10868_v60 = vld [vmem:[%s15845_s1 + $0x308] ss:$24 sps:$4 sm:$0xff]  }
 0x19b   :  { %7641 = vmatpush1.bf16.msra.mxu1 %v10808_v61  ;;  %v10871_v61 = vld [vmem:[%s15845_s1 + $0x310] ss:$24 sps:$4 sm:$0xff]  }
 0x19c   :  { %8157 = vmatpush1.bf16.msra.mxu0 %v10811_v62  ;;  %7642 = vmatprep.subr.bf16.mxu1 %v10816_v63  ;;  %v10876_v62 = vld [vmem:[%s15845_s1 + $0x33c] ss:$24 sps:$4 sm:$0xff]  }
 0x19d   :  { %8158 = vmatprep.subr.bf16.mxu0 %v10819_v0  ;;  %v10879_v63 = vld [vmem:[%s15845_s1 + $0x344] ss:$24 sps:$4 sm:$0xff]   ;;  %v10874_v0 = vld [vmem:[%s15845_s1 + $0x338] ss:$24 sps:$4 sm:$0xff]  }
 0x19f   :  { %7643 = vmatpush1.bf16.msra.mxu1 %v10814_v1  ;;  %v10877_v1 = vld [vmem:[%s15845_s1 + $0x340] ss:$24 sps:$4 sm:$0xff]  }
 0x1a0   :  { %8159 = vmatpush1.bf16.msra.mxu0 %v10817_v2  ;;  %7644 = vmatprep.subr.bf16.mxu1 %v10822_v3  ;;  %v10882_v2 = vld [vmem:[%s15845_s1 + $0x36c] ss:$24 sps:$4 sm:$0xff]   ;;  %v10880_v3 = vld [vmem:[%s15845_s1 + $0x368] ss:$24 sps:$4 sm:$0xff]  }
 0x1a1   :  { %8160 = vmatprep.subr.bf16.mxu0 %v10825_v4  ;;  %v10883_v4 = vld [vmem:[%s15845_s1 + $0x370] ss:$24 sps:$4 sm:$0xff]  }
 0x1a3   :  { %7645 = vmatpush1.bf16.msra.mxu1 %v10820_v5  ;;  %v10888_v5 = vld [vmem:[%s15845_s1 + $0x39c] ss:$24 sps:$4 sm:$0xff]  }
 0x1a4   :  { %8161 = vmatpush1.bf16.msra.mxu0 %v10823_v46  ;;  %7646 = vmatprep.subr.bf16.mxu1 %v10828_v47  ;;  %v10886_v46 = vld [vmem:[%s15845_s1 + $0x398] ss:$24 sps:$4 sm:$0xff]  }
 0x1a5   :  { %8162 = vmatprep.subr.bf16.mxu0 %v10831_v14  ;;  %v10889_v47 = vld [vmem:[%s15845_s1 + $0x3a0] ss:$24 sps:$4 sm:$0xff]   ;;  %v10894_v14 = vld [vmem:[%s15845_s1 + $0x3cc] ss:$24 sps:$4 sm:$0xff]  }
 0x1a7   :  { %7647 = vmatpush1.bf16.msra.mxu1 %v10826_v15  ;;  %v10897_v15 = vld [vmem:[%s15845_s1 + $0x3d4] ss:$24 sps:$4 sm:$0xff]  }
 0x1a8   :  { %8163 = vmatpush1.bf16.msra.mxu0 %v10829_v16  ;;  %7648 = vmatprep.subr.bf16.mxu1 %v10834_v17  ;;  %v10892_v16 = vld [vmem:[%s15845_s1 + $0x3c8] ss:$24 sps:$4 sm:$0xff]  }
 0x1a9   :  { %8164 = vmatprep.subr.bf16.mxu0 %v10837_v18  ;;  %v10895_v17 = vld [vmem:[%s15845_s1 + $0x3d0] ss:$24 sps:$4 sm:$0xff]   ;;  %v10900_v18 = vld [vmem:[%s15845_s1 + $0x3fc] ss:$24 sps:$4 sm:$0xff]  }
 0x1ab   :  { %7649 = vmatpush1.bf16.msra.mxu1 %v10832_v19  ;;  %v10903_v19 = vld [vmem:[%s15845_s1 + $0x404] ss:$24 sps:$4 sm:$0xff]  }
 0x1ac   :  { %8165 = vmatpush1.bf16.msra.mxu0 %v10835_v24  ;;  %7650 = vmatprep.subr.bf16.mxu1 %v10840_v25  ;;  %v10898_v24 = vld [vmem:[%s15845_s1 + $0x3f8] ss:$24 sps:$4 sm:$0xff]  }
 0x1ad   :  { %8166 = vmatprep.subr.bf16.mxu0 %v10843_v41  ;;  %v10901_v25 = vld [vmem:[%s15845_s1 + $0x400] ss:$24 sps:$4 sm:$0xff]   ;;  %v10906_v41 = vld [vmem:[%s15845_s1 + $0x42c] ss:$24 sps:$4 sm:$0xff]  }
 0x1af   :  { %7651 = vmatpush1.bf16.msra.mxu1 %v10838_v42  ;;  %v10909_v42 = vld [vmem:[%s15845_s1 + $0x434] ss:$24 sps:$4 sm:$0xff]  }
 0x1b0   :  { %8167 = vmatpush1.bf16.msra.mxu0 %v10841_v44  ;;  %7652 = vmatprep.subr.bf16.mxu1 %v10846_v45  ;;  %v10904_v44 = vld [vmem:[%s15845_s1 + $0x428] ss:$24 sps:$4 sm:$0xff]  }
 0x1b1   :  { %8168 = vmatprep.subr.bf16.mxu0 %v10849_v26  ;;  %v10907_v45 = vld [vmem:[%s15845_s1 + $0x430] ss:$24 sps:$4 sm:$0xff]   ;;  %v10912_v26 = vld [vmem:[%s15845_s1 + $0x45c] ss:$24 sps:$4 sm:$0xff]  }
 0x1b3   :  { %7653 = vmatpush1.bf16.msra.mxu1 %v10844_v27  ;;  %v10915_v27 = vld [vmem:[%s15845_s1 + $0x464] ss:$24 sps:$4 sm:$0xff]  }
 0x1b4   :  { %8169 = vmatpush1.bf16.msra.mxu0 %v10847_v30  ;;  %7654 = vmatprep.subr.bf16.mxu1 %v10852_v31  ;;  %v10910_v30 = vld [vmem:[%s15845_s1 + $0x458] ss:$24 sps:$4 sm:$0xff]  }
 0x1b5   :  { %8170 = vmatprep.subr.bf16.mxu0 %v10855_v36  ;;  %v10913_v31 = vld [vmem:[%s15845_s1 + $0x460] ss:$24 sps:$4 sm:$0xff]   ;;  %v10918_v36 = vld [vmem:[%s15845_s1 + $0x48c] ss:$24 sps:$4 sm:$0xff]  }
 0x1b7   :  { %7655 = vmatpush1.bf16.msra.mxu1 %v10850_v52  ;;  %v10921_v52 = vld [vmem:[%s15845_s1 + $0x494] ss:$24 sps:$4 sm:$0xff]  }
 0x1b8   :  { %8171 = vmatpush1.bf16.msra.mxu0 %v10853_v37  ;;  %7656 = vmatprep.subr.bf16.mxu1 %v10858_v38  ;;  %v10916_v37 = vld [vmem:[%s15845_s1 + $0x488] ss:$24 sps:$4 sm:$0xff]  }
 0x1b9   :  { %8172 = vmatprep.subr.bf16.mxu0 %v10861_v39  ;;  %v10919_v38 = vld [vmem:[%s15845_s1 + $0x490] ss:$24 sps:$4 sm:$0xff]   ;;  %v10924_v39 = vld [vmem:[%s15845_s1 + $0x4bc] ss:$24 sps:$4 sm:$0xff]  }
 0x1bb   :  { %7657 = vmatpush1.bf16.msra.mxu1 %v10856_v53  ;;  %v10927_v53 = vld [vmem:[%s15845_s1 + $0x4c4] ss:$24 sps:$4 sm:$0xff]  }
 0x1bc   :  { %8173 = vmatpush1.bf16.msra.mxu0 %v10859_v54  ;;  %7658 = vmatprep.subr.bf16.mxu1 %v10864_v6  ;;  %v10922_v54 = vld [vmem:[%s15845_s1 + $0x4b8] ss:$24 sps:$4 sm:$0xff]  }
 0x1bd   :  { %8174 = vmatprep.subr.bf16.mxu0 %v10867_v7  ;;  %v10925_v6 = vld [vmem:[%s15845_s1 + $0x4c0] ss:$24 sps:$4 sm:$0xff]   ;;  %v10930_v7 = vld [vmem:[%s15845_s1 + $0x4ec] ss:$24 sps:$4 sm:$0xff]  }
 0x1bf   :  { %7659 = vmatpush1.bf16.msra.mxu1 %v10862_v56  ;;  %v10933_v56 = vld [vmem:[%s15845_s1 + $0x4f4] ss:$24 sps:$4 sm:$0xff]  }
 0x1c0   :  { %8175 = vmatpush1.bf16.msra.mxu0 %v10865_v57  ;;  %7671 = vmatprep.subr.bf16.mxu1 %v10870_v58  ;;  %v10928_v57 = vld [vmem:[%s15845_s1 + $0x4e8] ss:$24 sps:$4 sm:$0xff]  }
 0x1c1   :  { %8187 = vmatprep.subr.bf16.mxu0 %v10873_v59  ;;  %v10931_v58 = vld [vmem:[%s15845_s1 + $0x4f0] ss:$24 sps:$4 sm:$0xff]   ;;  %v10936_v59 = vld [vmem:[%s15845_s1 + $0x51c] ss:$24 sps:$4 sm:$0xff]  }
 0x1c2   :  { %7661 = vmatmul.mubr.bf16.vlgmr.msra.gmra.mrb[4].mxu1 %v12213_v10 }
 0x1c3   :  { %8177 = vmatmul.mubr.bf16.vlgmr.msra.gmra.mrb[4].mxu0 %v12213_v10  ;;  %7672 = vmatpush1.bf16.msra.mxu1 %v10868_v60  ;;  %v10885_v10 = vld [vmem:[%s15845_s1 + $0x374] ss:$24 sps:$4 sm:$0xff]   ;;  %v10939_v60 = vld [vmem:[%s15845_s1 + $0x524] ss:$24 sps:$4 sm:$0xff]  }
 0x1c4   :  { %8188 = vmatpush1.bf16.msra.mxu0 %v10871_v61  ;;  %7673 = vmatprep.subr.bf16.mxu1 %v10876_v62  ;;  %v10934_v61 = vld [vmem:[%s15845_s1 + $0x518] ss:$24 sps:$4 sm:$0xff]  }
 0x1c5   :  { %8189 = vmatprep.subr.bf16.mxu0 %v10879_v63  ;;  %7703 = vmatprep.mubr.bf16.mxu1 %v12309_v40  ;;  %v10937_v62 = vld [vmem:[%s15845_s1 + $0x520] ss:$24 sps:$4 sm:$0xff]   ;;  %v10942_v63 = vld [vmem:[%s15845_s1 + $0x54c] ss:$24 sps:$4 sm:$0xff]  }
 0x1c6   :  { %8219 = vmatprep.mubr.bf16.mxu0 %v12309_v40  ;;  %v10891_v40 = vld [vmem:[%s15845_s1 + $0x3a4] ss:$24 sps:$4 sm:$0xff]  }
 0x1c7   :  { %7674 = vmatpush1.bf16.msra.mxu1 %v10874_v0  ;;  %v10945_v0 = vld [vmem:[%s15845_s1 + $0x554] ss:$24 sps:$4 sm:$0xff]  }
 0x1c8   :  { %8190 = vmatpush1.bf16.msra.mxu0 %v10877_v1  ;;  %7675 = vmatprep.subr.bf16.mxu1 %v10882_v2  ;;  %v10940_v1 = vld [vmem:[%s15845_s1 + $0x548] ss:$24 sps:$4 sm:$0xff]  }
 0x1c9   :  { %8191 = vmatprep.subr.bf16.mxu0 %v10885_v10  ;;  %v10943_v2 = vld [vmem:[%s15845_s1 + $0x550] ss:$24 sps:$4 sm:$0xff]   ;;  %v10948_v10 = vld [vmem:[%s15845_s1 + $0x57c] ss:$24 sps:$4 sm:$0xff]  }
 0x1cb   :  { %7676 = vmatpush1.bf16.msra.mxu1 %v10880_v3  ;;  %v10951_v3 = vld [vmem:[%s15845_s1 + $0x584] ss:$24 sps:$4 sm:$0xff]  }
 0x1cc   :  { %8192 = vmatpush1.bf16.msra.mxu0 %v10883_v4  ;;  %7677 = vmatprep.subr.bf16.mxu1 %v10888_v5  ;;  %v10946_v4 = vld [vmem:[%s15845_s1 + $0x578] ss:$24 sps:$4 sm:$0xff]  }
 0x1cd   :  { %8193 = vmatprep.subr.bf16.mxu0 %v10891_v40  ;;  %v10949_v5 = vld [vmem:[%s15845_s1 + $0x580] ss:$24 sps:$4 sm:$0xff]   ;;  %v10954_v40 = vld [vmem:[%s15845_s1 + $0x5ac] ss:$24 sps:$4 sm:$0xff]  }
 0x1cf   :  { %7678 = vmatpush1.bf16.msra.mxu1 %v10886_v46  ;;  %v10957_v46 = vld [vmem:[%s15845_s1 + $0x5b4] ss:$24 sps:$4 sm:$0xff]  }
 0x1d0   :  { %8194 = vmatpush1.bf16.msra.mxu0 %v10889_v47  ;;  %7679 = vmatprep.subr.bf16.mxu1 %v10894_v14  ;;  %v10952_v47 = vld [vmem:[%s15845_s1 + $0x5a8] ss:$24 sps:$4 sm:$0xff]  }
 0x1d1   :  { %8195 = vmatprep.subr.bf16.mxu0 %v10897_v15  ;;  %v10955_v14 = vld [vmem:[%s15845_s1 + $0x5b0] ss:$24 sps:$4 sm:$0xff]   ;;  %v10960_v15 = vld [vmem:[%s15845_s1 + $0x5dc] ss:$24 sps:$4 sm:$0xff]  }
 0x1d3   :  { %7680 = vmatpush1.bf16.msra.mxu1 %v10892_v16  ;;  %v10963_v16 = vld [vmem:[%s15845_s1 + $0x5e4] ss:$24 sps:$4 sm:$0xff]  }
 0x1d4   :  { %8196 = vmatpush1.bf16.msra.mxu0 %v10895_v17  ;;  %7681 = vmatprep.subr.bf16.mxu1 %v10900_v18  ;;  %v10958_v17 = vld [vmem:[%s15845_s1 + $0x5d8] ss:$24 sps:$4 sm:$0xff]  }
 0x1d5   :  { %8197 = vmatprep.subr.bf16.mxu0 %v10903_v19  ;;  %v10961_v18 = vld [vmem:[%s15845_s1 + $0x5e0] ss:$24 sps:$4 sm:$0xff]   ;;  %v10966_v19 = vld [vmem:[%s15845_s1 + $0x60c] ss:$24 sps:$4 sm:$0xff]  }
 0x1d7   :  { %7682 = vmatpush1.bf16.msra.mxu1 %v10898_v24  ;;  %v10969_v24 = vld [vmem:[%s15845_s1 + $0x614] ss:$24 sps:$4 sm:$0xff]  }
 0x1d8   :  { %8198 = vmatpush1.bf16.msra.mxu0 %v10901_v25  ;;  %7683 = vmatprep.subr.bf16.mxu1 %v10906_v41  ;;  %v10964_v25 = vld [vmem:[%s15845_s1 + $0x608] ss:$24 sps:$4 sm:$0xff]  }
 0x1d9   :  { %8199 = vmatprep.subr.bf16.mxu0 %v10909_v42  ;;  %v10967_v41 = vld [vmem:[%s15845_s1 + $0x610] ss:$24 sps:$4 sm:$0xff]   ;;  %v10972_v42 = vld [vmem:[%s15845_s1 + $0x63c] ss:$24 sps:$4 sm:$0xff]  }
 0x1db   :  { %7684 = vmatpush1.bf16.msra.mxu1 %v10904_v44  ;;  %v10975_v44 = vld [vmem:[%s15845_s1 + $0x644] ss:$24 sps:$4 sm:$0xff]  }
 0x1dc   :  { %8200 = vmatpush1.bf16.msra.mxu0 %v10907_v45  ;;  %7685 = vmatprep.subr.bf16.mxu1 %v10912_v26  ;;  %v10970_v45 = vld [vmem:[%s15845_s1 + $0x638] ss:$24 sps:$4 sm:$0xff]  }
 0x1dd   :  { %8201 = vmatprep.subr.bf16.mxu0 %v10915_v27  ;;  %v10973_v26 = vld [vmem:[%s15845_s1 + $0x640] ss:$24 sps:$4 sm:$0xff]   ;;  %v10978_v27 = vld [vmem:[%s15845_s1 + $0x66c] ss:$24 sps:$4 sm:$0xff]  }
 0x1df   :  { %7686 = vmatpush1.bf16.msra.mxu1 %v10910_v30  ;;  %v10976_v30 = vld [vmem:[%s15845_s1 + $0x668] ss:$24 sps:$4 sm:$0xff]  }
 0x1e0   :  { %8202 = vmatpush1.bf16.msra.mxu0 %v10913_v31  ;;  %7687 = vmatprep.subr.bf16.mxu1 %v10918_v36  ;;  %v10979_v31 = vld [vmem:[%s15845_s1 + $0x670] ss:$24 sps:$4 sm:$0xff]   ;;  %v10984_v36 = vld [vmem:[%s15845_s1 + $0x69c] ss:$24 sps:$4 sm:$0xff]  }
 0x1e1   :  { %8203 = vmatprep.subr.bf16.mxu0 %v10921_v52  ;;  %v10982_v52 = vld [vmem:[%s15845_s1 + $0x698] ss:$24 sps:$4 sm:$0xff]  }
 0x1e3   :  { %7688 = vmatpush1.bf16.msra.mxu1 %v10916_v37  ;;  %v10985_v37 = vld [vmem:[%s15845_s1 + $0x6a0] ss:$24 sps:$4 sm:$0xff]  }
 0x1e4   :  { %8204 = vmatpush1.bf16.msra.mxu0 %v10919_v38  ;;  %7689 = vmatprep.subr.bf16.mxu1 %v10924_v39  ;;  %v10990_v38 = vld [vmem:[%s15845_s1 + $0x6cc] ss:$24 sps:$4 sm:$0xff]  }
 0x1e5   :  { %8205 = vmatprep.subr.bf16.mxu0 %v10927_v53  ;;  %v10993_v39 = vld [vmem:[%s15845_s1 + $0x6d4] ss:$24 sps:$4 sm:$0xff]   ;;  %v10988_v53 = vld [vmem:[%s15845_s1 + $0x6c8] ss:$24 sps:$4 sm:$0xff]  }
 0x1e7   :  { %7690 = vmatpush1.bf16.msra.mxu1 %v10922_v54  ;;  %v10991_v54 = vld [vmem:[%s15845_s1 + $0x6d0] ss:$24 sps:$4 sm:$0xff]  }
 0x1e8   :  { %8206 = vmatpush1.bf16.msra.mxu0 %v10925_v6  ;;  %7691 = vmatprep.subr.bf16.mxu1 %v10930_v7  ;;  %v10996_v6 = vld [vmem:[%s15845_s1 + $0x6fc] ss:$24 sps:$4 sm:$0xff]  }
 0x1e9   :  { %8207 = vmatprep.subr.bf16.mxu0 %v10933_v56  ;;  %v10999_v7 = vld [vmem:[%s15845_s1 + $0x704] ss:$24 sps:$4 sm:$0xff]   ;;  %v10994_v56 = vld [vmem:[%s15845_s1 + $0x6f8] ss:$24 sps:$4 sm:$0xff]  }
 0x1eb   :  { %7692 = vmatpush1.bf16.msra.mxu1 %v10928_v57  ;;  %v10997_v57 = vld [vmem:[%s15845_s1 + $0x700] ss:$24 sps:$4 sm:$0xff]  }
 0x1ec   :  { %8208 = vmatpush1.bf16.msra.mxu0 %v10931_v58  ;;  %7693 = vmatprep.subr.bf16.mxu1 %v10936_v59  ;;  %v11002_v58 = vld [vmem:[%s15845_s1 + $0x72c] ss:$24 sps:$4 sm:$0xff]  }
 0x1ed   :  { %8209 = vmatprep.subr.bf16.mxu0 %v10939_v60  ;;  %v11005_v59 = vld [vmem:[%s15845_s1 + $0x734] ss:$24 sps:$4 sm:$0xff]   ;;  %v11000_v60 = vld [vmem:[%s15845_s1 + $0x728] ss:$24 sps:$4 sm:$0xff]  }
 0x1ef   :  { %7694 = vmatpush1.bf16.msra.mxu1 %v10934_v61  ;;  %v11003_v61 = vld [vmem:[%s15845_s1 + $0x730] ss:$24 sps:$4 sm:$0xff]  }
 0x1f0   :  { %8210 = vmatpush1.bf16.msra.mxu0 %v10937_v62  ;;  %7695 = vmatprep.subr.bf16.mxu1 %v10942_v63  ;;  %v11008_v62 = vld [vmem:[%s15845_s1 + $0x75c] ss:$24 sps:$4 sm:$0xff]  }
 0x1f1   :  { %8211 = vmatprep.subr.bf16.mxu0 %v10945_v0  ;;  %v11011_v63 = vld [vmem:[%s15845_s1 + $0x764] ss:$24 sps:$4 sm:$0xff]   ;;  %v11006_v0 = vld [vmem:[%s15845_s1 + $0x758] ss:$24 sps:$4 sm:$0xff]  }
 0x1f3   :  { %7696 = vmatpush1.bf16.msra.mxu1 %v10940_v1  ;;  %v11009_v1 = vld [vmem:[%s15845_s1 + $0x760] ss:$24 sps:$4 sm:$0xff]  }
 0x1f4   :  { %8212 = vmatpush1.bf16.msra.mxu0 %v10943_v2  ;;  %7697 = vmatprep.subr.bf16.mxu1 %v10948_v10  ;;  %v11014_v2 = vld [vmem:[%s15845_s1 + $0x78c] ss:$24 sps:$4 sm:$0xff]  }
 0x1f5   :  { %8213 = vmatprep.subr.bf16.mxu0 %v10951_v3  ;;  %v11017_v10 = vld [vmem:[%s15845_s1 + $0x794] ss:$24 sps:$4 sm:$0xff]   ;;  %v11012_v3 = vld [vmem:[%s15845_s1 + $0x788] ss:$24 sps:$4 sm:$0xff]  }
 0x1f7   :  { %7698 = vmatpush1.bf16.msra.mxu1 %v10946_v4  ;;  %v11015_v4 = vld [vmem:[%s15845_s1 + $0x790] ss:$24 sps:$4 sm:$0xff]  }
 0x1f8   :  { %8214 = vmatpush1.bf16.msra.mxu0 %v10949_v5  ;;  %7699 = vmatprep.subr.bf16.mxu1 %v10954_v40  ;;  %v11020_v5 = vld [vmem:[%s15845_s1 + $0x7bc] ss:$24 sps:$4 sm:$0xff]  }
 0x1f9   :  { %8215 = vmatprep.subr.bf16.mxu0 %v10957_v46  ;;  %v11023_v40 = vld [vmem:[%s15845_s1 + $0x7c4] ss:$24 sps:$4 sm:$0xff]   ;;  %v11018_v46 = vld [vmem:[%s15845_s1 + $0x7b8] ss:$24 sps:$4 sm:$0xff]  }
 0x1fb   :  { %7700 = vmatpush1.bf16.msra.mxu1 %v10952_v47  ;;  %v11021_v47 = vld [vmem:[%s15845_s1 + $0x7c0] ss:$24 sps:$4 sm:$0xff]  }
 0x1fc   :  { %8216 = vmatpush1.bf16.msra.mxu0 %v10955_v14  ;;  %7701 = vmatprep.subr.bf16.mxu1 %v10960_v15  ;;  %v11026_v14 = vld [vmem:[%s15845_s1 + $0x7ec] ss:$24 sps:$4 sm:$0xff]  }
 0x1fd   :  { %8217 = vmatprep.subr.bf16.mxu0 %v10963_v16  ;;  %v11029_v15 = vld [vmem:[%s15845_s1 + $0x7f4] ss:$24 sps:$4 sm:$0xff]   ;;  %v11024_v16 = vld [vmem:[%s15845_s1 + $0x7e8] ss:$24 sps:$4 sm:$0xff]  }
 0x1ff   :  { %7702 = vmatpush1.bf16.msra.mxu1 %v10958_v17  ;;  %v11027_v17 = vld [vmem:[%s15845_s1 + $0x7f0] ss:$24 sps:$4 sm:$0xff]  }
 0x200   :  { %8218 = vmatpush1.bf16.msra.mxu0 %v10961_v18  ;;  %7714 = vmatprep.subr.bf16.mxu1 %v10966_v19  ;;  %v11032_v18 = vld [vmem:[%s15845_s1 + $0x81c] ss:$24 sps:$4 sm:$0xff]  }
 0x201   :  { %8230 = vmatprep.subr.bf16.mxu0 %v10969_v24  ;;  %v11035_v19 = vld [vmem:[%s15845_s1 + $0x824] ss:$24 sps:$4 sm:$0xff]   ;;  %v11030_v24 = vld [vmem:[%s15845_s1 + $0x818] ss:$24 sps:$4 sm:$0xff]  }
 0x202   :  { %7704 = vmatmul.mubr.bf16.vlgmr.msra.gmra.mrb[4].mxu1 %v12437_v20 }
 0x203   :  { %8220 = vmatmul.mubr.bf16.vlgmr.msra.gmra.mrb[4].mxu0 %v12437_v20  ;;  %7715 = vmatpush1.bf16.msra.mxu1 %v10964_v25  ;;  %v10981_v20 = vld [vmem:[%s15845_s1 + $0x674] ss:$24 sps:$4 sm:$0xff]   ;;  %v11033_v25 = vld [vmem:[%s15845_s1 + $0x820] ss:$24 sps:$4 sm:$0xff]  }
 0x204   :  { %8231 = vmatpush1.bf16.msra.mxu0 %v10967_v41  ;;  %7716 = vmatprep.subr.bf16.mxu1 %v10972_v42  ;;  %v11038_v41 = vld [vmem:[%s15845_s1 + $0x84c] ss:$24 sps:$4 sm:$0xff]  }
 0x205   :  { %8232 = vmatprep.subr.bf16.mxu0 %v10975_v44  ;;  %7746 = vmatprep.mubr.bf16.mxu1 %v12481_v32  ;;  %v11041_v42 = vld [vmem:[%s15845_s1 + $0x854] ss:$24 sps:$4 sm:$0xff]   ;;  %v11036_v44 = vld [vmem:[%s15845_s1 + $0x848] ss:$24 sps:$4 sm:$0xff]  }
 0x206   :  { %8262 = vmatprep.mubr.bf16.mxu0 %v12481_v32  ;;  %v10987_v32 = vld [vmem:[%s15845_s1 + $0x6a4] ss:$24 sps:$4 sm:$0xff]  }
 0x207   :  { %7717 = vmatpush1.bf16.msra.mxu1 %v10970_v45  ;;  %v11039_v45 = vld [vmem:[%s15845_s1 + $0x850] ss:$24 sps:$4 sm:$0xff]  }
 0x208   :  { %8233 = vmatpush1.bf16.msra.mxu0 %v10973_v26  ;;  %7718 = vmatprep.subr.bf16.mxu1 %v10978_v27  ;;  %v11044_v26 = vld [vmem:[%s15845_s1 + $0x87c] ss:$24 sps:$4 sm:$0xff]  }
 0x209   :  { %8234 = vmatprep.subr.bf16.mxu0 %v10981_v20  ;;  %v11047_v27 = vld [vmem:[%s15845_s1 + $0x884] ss:$24 sps:$4 sm:$0xff]   ;;  %v11042_v20 = vld [vmem:[%s15845_s1 + $0x878] ss:$24 sps:$4 sm:$0xff]  }
 0x20b   :  { %7719 = vmatpush1.bf16.msra.mxu1 %v10976_v30  ;;  %v11045_v30 = vld [vmem:[%s15845_s1 + $0x880] ss:$24 sps:$4 sm:$0xff]  }
 0x20c   :  { %8235 = vmatpush1.bf16.msra.mxu0 %v10979_v31  ;;  %7720 = vmatprep.subr.bf16.mxu1 %v10984_v36  ;;  %v11050_v31 = vld [vmem:[%s15845_s1 + $0x8ac] ss:$24 sps:$4 sm:$0xff]  }
 0x20d   :  { %8236 = vmatprep.subr.bf16.mxu0 %v10987_v32  ;;  %v11053_v36 = vld [vmem:[%s15845_s1 + $0x8b4] ss:$24 sps:$4 sm:$0xff]   ;;  %v11048_v32 = vld [vmem:[%s15845_s1 + $0x8a8] ss:$24 sps:$4 sm:$0xff]  }
 0x20f   :  { %7721 = vmatpush1.bf16.msra.mxu1 %v10982_v52  ;;  %v11051_v52 = vld [vmem:[%s15845_s1 + $0x8b0] ss:$24 sps:$4 sm:$0xff]  }
 0x210   :  { %8237 = vmatpush1.bf16.msra.mxu0 %v10985_v37  ;;  %7722 = vmatprep.subr.bf16.mxu1 %v10990_v38  ;;  %v11056_v37 = vld [vmem:[%s15845_s1 + $0x8dc] ss:$24 sps:$4 sm:$0xff]  }
 0x211   :  { %8238 = vmatprep.subr.bf16.mxu0 %v10993_v39  ;;  %v11059_v38 = vld [vmem:[%s15845_s1 + $0x8e4] ss:$24 sps:$4 sm:$0xff]   ;;  %v11054_v39 = vld [vmem:[%s15845_s1 + $0x8d8] ss:$24 sps:$4 sm:$0xff]  }
 0x213   :  { %7723 = vmatpush1.bf16.msra.mxu1 %v10988_v53  ;;  %v11057_v53 = vld [vmem:[%s15845_s1 + $0x8e0] ss:$24 sps:$4 sm:$0xff]  }
 0x214   :  { %8239 = vmatpush1.bf16.msra.mxu0 %v10991_v54  ;;  %7724 = vmatprep.subr.bf16.mxu1 %v10996_v6  ;;  %v11062_v54 = vld [vmem:[%s15845_s1 + $0x90c] ss:$24 sps:$4 sm:$0xff]  }
 0x215   :  { %8240 = vmatprep.subr.bf16.mxu0 %v10999_v7  ;;  %v11065_v6 = vld [vmem:[%s15845_s1 + $0x914] ss:$24 sps:$4 sm:$0xff]   ;;  %v11060_v7 = vld [vmem:[%s15845_s1 + $0x908] ss:$24 sps:$4 sm:$0xff]  }
 0x217   :  { %7725 = vmatpush1.bf16.msra.mxu1 %v10994_v56  ;;  %v11063_v56 = vld [vmem:[%s15845_s1 + $0x910] ss:$24 sps:$4 sm:$0xff]  }
 0x218   :  { %8241 = vmatpush1.bf16.msra.mxu0 %v10997_v57  ;;  %7726 = vmatprep.subr.bf16.mxu1 %v11002_v58  ;;  %v11068_v57 = vld [vmem:[%s15845_s1 + $0x93c] ss:$24 sps:$4 sm:$0xff]  }
 0x219   :  { %8242 = vmatprep.subr.bf16.mxu0 %v11005_v59  ;;  %v11071_v58 = vld [vmem:[%s15845_s1 + $0x944] ss:$24 sps:$4 sm:$0xff]   ;;  %v11066_v59 = vld [vmem:[%s15845_s1 + $0x938] ss:$24 sps:$4 sm:$0xff]  }
 0x21b   :  { %7727 = vmatpush1.bf16.msra.mxu1 %v11000_v60  ;;  %v11069_v60 = vld [vmem:[%s15845_s1 + $0x940] ss:$24 sps:$4 sm:$0xff]  }
 0x21c   :  { %8243 = vmatpush1.bf16.msra.mxu0 %v11003_v61  ;;  %7728 = vmatprep.subr.bf16.mxu1 %v11008_v62  ;;  %v11074_v61 = vld [vmem:[%s15845_s1 + $0x96c] ss:$24 sps:$4 sm:$0xff]   ;;  %v1202_v62 = vlaneseq }
 0x21d   :  { %8244 = vmatprep.subr.bf16.mxu0 %v11011_v63  ;;  %v11072_v63 = vld [vmem:[%s15845_s1 + $0x968] ss:$24 sps:$4 sm:$0xff]  }
 0x21f   :  { %7729 = vmatpush1.bf16.msra.mxu1 %v11006_v0  ;;  %v11075_v0 = vld [vmem:[%s15845_s1 + $0x970] ss:$24 sps:$4 sm:$0xff]  }
 0x220   :  { %8245 = vmatpush1.bf16.msra.mxu0 %v11009_v1  ;;  %7730 = vmatprep.subr.bf16.mxu1 %v11014_v2  ;;  %v11080_v1 = vld [vmem:[%s15845_s1 + $0x99c] ss:$24 sps:$4 sm:$0xff]   ;;  %v13999_v2 = vshrl.u32 %v1202_v62, 7  ;;  %v11108_v62 = vld [vmem:[%s15845_s1 + $0xa88] ss:$24 sps:$4 sm:$0xff]  }
 0x221   :  { %8246 = vmatprep.subr.bf16.mxu0 %v11017_v10  ;;  %v11078_v10 = vld [vmem:[%s15845_s1 + $0x998] ss:$24 sps:$4 sm:$0xff]  }
 0x223   :  { %7731 = vmatpush1.bf16.msra.mxu1 %v11012_v3  ;;  %v11081_v3 = vld [vmem:[%s15845_s1 + $0x9a0] ss:$24 sps:$4 sm:$0xff]  }
 0x224   :  { %8247 = vmatpush1.bf16.msra.mxu0 %v11015_v4  ;;  %7732 = vmatprep.subr.bf16.mxu1 %v11020_v5  ;;  %v11086_v4 = vld [vmem:[%s15845_s1 + $0x9cc] ss:$24 sps:$4 sm:$0xff]  }
 0x225   :  { %8248 = vmatprep.subr.bf16.mxu0 %v11023_v40  ;;  %v11089_v5 = vld [vmem:[%s15845_s1 + $0x9d4] ss:$24 sps:$4 sm:$0xff]   ;;  %v11084_v40 = vld [vmem:[%s15845_s1 + $0x9c8] ss:$24 sps:$4 sm:$0xff]  }
 0x227   :  { %7733 = vmatpush1.bf16.msra.mxu1 %v11018_v46  ;;  %v14017_v46 = vsub.s32 0, %v13999_v2 }
 0x228   :  { %8249 = vmatpush1.bf16.msra.mxu0 %v11021_v47  ;;  %7734 = vmatprep.subr.bf16.mxu1 %v11026_v14  ;;  %v11087_v47 = vld [vmem:[%s15845_s1 + $0x9d0] ss:$24 sps:$4 sm:$0xff]   ;;  %v1200_v14 = vld [vmem:[%s15846_s2] sm:$0x3f] }
 0x229   :  { %8250 = vmatprep.subr.bf16.mxu0 %v11029_v15  ;;  %v14026_v15 = vsub.s32 1, %v13999_v2 }
 0x22b   :  { %7735 = vmatpush1.bf16.msra.mxu1 %v11024_v16  ;;  %v11092_v16 = vld [vmem:[%s15845_s1 + $0x9fc] ss:$24 sps:$4 sm:$0xff]  }
 0x22c   :  { %8251 = vmatpush1.bf16.msra.mxu0 %v11027_v17  ;;  %7736 = vmatprep.subr.bf16.mxu1 %v11032_v18  ;;  %v11095_v17 = vld [vmem:[%s15845_s1 + $0xa04] ss:$24 sps:$4 sm:$0xff]   ;;  %v1205_v18 = vrot.slane %v1200_v14, %v14017_v46 }
 0x22d   :  { %8252 = vmatprep.subr.bf16.mxu0 %v11035_v19  ;;  %v1209_v19 = vrot.slane %v1200_v14, %v14026_v15  ;;  %v11131_v14 = vld [vmem:[%s15845_s1 + $0xb24] ss:$24 sps:$4 sm:$0xff]  }
 0x22f   :  { %7737 = vmatpush1.bf16.msra.mxu1 %v11030_v24  ;;  %v11090_v24 = vld [vmem:[%s15845_s1 + $0x9f8] ss:$24 sps:$4 sm:$0xff]  }
 0x230   :  { %8253 = vmatpush1.bf16.msra.mxu0 %v11033_v25  ;;  %7738 = vmatprep.subr.bf16.mxu1 %v11038_v41  ;;  %v11093_v25 = vld [vmem:[%s15845_s1 + $0xa00] ss:$24 sps:$4 sm:$0xff]   ;;  %v11098_v41 = vld [vmem:[%s15845_s1 + $0xa2c] ss:$24 sps:$4 sm:$0xff]  }
 0x231   :  { %8254 = vmatprep.subr.bf16.mxu0 %v11041_v42  ;;  %v11101_v42 = vld [vmem:[%s15845_s1 + $0xa34] ss:$24 sps:$4 sm:$0xff]  }
 0x233   :  { %7739 = vmatpush1.bf16.msra.mxu1 %v11036_v44 }
 0x234   :  { %8255 = vmatpush1.bf16.msra.mxu0 %v11039_v45  ;;  %7740 = vmatprep.subr.bf16.mxu1 %v11044_v26 }
 0x235   :  { %8256 = vmatprep.subr.bf16.mxu0 %v11047_v27 }
 0x237   :  { %7741 = vmatpush1.bf16.msra.mxu1 %v11042_v20 }
 0x238   :  { %8257 = vmatpush1.bf16.msra.mxu0 %v11045_v30  ;;  %7742 = vmatprep.subr.bf16.mxu1 %v11050_v31 }
 0x239   :  { %8258 = vmatprep.subr.bf16.mxu0 %v11053_v36 }
 0x23b   :  { %7743 = vmatpush1.bf16.msra.mxu1 %v11048_v32  ;;  %v11096_v32 = vld [vmem:[%s15845_s1 + $0xa28] ss:$24 sps:$4 sm:$0xff]  }
 0x23c   :  { %8259 = vmatpush1.bf16.msra.mxu0 %v11051_v52  ;;  %7744 = vmatprep.subr.bf16.mxu1 %v11056_v37  ;;  %v11099_v52 = vld [vmem:[%s15845_s1 + $0xa30] ss:$24 sps:$4 sm:$0xff]  }
 0x23d   :  { %8260 = vmatprep.subr.bf16.mxu0 %v11059_v38 }
 0x23f   :  { %7745 = vmatpush1.bf16.msra.mxu1 %v11054_v39 }
 0x240   :  { %8261 = vmatpush1.bf16.msra.mxu0 %v11057_v53  ;;  %7757 = vmatprep.subr.bf16.mxu1 %v11062_v54  ;;  %v11104_v54 = vld [vmem:[%s15845_s1 + $0xa5c] ss:$24 sps:$4 sm:$0xff]  }
 0x241   :  { %8273 = vmatprep.subr.bf16.mxu0 %v11065_v6  ;;  %v11107_v6 = vld [vmem:[%s15845_s1 + $0xa64] ss:$24 sps:$4 sm:$0xff]  }
 0x242   :  { %7747 = vmatmul.mubr.bf16.vlgmr.msra.gmra.mrb[4].mxu1 %v12685_v48 }
 0x243   :  { %8263 = vmatmul.mubr.bf16.vlgmr.msra.gmra.mrb[4].mxu0 %v12685_v48  ;;  %7758 = vmatpush1.bf16.msra.mxu1 %v11060_v7  ;;  %v11077_v48 = vld [vmem:[%s15845_s1 + $0x974] ss:$24 sps:$4 sm:$0xff]  }
 0x244   :  { %8274 = vmatpush1.bf16.msra.mxu0 %v11063_v56  ;;  %7759 = vmatprep.subr.bf16.mxu1 %v11068_v57 }
 0x245   :  { %8275 = vmatprep.subr.bf16.mxu0 %v11071_v58  ;;  %7789 = vmatprep.mubr.bf16.mxu1 %v12709_v33 }
 0x246   :  { %8305 = vmatprep.mubr.bf16.mxu0 %v12709_v33  ;;  %v11083_v33 = vld [vmem:[%s15845_s1 + $0x9a4] ss:$24 sps:$4 sm:$0xff]  }
 0x247   :  { %7760 = vmatpush1.bf16.msra.mxu1 %v11066_v59  ;;  %v11102_v59 = vld [vmem:[%s15845_s1 + $0xa58] ss:$24 sps:$4 sm:$0xff]  }
 0x248   :  { %8276 = vmatpush1.bf16.msra.mxu0 %v11069_v60  ;;  %7761 = vmatprep.subr.bf16.mxu1 %v11074_v61  ;;  %v11105_v60 = vld [vmem:[%s15845_s1 + $0xa60] ss:$24 sps:$4 sm:$0xff]   ;;  %v11110_v61 = vld [vmem:[%s15845_s1 + $0xa8c] ss:$24 sps:$4 sm:$0xff]  }
 0x249   :  { %8277 = vmatprep.subr.bf16.mxu0 %v11077_v48  ;;  %v11113_v48 = vld [vmem:[%s15845_s1 + $0xa94] ss:$24 sps:$4 sm:$0xff]  }
 0x24b   :  { %7762 = vmatpush1.bf16.msra.mxu1 %v11072_v63  ;;  %v11111_v63 = vld [vmem:[%s15845_s1 + $0xa90] ss:$24 sps:$4 sm:$0xff]  }
 0x24c   :  { %8278 = vmatpush1.bf16.msra.mxu0 %v11075_v0  ;;  %7763 = vmatprep.subr.bf16.mxu1 %v11080_v1  ;;  %v11116_v0 = vld [vmem:[%s15845_s1 + $0xabc] ss:$24 sps:$4 sm:$0xff]  }
 0x24d   :  { %8279 = vmatprep.subr.bf16.mxu0 %v11083_v33  ;;  %v11119_v1 = vld [vmem:[%s15845_s1 + $0xac4] ss:$24 sps:$4 sm:$0xff]   ;;  %v11114_v33 = vld [vmem:[%s15845_s1 + $0xab8] ss:$24 sps:$4 sm:$0xff]  }
 0x24f   :  { %7764 = vmatpush1.bf16.msra.mxu1 %v11078_v10  ;;  %v11117_v10 = vld [vmem:[%s15845_s1 + $0xac0] ss:$24 sps:$4 sm:$0xff]  }
 0x250   :  { %8280 = vmatpush1.bf16.msra.mxu0 %v11081_v3  ;;  %7765 = vmatprep.subr.bf16.mxu1 %v11086_v4  ;;  %v11122_v3 = vld [vmem:[%s15845_s1 + $0xaec] ss:$24 sps:$4 sm:$0xff]  }
 0x251   :  { %8281 = vmatprep.subr.bf16.mxu0 %v11089_v5  ;;  %v11125_v4 = vld [vmem:[%s15845_s1 + $0xaf4] ss:$24 sps:$4 sm:$0xff]   ;;  %v11120_v5 = vld [vmem:[%s15845_s1 + $0xae8] ss:$24 sps:$4 sm:$0xff]  }
 0x253   :  { %7766 = vmatpush1.bf16.msra.mxu1 %v11084_v40  ;;  %v11123_v40 = vld [vmem:[%s15845_s1 + $0xaf0] ss:$24 sps:$4 sm:$0xff]  }
 0x254   :  { %8282 = vmatpush1.bf16.msra.mxu0 %v11087_v47  ;;  %7767 = vmatprep.subr.bf16.mxu1 %v11092_v16  ;;  %v11128_v47 = vld [vmem:[%s15845_s1 + $0xb1c] ss:$24 sps:$4 sm:$0xff]   ;;  %v11126_v16 = vld [vmem:[%s15845_s1 + $0xb18] ss:$24 sps:$4 sm:$0xff]  }
 0x255   :  { %8283 = vmatprep.subr.bf16.mxu0 %v11095_v17  ;;  %v7361_v44 = vpop.f32.mrb[0].mxu1  ;;  %v11129_v17 = vld [vmem:[%s15845_s1 + $0xb20] ss:$24 sps:$4 sm:$0xff]  }
 0x256   :  { %v7619_v45 = vpop.f32.mrb[0].mxu0  ;;  %v10049_v26 = vadd.f32 %v7361_v44, %v1205_v18  ;;  %v7363_v27 = vpop.f32.mrb[1].mxu1  ;;  %v11138_v44 = vld [vmem:[%s15845_s1 + $0xb78] ss:$24 sps:$4 sm:$0xff]  }
 0x257   :  { %v7621_v20 = vpop.f32.mrb[1].mxu0  ;;  %v10051_v30 = vadd.f32 %v7363_v27, %v1209_v19  ;;  %v7365_v31 = vpop.f32.mrb[2].mxu1  ;;  %7768 = vmatpush1.bf16.msra.mxu1 %v11090_v24  ;;  %v11132_v24 = vld [vmem:[%s15845_s1 + $0xb48] ss:$24 sps:$4 sm:$0xff]   ;;  %v11149_v27 = vld [vmem:[%s15845_s1 + $0xbb4] ss:$24 sps:$4 sm:$0xff]  }
 0x258   :  { %v7623_v36 = vpop.f32.mrb[2].mxu0  ;;  %8284 = vmatpush1.bf16.msra.mxu0 %v11093_v25  ;;  %v14054_v37 = vadd.f32 %v10049_v26, %v7619_v45  ;;  %v10053_v38 = vadd.f32 %v7365_v31, %v1205_v18  ;;  %v7367_v39 = vpop.f32.mrb[3].mxu1  ;;  %7769 = vmatprep.subr.bf16.mxu1 %v11098_v41  ;;  %v11134_v18 = vld [vmem:[%s15845_s1 + $0xb4c] ss:$24 sps:$4 sm:$0xff]   ;;  %v11135_v25 = vld [vmem:[%s15845_s1 + $0xb50] ss:$24 sps:$4 sm:$0xff]  }
 0x259   :  { %v7625_v53 = vpop.f32.mrb[3].mxu0  ;;  %8285 = vmatprep.subr.bf16.mxu0 %v11101_v42  ;;  %v14062_v7 = vadd.f32 %v10051_v30, %v7621_v20  ;;  %v10055_v56 = vadd.f32 %v7367_v39, %v1209_v19  ;;  %v11137_v19 = vld [vmem:[%s15845_s1 + $0xb54] ss:$24 sps:$4 sm:$0xff]   ;;  %v11143_v42 = vld [vmem:[%s15845_s1 + $0xb84] ss:$24 sps:$4 sm:$0xff]  }
 0x25a   :  { %v14064_v57 = vadd.f32 %v10053_v38, %v7623_v36  ;;  %v11140_v41 = vld [vmem:[%s15845_s1 + $0xb7c] ss:$24 sps:$4 sm:$0xff]   ;;  %v11141_v45 = vld [vmem:[%s15845_s1 + $0xb80] ss:$24 sps:$4 sm:$0xff]   ;;  %v11146_v26 = vld [vmem:[%s15845_s1 + $0xbac] ss:$24 sps:$4 sm:$0xff]  }
 0x25b   :  { %v14066_v58 = vadd.f32 %v10055_v56, %v7625_v53  ;;  %7770 = vmatpush1.bf16.msra.mxu1 %v11096_v32  ;;  %v11144_v20 = vld [vmem:[%s15845_s1 + $0xba8] ss:$24 sps:$4 sm:$0xff]   ;;  %v11152_v31 = vld [vmem:[%s15845_s1 + $0xbdc] ss:$24 sps:$4 sm:$0xff]   ;;  %v11150_v32 = vld [vmem:[%s15845_s1 + $0xbd8] ss:$24 sps:$4 sm:$0xff]  }
 0x25c   :  { %8286 = vmatpush1.bf16.msra.mxu0 %v11099_v52  ;;  %7771 = vmatprep.subr.bf16.mxu1 %v11104_v54  ;;  %v11147_v30 = vld [vmem:[%s15845_s1 + $0xbb0] ss:$24 sps:$4 sm:$0xff]   ;;  %v11155_v36 = vld [vmem:[%s15845_s1 + $0xbe4] ss:$24 sps:$4 sm:$0xff]   ;;  %v11153_v52 = vld [vmem:[%s15845_s1 + $0xbe0] ss:$24 sps:$4 sm:$0xff]  }
 0x25d   :  { %8287 = vmatprep.subr.bf16.mxu0 %v11107_v6  ;;  %v11158_v38 = vld [vmem:[%s15845_s1 + $0xc0c] ss:$24 sps:$4 sm:$0xff]   ;;  %v11156_v53 = vld [vmem:[%s15845_s1 + $0xc08] ss:$24 sps:$4 sm:$0xff]   ;;  %v11164_v6 = vld [vmem:[%s15845_s1 + $0xc3c] ss:$24 sps:$4 sm:$0xff]  }
 0x25e   :  { %v11161_v39 = vld [vmem:[%s15845_s1 + $0xc14] ss:$24 sps:$4 sm:$0xff]   ;;  %v11159_v54 = vld [vmem:[%s15845_s1 + $0xc10] ss:$24 sps:$4 sm:$0xff]   ;;  %v11167_v56 = vld [vmem:[%s15845_s1 + $0xc44] ss:$24 sps:$4 sm:$0xff]  }
 0x25f   :  { %7772 = vmatpush1.bf16.msra.mxu1 %v11102_v59  ;;  %v11162_v59 = vld [vmem:[%s15845_s1 + $0xc38] ss:$24 sps:$4 sm:$0xff]  }
 0x260   :  { %8288 = vmatpush1.bf16.msra.mxu0 %v11105_v60  ;;  %7773 = vmatprep.subr.bf16.mxu1 %v11110_v61  ;;  %v11165_v60 = vld [vmem:[%s15845_s1 + $0xc40] ss:$24 sps:$4 sm:$0xff]   ;;  %v11170_v61 = vld [vmem:[%s15845_s1 + $0xc6c] ss:$24 sps:$4 sm:$0xff]  }
 0x261   :  { %8289 = vmatprep.subr.bf16.mxu0 %v11113_v48  ;;  %v11168_v48 = vld [vmem:[%s15845_s1 + $0xc68] ss:$24 sps:$4 sm:$0xff]  }
 0x263   :  { %7774 = vmatpush1.bf16.msra.mxu1 %v11108_v62  ;;  %v11171_v62 = vld [vmem:[%s15845_s1 + $0xc70] ss:$24 sps:$4 sm:$0xff]  }
 0x264   :  { %8290 = vmatpush1.bf16.msra.mxu0 %v11111_v63  ;;  %7775 = vmatprep.subr.bf16.mxu1 %v11116_v0  ;;  %v11176_v63 = vld [vmem:[%s15845_s1 + $0xc9c] ss:$24 sps:$4 sm:$0xff]   ;;  %v11174_v0 = vld [vmem:[%s15845_s1 + $0xc98] ss:$24 sps:$4 sm:$0xff]  }
 0x265   :  { %8291 = vmatprep.subr.bf16.mxu0 %v11119_v1  ;;  %v11177_v1 = vld [vmem:[%s15845_s1 + $0xca0] ss:$24 sps:$4 sm:$0xff]  }
 0x267   :  { %7776 = vmatpush1.bf16.msra.mxu1 %v11114_v33  ;;  %v11182_v33 = vld [vmem:[%s15845_s1 + $0xccc] ss:$24 sps:$4 sm:$0xff]  }
 0x268   :  { %8292 = vmatpush1.bf16.msra.mxu0 %v11117_v10  ;;  %7777 = vmatprep.subr.bf16.mxu1 %v11122_v3  ;;  %v11185_v10 = vld [vmem:[%s15845_s1 + $0xcd4] ss:$24 sps:$4 sm:$0xff]   ;;  %v11180_v3 = vld [vmem:[%s15845_s1 + $0xcc8] ss:$24 sps:$4 sm:$0xff]  }
 0x269   :  { %8293 = vmatprep.subr.bf16.mxu0 %v11125_v4  ;;  %v11183_v4 = vld [vmem:[%s15845_s1 + $0xcd0] ss:$24 sps:$4 sm:$0xff]  }
 0x26b   :  { %7778 = vmatpush1.bf16.msra.mxu1 %v11120_v5  ;;  %v11188_v5 = vld [vmem:[%s15845_s1 + $0xcfc] ss:$24 sps:$4 sm:$0xff]  }
 0x26c   :  { %8294 = vmatpush1.bf16.msra.mxu0 %v11123_v40  ;;  %7779 = vmatprep.subr.bf16.mxu1 %v11128_v47  ;;  %v11191_v40 = vld [vmem:[%s15845_s1 + $0xd04] ss:$24 sps:$4 sm:$0xff]  }
 0x26d   :  { %8295 = vmatprep.subr.bf16.mxu0 %v11131_v14 }
 0x26f   :  { %7780 = vmatpush1.bf16.msra.mxu1 %v11126_v16 }
 0x270   :  { %8296 = vmatpush1.bf16.msra.mxu0 %v11129_v17  ;;  %7781 = vmatprep.subr.bf16.mxu1 %v11134_v18 }
 0x271   :  { %8297 = vmatprep.subr.bf16.mxu0 %v11137_v19 }
 0x273   :  { %7782 = vmatpush1.bf16.msra.mxu1 %v11132_v24 }
 0x274   :  { %8298 = vmatpush1.bf16.msra.mxu0 %v11135_v25  ;;  %7783 = vmatprep.subr.bf16.mxu1 %v11140_v41 }
 0x275   :  { %8299 = vmatprep.subr.bf16.mxu0 %v11143_v42 }
 0x277   :  { %7784 = vmatpush1.bf16.msra.mxu1 %v11138_v44 }
 0x278   :  { %8300 = vmatpush1.bf16.msra.mxu0 %v11141_v45  ;;  %7785 = vmatprep.subr.bf16.mxu1 %v11146_v26 }
 0x279   :  { %8301 = vmatprep.subr.bf16.mxu0 %v11149_v27 }
 0x27b   :  { %7786 = vmatpush1.bf16.msra.mxu1 %v11144_v20 }
 0x27c   :  { %8302 = vmatpush1.bf16.msra.mxu0 %v11147_v30  ;;  %7787 = vmatprep.subr.bf16.mxu1 %v11152_v31 }
 0x27d   :  { %8303 = vmatprep.subr.bf16.mxu0 %v11155_v36 }
 0x27f   :  { %7788 = vmatpush1.bf16.msra.mxu1 %v11150_v32 }
 0x280   :  { %8304 = vmatpush1.bf16.msra.mxu0 %v11153_v52  ;;  %7800 = vmatprep.subr.bf16.mxu1 %v11158_v38 }
 0x281   :  { %8316 = vmatprep.subr.bf16.mxu0 %v11161_v39 }
 0x282   :  { %7790 = vmatmul.mubr.bf16.vlgmr.msra.gmra.mrb[4].mxu1 %v12917_v8 }
 0x283   :  { %8306 = vmatmul.mubr.bf16.vlgmr.msra.gmra.mrb[4].mxu0 %v12917_v8  ;;  %7801 = vmatpush1.bf16.msra.mxu1 %v11156_v53  ;;  %v11173_v8 = vld [vmem:[%s15845_s1 + $0xc74] ss:$24 sps:$4 sm:$0xff]  }
 0x284   :  { %8317 = vmatpush1.bf16.msra.mxu0 %v11159_v54  ;;  %7802 = vmatprep.subr.bf16.mxu1 %v11164_v6 }
 0x285   :  { %8318 = vmatprep.subr.bf16.mxu0 %v11167_v56  ;;  %7832 = vmatprep.mubr.bf16.mxu1 %v12941_v50 }
 0x286   :  { %8348 = vmatprep.mubr.bf16.mxu0 %v12941_v50  ;;  %v11179_v50 = vld [vmem:[%s15845_s1 + $0xca4] ss:$24 sps:$4 sm:$0xff]  }
 0x287   :  { %7803 = vmatpush1.bf16.msra.mxu1 %v11162_v59 }
 0x288   :  { %8319 = vmatpush1.bf16.msra.mxu0 %v11165_v60  ;;  %7804 = vmatprep.subr.bf16.mxu1 %v11170_v61 }
 0x289   :  { %8320 = vmatprep.subr.bf16.mxu0 %v11173_v8 }
 0x28b   :  { %7805 = vmatpush1.bf16.msra.mxu1 %v11168_v48 }
 0x28c   :  { %8321 = vmatpush1.bf16.msra.mxu0 %v11171_v62  ;;  %7806 = vmatprep.subr.bf16.mxu1 %v11176_v63 }
 0x28d   :  { %8322 = vmatprep.subr.bf16.mxu0 %v11179_v50 }
 0x28f   :  { %7807 = vmatpush1.bf16.msra.mxu1 %v11174_v0 }
 0x290   :  { %8323 = vmatpush1.bf16.msra.mxu0 %v11177_v1  ;;  %7808 = vmatprep.subr.bf16.mxu1 %v11182_v33 }
 0x291   :  { %8324 = vmatprep.subr.bf16.mxu0 %v11185_v10 }
 0x292   :  { %11 = vsyncpa [#allocation3], 0  ;;  %v11186_v47 = vld [vmem:[%s15845_s1 + $0xcf8] ss:$24 sps:$4 sm:$0xff]   ;;  %v11194_v16 = vld [vmem:[%s15845_s1 + $0xd2c] ss:$24 sps:$4 sm:$0xff]  }
 0x293   :  { %7809 = vmatpush1.bf16.msra.mxu1 %v11180_v3  ;;  %v11189_v14 = vld [vmem:[%s15845_s1 + $0xd00] ss:$24 sps:$4 sm:$0xff]   ;;  %v11197_v17 = vld [vmem:[%s15845_s1 + $0xd34] ss:$24 sps:$4 sm:$0xff]   ;;  %v11195_v19 = vld [vmem:[%s15845_s1 + $0xd30] ss:$24 sps:$4 sm:$0xff]  }
 0x294   :  { %8325 = vmatpush1.bf16.msra.mxu0 %v11183_v4  ;;  %7810 = vmatprep.subr.bf16.mxu1 %v11188_v5  ;;  %v11192_v18 = vld [vmem:[%s15845_s1 + $0xd28] ss:$24 sps:$4 sm:$0xff]   ;;  %v11200_v24 = vld [vmem:[%s15845_s1 + $0xd5c] ss:$24 sps:$4 sm:$0xff]   ;;  %v11198_v41 = vld [vmem:[%s15845_s1 + $0xd58] ss:$24 sps:$4 sm:$0xff]  }
 0x295   :  { %8326 = vmatprep.subr.bf16.mxu0 %v11191_v40  ;;  %v11203_v25 = vld [vmem:[%s15845_s1 + $0xd64] ss:$24 sps:$4 sm:$0xff]   ;;  %v11201_v42 = vld [vmem:[%s15845_s1 + $0xd60] ss:$24 sps:$4 sm:$0xff]   ;;  %v11209_v45 = vld [vmem:[%s15845_s1 + $0xd94] ss:$24 sps:$4 sm:$0xff]  }
 0x296   :  { %v11206_v44 = vld [vmem:[%s15845_s1 + $0xd8c] ss:$24 sps:$4 sm:$0xff]   ;;  %v11204_v26 = vld [vmem:[%s15845_s1 + $0xd88] ss:$24 sps:$4 sm:$0xff]   ;;  %v11212_v20 = vld [vmem:[%s15845_s1 + $0xdbc] ss:$24 sps:$4 sm:$0xff]  }
 0x297   :  { %7811 = vmatpush1.bf16.msra.mxu1 %v11186_v47  ;;  %v11207_v27 = vld [vmem:[%s15845_s1 + $0xd90] ss:$24 sps:$4 sm:$0xff]   ;;  %v11215_v30 = vld [vmem:[%s15845_s1 + $0xdc4] ss:$24 sps:$4 sm:$0xff]   ;;  %v11213_v36 = vld [vmem:[%s15845_s1 + $0xdc0] ss:$24 sps:$4 sm:$0xff]  }
 0x298   :  { %8327 = vmatpush1.bf16.msra.mxu0 %v11189_v14  ;;  %7812 = vmatprep.subr.bf16.mxu1 %v11194_v16  ;;  %v11210_v31 = vld [vmem:[%s15845_s1 + $0xdb8] ss:$24 sps:$4 sm:$0xff]   ;;  %v11218_v32 = vld [vmem:[%s15845_s1 + $0xdec] ss:$24 sps:$4 sm:$0xff]   ;;  %v11216_v38 = vld [vmem:[%s15845_s1 + $0xde8] ss:$24 sps:$4 sm:$0xff]  }
 0x299   :  { %8328 = vmatprep.subr.bf16.mxu0 %v11197_v17  ;;  %v11221_v52 = vld [vmem:[%s15845_s1 + $0xdf4] ss:$24 sps:$4 sm:$0xff]   ;;  %v11219_v39 = vld [vmem:[%s15845_s1 + $0xdf0] ss:$24 sps:$4 sm:$0xff]   ;;  %v11227_v54 = vld [vmem:[%s15845_s1 + $0xe24] ss:$24 sps:$4 sm:$0xff]  }
 0x29a   :  { %v11224_v53 = vld [vmem:[%s15845_s1 + $0xe1c] ss:$24 sps:$4 sm:$0xff]   ;;  %v11222_v6 = vld [vmem:[%s15845_s1 + $0xe18] ss:$24 sps:$4 sm:$0xff]   ;;  %v11230_v59 = vld [vmem:[%s15845_s1 + $0xe4c] ss:$24 sps:$4 sm:$0xff]  }
 0x29b   :  { %7813 = vmatpush1.bf16.msra.mxu1 %v11192_v18  ;;  %v11225_v56 = vld [vmem:[%s15845_s1 + $0xe20] ss:$24 sps:$4 sm:$0xff]   ;;  %v11233_v60 = vld [vmem:[%s15845_s1 + $0xe54] ss:$24 sps:$4 sm:$0xff]   ;;  %v11231_v8 = vld [vmem:[%s15845_s1 + $0xe50] ss:$24 sps:$4 sm:$0xff]  }
 0x29c   :  { %8329 = vmatpush1.bf16.msra.mxu0 %v11195_v19  ;;  %7814 = vmatprep.subr.bf16.mxu1 %v11200_v24  ;;  %v11228_v61 = vld [vmem:[%s15845_s1 + $0xe48] ss:$24 sps:$4 sm:$0xff]   ;;  %v11236_v48 = vld [vmem:[%s15845_s1 + $0xe7c] ss:$24 sps:$4 sm:$0xff]   ;;  %v11234_v63 = vld [vmem:[%s15845_s1 + $0xe78] ss:$24 sps:$4 sm:$0xff]  }
 0x29d   :  { %8330 = vmatprep.subr.bf16.mxu0 %v11203_v25  ;;  %v11239_v62 = vld [vmem:[%s15845_s1 + $0xe84] ss:$24 sps:$4 sm:$0xff]   ;;  %v11237_v50 = vld [vmem:[%s15845_s1 + $0xe80] ss:$24 sps:$4 sm:$0xff]   ;;  %v11245_v1 = vld [vmem:[%s15845_s1 + $0xeb4] ss:$24 sps:$4 sm:$0xff]  }
 0x29e   :  { %v11242_v0 = vld [vmem:[%s15845_s1 + $0xeac] ss:$24 sps:$4 sm:$0xff]   ;;  %v11240_v33 = vld [vmem:[%s15845_s1 + $0xea8] ss:$24 sps:$4 sm:$0xff]   ;;  %v11248_v3 = vld [vmem:[%s15845_s1 + $0xedc] ss:$24 sps:$4 sm:$0xff]  }
 0x29f   :  { %7815 = vmatpush1.bf16.msra.mxu1 %v11198_v41  ;;  %v11243_v10 = vld [vmem:[%s15845_s1 + $0xeb0] ss:$24 sps:$4 sm:$0xff]   ;;  %v11251_v4 = vld [vmem:[%s15845_s1 + $0xee4] ss:$24 sps:$4 sm:$0xff]   ;;  %v11249_v40 = vld [vmem:[%s15845_s1 + $0xee0] ss:$24 sps:$4 sm:$0xff]  }
 0x2a0   :  { %8331 = vmatpush1.bf16.msra.mxu0 %v11201_v42  ;;  %7816 = vmatprep.subr.bf16.mxu1 %v11206_v44  ;;  %v11246_v5 = vld [vmem:[%s15845_s1 + $0xed8] ss:$24 sps:$4 sm:$0xff]   ;;  %v11254_v47 = vld [vmem:[%s15845_s1 + $0xf0c] ss:$24 sps:$4 sm:$0xff]   ;;  %v11252_v16 = vld [vmem:[%s15845_s1 + $0xf08] ss:$24 sps:$4 sm:$0xff]  }
 0x2a1   :  { %8332 = vmatprep.subr.bf16.mxu0 %v11209_v45  ;;  %v11257_v14 = vld [vmem:[%s15845_s1 + $0xf14] ss:$24 sps:$4 sm:$0xff]   ;;  %v11255_v17 = vld [vmem:[%s15845_s1 + $0xf10] ss:$24 sps:$4 sm:$0xff]   ;;  %v11263_v19 = vld [vmem:[%s15845_s1 + $0xf44] ss:$24 sps:$4 sm:$0xff]  }
 0x2a2   :  { %v11260_v18 = vld [vmem:[%s15845_s1 + $0xf3c] ss:$24 sps:$4 sm:$0xff]   ;;  %v11258_v24 = vld [vmem:[%s15845_s1 + $0xf38] ss:$24 sps:$4 sm:$0xff]   ;;  %v11266_v41 = vld [vmem:[%s15845_s1 + $0xf6c] ss:$24 sps:$4 sm:$0xff]  }
 0x2a3   :  { %7817 = vmatpush1.bf16.msra.mxu1 %v11204_v26  ;;  %v11261_v25 = vld [vmem:[%s15845_s1 + $0xf40] ss:$24 sps:$4 sm:$0xff]   ;;  %v11267_v44 = vld [vmem:[%s15845_s1 + $0xf70] ss:$24 sps:$4 sm:$0xff]   ;;  %v11272_v45 = vld [vmem:[%s15845_s1 + $0xf9c] ss:$24 sps:$4 sm:$0xff]  }
 0x2a4   :  { %8333 = vmatpush1.bf16.msra.mxu0 %v11207_v27  ;;  %7818 = vmatprep.subr.bf16.mxu1 %v11212_v20  ;;  %v11264_v42 = vld [vmem:[%s15845_s1 + $0xf68] ss:$24 sps:$4 sm:$0xff]   ;;  %v11270_v26 = vld [vmem:[%s15845_s1 + $0xf98] ss:$24 sps:$4 sm:$0xff]   ;;  %v11278_v20 = vld [vmem:[%s15845_s1 + $0xfcc] ss:$24 sps:$4 sm:$0xff]  }
 0x2a5   :  { %8334 = vmatprep.subr.bf16.mxu0 %v11215_v30  ;;  %v11273_v27 = vld [vmem:[%s15845_s1 + $0xfa0] ss:$24 sps:$4 sm:$0xff]   ;;  %v11281_v30 = vld [vmem:[%s15845_s1 + $0xfd4] ss:$24 sps:$4 sm:$0xff]  }
 0x2a7   :  { %7819 = vmatpush1.bf16.msra.mxu1 %v11210_v31  ;;  %v11276_v31 = vld [vmem:[%s15845_s1 + $0xfc8] ss:$24 sps:$4 sm:$0xff]  }
 0x2a8   :  { %8335 = vmatpush1.bf16.msra.mxu0 %v11213_v36  ;;  %7820 = vmatprep.subr.bf16.mxu1 %v11218_v32  ;;  %v11279_v36 = vld [vmem:[%s15845_s1 + $0xfd0] ss:$24 sps:$4 sm:$0xff]   ;;  %v11284_v32 = vld [vmem:[%s15845_s1 + $0xffc] ss:$24 sps:$4 sm:$0xff]  }
 0x2a9   :  { %8336 = vmatprep.subr.bf16.mxu0 %v11221_v52  ;;  %v11287_v52 = vld [vmem:[%s15845_s1 + $0x1004] ss:$24 sps:$4 sm:$0xff]  }
 0x2ab   :  { %7821 = vmatpush1.bf16.msra.mxu1 %v11216_v38  ;;  %v11282_v38 = vld [vmem:[%s15845_s1 + $0xff8] ss:$24 sps:$4 sm:$0xff]  }
 0x2ac   :  { %8337 = vmatpush1.bf16.msra.mxu0 %v11219_v39  ;;  %7822 = vmatprep.subr.bf16.mxu1 %v11224_v53  ;;  %v11285_v39 = vld [vmem:[%s15845_s1 + $0x1000] ss:$24 sps:$4 sm:$0xff]   ;;  %v11290_v53 = vld [vmem:[%s15845_s1 + $0x102c] ss:$24 sps:$4 sm:$0xff]  }
 0x2ad   :  { %8338 = vmatprep.subr.bf16.mxu0 %v11227_v54  ;;  %v11293_v54 = vld [vmem:[%s15845_s1 + $0x1034] ss:$24 sps:$4 sm:$0xff]  }
 0x2af   :  { %7823 = vmatpush1.bf16.msra.mxu1 %v11222_v6  ;;  %v11288_v6 = vld [vmem:[%s15845_s1 + $0x1028] ss:$24 sps:$4 sm:$0xff]  }
 0x2b0   :  { %8339 = vmatpush1.bf16.msra.mxu0 %v11225_v56  ;;  %7824 = vmatprep.subr.bf16.mxu1 %v11230_v59  ;;  %v11291_v56 = vld [vmem:[%s15845_s1 + $0x1030] ss:$24 sps:$4 sm:$0xff]   ;;  %v11296_v59 = vld [vmem:[%s15845_s1 + $0x105c] ss:$24 sps:$4 sm:$0xff]  }
 0x2b1   :  { %8340 = vmatprep.subr.bf16.mxu0 %v11233_v60  ;;  %v11299_v60 = vld [vmem:[%s15845_s1 + $0x1064] ss:$24 sps:$4 sm:$0xff]  }
 0x2b3   :  { %7825 = vmatpush1.bf16.msra.mxu1 %v11228_v61  ;;  %v11294_v61 = vld [vmem:[%s15845_s1 + $0x1058] ss:$24 sps:$4 sm:$0xff]  }
 0x2b4   :  { %8341 = vmatpush1.bf16.msra.mxu0 %v11231_v8  ;;  %7826 = vmatprep.subr.bf16.mxu1 %v11236_v48  ;;  %v11297_v8 = vld [vmem:[%s15845_s1 + $0x1060] ss:$24 sps:$4 sm:$0xff]   ;;  %v11302_v48 = vld [vmem:[%s15845_s1 + $0x108c] ss:$24 sps:$4 sm:$0xff]  }
 0x2b5   :  { %8342 = vmatprep.subr.bf16.mxu0 %v11239_v62  ;;  %v11305_v62 = vld [vmem:[%s15845_s1 + $0x1094] ss:$24 sps:$4 sm:$0xff]  }
 0x2b7   :  { %7827 = vmatpush1.bf16.msra.mxu1 %v11234_v63  ;;  %v11300_v63 = vld [vmem:[%s15845_s1 + $0x1088] ss:$24 sps:$4 sm:$0xff]  }
 0x2b8   :  { %8343 = vmatpush1.bf16.msra.mxu0 %v11237_v50  ;;  %7828 = vmatprep.subr.bf16.mxu1 %v11242_v0  ;;  %v11303_v50 = vld [vmem:[%s15845_s1 + $0x1090] ss:$24 sps:$4 sm:$0xff]   ;;  %v11308_v0 = vld [vmem:[%s15845_s1 + $0x10bc] ss:$24 sps:$4 sm:$0xff]  }
 0x2b9   :  { %8344 = vmatprep.subr.bf16.mxu0 %v11245_v1  ;;  %v11311_v1 = vld [vmem:[%s15845_s1 + $0x10c4] ss:$24 sps:$4 sm:$0xff]  }
 0x2bb   :  { %7829 = vmatpush1.bf16.msra.mxu1 %v11240_v33  ;;  %v11306_v33 = vld [vmem:[%s15845_s1 + $0x10b8] ss:$24 sps:$4 sm:$0xff]  }
 0x2bc   :  { %8345 = vmatpush1.bf16.msra.mxu0 %v11243_v10  ;;  %7830 = vmatprep.subr.bf16.mxu1 %v11248_v3  ;;  %v11309_v10 = vld [vmem:[%s15845_s1 + $0x10c0] ss:$24 sps:$4 sm:$0xff]   ;;  %v11314_v3 = vld [vmem:[%s15845_s1 + $0x10ec] ss:$24 sps:$4 sm:$0xff]  }
 0x2bd   :  { %8346 = vmatprep.subr.bf16.mxu0 %v11251_v4  ;;  %v11317_v4 = vld [vmem:[%s15845_s1 + $0x10f4] ss:$24 sps:$4 sm:$0xff]  }
 0x2bf   :  { %7831 = vmatpush1.bf16.msra.mxu1 %v11246_v5  ;;  %v11312_v5 = vld [vmem:[%s15845_s1 + $0x10e8] ss:$24 sps:$4 sm:$0xff]  }
 0x2c0   :  { %8347 = vmatpush1.bf16.msra.mxu0 %v11249_v40  ;;  %7843 = vmatprep.subr.bf16.mxu1 %v11254_v47  ;;  %v11315_v40 = vld [vmem:[%s15845_s1 + $0x10f0] ss:$24 sps:$4 sm:$0xff]   ;;  %v11320_v47 = vld [vmem:[%s15845_s1 + $0x111c] ss:$24 sps:$4 sm:$0xff]  }
 0x2c1   :  { %8359 = vmatprep.subr.bf16.mxu0 %v11257_v14  ;;  %v11323_v14 = vld [vmem:[%s15845_s1 + $0x1124] ss:$24 sps:$4 sm:$0xff]  }
 0x2c2   :  { %7833 = vmatmul.mubr.bf16.vlgmr.msra.gmra.mrb[4].mxu1 %v13153_v28 }
 0x2c3   :  { %8349 = vmatmul.mubr.bf16.vlgmr.msra.gmra.mrb[4].mxu0 %v13153_v28  ;;  %7844 = vmatpush1.bf16.msra.mxu1 %v11252_v16  ;;  %v11269_v28 = vld [vmem:[%s15845_s1 + $0xf74] ss:$24 sps:$4 sm:$0xff]   ;;  %v11318_v16 = vld [vmem:[%s15845_s1 + $0x1118] ss:$24 sps:$4 sm:$0xff]  }
 0x2c4   :  { %8360 = vmatpush1.bf16.msra.mxu0 %v11255_v17  ;;  %7845 = vmatprep.subr.bf16.mxu1 %v11260_v18  ;;  %v11321_v17 = vld [vmem:[%s15845_s1 + $0x1120] ss:$24 sps:$4 sm:$0xff]   ;;  %v11326_v18 = vld [vmem:[%s15845_s1 + $0x114c] ss:$24 sps:$4 sm:$0xff]  }
 0x2c5   :  { %8361 = vmatprep.subr.bf16.mxu0 %v11263_v19  ;;  %7875 = vmatprep.mubr.bf16.mxu1 %v13173_v12  ;;  %v11329_v19 = vld [vmem:[%s15845_s1 + $0x1154] ss:$24 sps:$4 sm:$0xff]  }
 0x2c6   :  { %8391 = vmatprep.mubr.bf16.mxu0 %v13173_v12  ;;  %v11275_v12 = vld [vmem:[%s15845_s1 + $0xfa4] ss:$24 sps:$4 sm:$0xff]  }
 0x2c7   :  { %7846 = vmatpush1.bf16.msra.mxu1 %v11258_v24  ;;  %v11324_v24 = vld [vmem:[%s15845_s1 + $0x1148] ss:$24 sps:$4 sm:$0xff]  }
 0x2c8   :  { %8362 = vmatpush1.bf16.msra.mxu0 %v11261_v25  ;;  %7847 = vmatprep.subr.bf16.mxu1 %v11266_v41  ;;  %v11327_v25 = vld [vmem:[%s15845_s1 + $0x1150] ss:$24 sps:$4 sm:$0xff]   ;;  %v11332_v41 = vld [vmem:[%s15845_s1 + $0x117c] ss:$24 sps:$4 sm:$0xff]  }
 0x2c9   :  { %8363 = vmatprep.subr.bf16.mxu0 %v11269_v28  ;;  %v11335_v28 = vld [vmem:[%s15845_s1 + $0x1184] ss:$24 sps:$4 sm:$0xff]  }
 0x2cb   :  { %7848 = vmatpush1.bf16.msra.mxu1 %v11264_v42  ;;  %v11330_v42 = vld [vmem:[%s15845_s1 + $0x1178] ss:$24 sps:$4 sm:$0xff]  }
 0x2cc   :  { %8364 = vmatpush1.bf16.msra.mxu0 %v11267_v44  ;;  %7849 = vmatprep.subr.bf16.mxu1 %v11272_v45  ;;  %v11333_v44 = vld [vmem:[%s15845_s1 + $0x1180] ss:$24 sps:$4 sm:$0xff]   ;;  %v11338_v45 = vld [vmem:[%s15845_s1 + $0x11ac] ss:$24 sps:$4 sm:$0xff]  }
 0x2cd   :  { %8365 = vmatprep.subr.bf16.mxu0 %v11275_v12  ;;  %v11341_v12 = vld [vmem:[%s15845_s1 + $0x11b4] ss:$24 sps:$4 sm:$0xff]  }
 0x2cf   :  { %7850 = vmatpush1.bf16.msra.mxu1 %v11270_v26  ;;  %v11336_v26 = vld [vmem:[%s15845_s1 + $0x11a8] ss:$24 sps:$4 sm:$0xff]  }
 0x2d0   :  { %8366 = vmatpush1.bf16.msra.mxu0 %v11273_v27  ;;  %7851 = vmatprep.subr.bf16.mxu1 %v11278_v20  ;;  %v11339_v27 = vld [vmem:[%s15845_s1 + $0x11b0] ss:$24 sps:$4 sm:$0xff]   ;;  %v11344_v20 = vld [vmem:[%s15845_s1 + $0x11dc] ss:$24 sps:$4 sm:$0xff]  }
 0x2d1   :  { %8367 = vmatprep.subr.bf16.mxu0 %v11281_v30  ;;  %v11347_v30 = vld [vmem:[%s15845_s1 + $0x11e4] ss:$24 sps:$4 sm:$0xff]  }
 0x2d3   :  { %7852 = vmatpush1.bf16.msra.mxu1 %v11276_v31  ;;  %v11342_v31 = vld [vmem:[%s15845_s1 + $0x11d8] ss:$24 sps:$4 sm:$0xff]  }
 0x2d4   :  { %8368 = vmatpush1.bf16.msra.mxu0 %v11279_v36  ;;  %7853 = vmatprep.subr.bf16.mxu1 %v11284_v32  ;;  %v11345_v36 = vld [vmem:[%s15845_s1 + $0x11e0] ss:$24 sps:$4 sm:$0xff]   ;;  %v11350_v32 = vld [vmem:[%s15845_s1 + $0x120c] ss:$24 sps:$4 sm:$0xff]  }
 0x2d5   :  { %8369 = vmatprep.subr.bf16.mxu0 %v11287_v52  ;;  %v11353_v52 = vld [vmem:[%s15845_s1 + $0x1214] ss:$24 sps:$4 sm:$0xff]  }
 0x2d7   :  { %7854 = vmatpush1.bf16.msra.mxu1 %v11282_v38  ;;  %v11348_v38 = vld [vmem:[%s15845_s1 + $0x1208] ss:$24 sps:$4 sm:$0xff]  }
 0x2d8   :  { %8370 = vmatpush1.bf16.msra.mxu0 %v11285_v39  ;;  %7855 = vmatprep.subr.bf16.mxu1 %v11290_v53  ;;  %v11351_v39 = vld [vmem:[%s15845_s1 + $0x1210] ss:$24 sps:$4 sm:$0xff]   ;;  %v11356_v53 = vld [vmem:[%s15845_s1 + $0x123c] ss:$24 sps:$4 sm:$0xff]  }
 0x2d9   :  { %8371 = vmatprep.subr.bf16.mxu0 %v11293_v54  ;;  %v11359_v54 = vld [vmem:[%s15845_s1 + $0x1244] ss:$24 sps:$4 sm:$0xff]  }
 0x2db   :  { %7856 = vmatpush1.bf16.msra.mxu1 %v11288_v6  ;;  %v11354_v6 = vld [vmem:[%s15845_s1 + $0x1238] ss:$24 sps:$4 sm:$0xff]  }
 0x2dc   :  { %8372 = vmatpush1.bf16.msra.mxu0 %v11291_v56  ;;  %7857 = vmatprep.subr.bf16.mxu1 %v11296_v59  ;;  %v11357_v56 = vld [vmem:[%s15845_s1 + $0x1240] ss:$24 sps:$4 sm:$0xff]   ;;  %v11362_v59 = vld [vmem:[%s15845_s1 + $0x126c] ss:$24 sps:$4 sm:$0xff]  }
 0x2dd   :  { %8373 = vmatprep.subr.bf16.mxu0 %v11299_v60  ;;  %v11360_v60 = vld [vmem:[%s15845_s1 + $0x1268] ss:$24 sps:$4 sm:$0xff]  }
 0x2df   :  { %7858 = vmatpush1.bf16.msra.mxu1 %v11294_v61  ;;  %v11363_v61 = vld [vmem:[%s15845_s1 + $0x1270] ss:$24 sps:$4 sm:$0xff]  }
 0x2e0   :  { %8374 = vmatpush1.bf16.msra.mxu0 %v11297_v8  ;;  %7859 = vmatprep.subr.bf16.mxu1 %v11302_v48  ;;  %v11368_v8 = vld [vmem:[%s15845_s1 + $0x129c] ss:$24 sps:$4 sm:$0xff]   ;;  %v11366_v48 = vld [vmem:[%s15845_s1 + $0x1298] ss:$24 sps:$4 sm:$0xff]  }
 0x2e1   :  { %8375 = vmatprep.subr.bf16.mxu0 %v11305_v62  ;;  %v11369_v62 = vld [vmem:[%s15845_s1 + $0x12a0] ss:$24 sps:$4 sm:$0xff]  }
 0x2e3   :  { %7860 = vmatpush1.bf16.msra.mxu1 %v11300_v63  ;;  %v11374_v63 = vld [vmem:[%s15845_s1 + $0x12cc] ss:$24 sps:$4 sm:$0xff]  }
 0x2e4   :  { %8376 = vmatpush1.bf16.msra.mxu0 %v11303_v50  ;;  %7861 = vmatprep.subr.bf16.mxu1 %v11308_v0  ;;  %v11377_v50 = vld [vmem:[%s15845_s1 + $0x12d4] ss:$24 sps:$4 sm:$0xff]   ;;  %v11372_v0 = vld [vmem:[%s15845_s1 + $0x12c8] ss:$24 sps:$4 sm:$0xff]  }
 0x2e5   :  { %8377 = vmatprep.subr.bf16.mxu0 %v11311_v1  ;;  %v11375_v1 = vld [vmem:[%s15845_s1 + $0x12d0] ss:$24 sps:$4 sm:$0xff]  }
 0x2e7   :  { %7862 = vmatpush1.bf16.msra.mxu1 %v11306_v33  ;;  %v11380_v33 = vld [vmem:[%s15845_s1 + $0x12fc] ss:$24 sps:$4 sm:$0xff]  }
 0x2e8   :  { %8378 = vmatpush1.bf16.msra.mxu0 %v11309_v10  ;;  %7863 = vmatprep.subr.bf16.mxu1 %v11314_v3  ;;  %v11383_v10 = vld [vmem:[%s15845_s1 + $0x1304] ss:$24 sps:$4 sm:$0xff]   ;;  %v11378_v3 = vld [vmem:[%s15845_s1 + $0x12f8] ss:$24 sps:$4 sm:$0xff]  }
 0x2e9   :  { %8379 = vmatprep.subr.bf16.mxu0 %v11317_v4  ;;  %v11381_v4 = vld [vmem:[%s15845_s1 + $0x1300] ss:$24 sps:$4 sm:$0xff]  }
 0x2eb   :  { %7864 = vmatpush1.bf16.msra.mxu1 %v11312_v5  ;;  %v11386_v5 = vld [vmem:[%s15845_s1 + $0x132c] ss:$24 sps:$4 sm:$0xff]  }
 0x2ec   :  { %8380 = vmatpush1.bf16.msra.mxu0 %v11315_v40  ;;  %7865 = vmatprep.subr.bf16.mxu1 %v11320_v47  ;;  %v11389_v40 = vld [vmem:[%s15845_s1 + $0x1334] ss:$24 sps:$4 sm:$0xff]   ;;  %v11384_v47 = vld [vmem:[%s15845_s1 + $0x1328] ss:$24 sps:$4 sm:$0xff]  }
 0x2ed   :  { %8381 = vmatprep.subr.bf16.mxu0 %v11323_v14  ;;  %v11387_v14 = vld [vmem:[%s15845_s1 + $0x1330] ss:$24 sps:$4 sm:$0xff]  }
 0x2ef   :  { %7866 = vmatpush1.bf16.msra.mxu1 %v11318_v16  ;;  %v11392_v16 = vld [vmem:[%s15845_s1 + $0x135c] ss:$24 sps:$4 sm:$0xff]  }
 0x2f0   :  { %8382 = vmatpush1.bf16.msra.mxu0 %v11321_v17  ;;  %7867 = vmatprep.subr.bf16.mxu1 %v11326_v18  ;;  %v11395_v17 = vld [vmem:[%s15845_s1 + $0x1364] ss:$24 sps:$4 sm:$0xff]   ;;  %v11390_v18 = vld [vmem:[%s15845_s1 + $0x1358] ss:$24 sps:$4 sm:$0xff]  }
 0x2f1   :  { %8383 = vmatprep.subr.bf16.mxu0 %v11329_v19  ;;  %v11393_v19 = vld [vmem:[%s15845_s1 + $0x1360] ss:$24 sps:$4 sm:$0xff]  }
 0x2f3   :  { %7868 = vmatpush1.bf16.msra.mxu1 %v11324_v24  ;;  %v11398_v24 = vld [vmem:[%s15845_s1 + $0x138c] ss:$24 sps:$4 sm:$0xff]  }
 0x2f4   :  { %8384 = vmatpush1.bf16.msra.mxu0 %v11327_v25  ;;  %7869 = vmatprep.subr.bf16.mxu1 %v11332_v41  ;;  %v11401_v25 = vld [vmem:[%s15845_s1 + $0x1394] ss:$24 sps:$4 sm:$0xff]   ;;  %v11396_v41 = vld [vmem:[%s15845_s1 + $0x1388] ss:$24 sps:$4 sm:$0xff]  }
 0x2f5   :  { %8385 = vmatprep.subr.bf16.mxu0 %v11335_v28  ;;  %v11399_v28 = vld [vmem:[%s15845_s1 + $0x1390] ss:$24 sps:$4 sm:$0xff]  }
 0x2f7   :  { %7870 = vmatpush1.bf16.msra.mxu1 %v11330_v42  ;;  %v11404_v42 = vld [vmem:[%s15845_s1 + $0x13bc] ss:$24 sps:$4 sm:$0xff]  }
 0x2f8   :  { %8386 = vmatpush1.bf16.msra.mxu0 %v11333_v44  ;;  %7871 = vmatprep.subr.bf16.mxu1 %v11338_v45  ;;  %v11407_v44 = vld [vmem:[%s15845_s1 + $0x13c4] ss:$24 sps:$4 sm:$0xff]   ;;  %v11402_v45 = vld [vmem:[%s15845_s1 + $0x13b8] ss:$24 sps:$4 sm:$0xff]  }
 0x2f9   :  { %8387 = vmatprep.subr.bf16.mxu0 %v11341_v12  ;;  %v11405_v12 = vld [vmem:[%s15845_s1 + $0x13c0] ss:$24 sps:$4 sm:$0xff]  }
 0x2fb   :  { %7872 = vmatpush1.bf16.msra.mxu1 %v11336_v26  ;;  %v11410_v26 = vld [vmem:[%s15845_s1 + $0x13ec] ss:$24 sps:$4 sm:$0xff]  }
 0x2fc   :  { %8388 = vmatpush1.bf16.msra.mxu0 %v11339_v27  ;;  %7873 = vmatprep.subr.bf16.mxu1 %v11344_v20  ;;  %v11413_v27 = vld [vmem:[%s15845_s1 + $0x13f4] ss:$24 sps:$4 sm:$0xff]   ;;  %v11408_v20 = vld [vmem:[%s15845_s1 + $0x13e8] ss:$24 sps:$4 sm:$0xff]  }
 0x2fd   :  { %8389 = vmatprep.subr.bf16.mxu0 %v11347_v30  ;;  %v11411_v30 = vld [vmem:[%s15845_s1 + $0x13f0] ss:$24 sps:$4 sm:$0xff]  }
 0x2ff   :  { %7874 = vmatpush1.bf16.msra.mxu1 %v11342_v31  ;;  %v11416_v31 = vld [vmem:[%s15845_s1 + $0x141c] ss:$24 sps:$4 sm:$0xff]  }
 0x300   :  { %8390 = vmatpush1.bf16.msra.mxu0 %v11345_v36  ;;  %7886 = vmatprep.subr.bf16.mxu1 %v11350_v32  ;;  %v11419_v36 = vld [vmem:[%s15845_s1 + $0x1424] ss:$24 sps:$4 sm:$0xff]   ;;  %v11414_v32 = vld [vmem:[%s15845_s1 + $0x1418] ss:$24 sps:$4 sm:$0xff]  }
 0x301   :  { %8402 = vmatprep.subr.bf16.mxu0 %v11353_v52  ;;  %v11417_v52 = vld [vmem:[%s15845_s1 + $0x1420] ss:$24 sps:$4 sm:$0xff]  }
 0x302   :  { %7876 = vmatmul.mubr.bf16.vlgmr.msra.gmra.mrb[4].mxu1 %v13365_v21 }
 0x303   :  { %8392 = vmatmul.mubr.bf16.vlgmr.msra.gmra.mrb[4].mxu0 %v13365_v21  ;;  %7887 = vmatpush1.bf16.msra.mxu1 %v11348_v38  ;;  %v11365_v21 = vld [vmem:[%s15845_s1 + $0x1274] ss:$24 sps:$4 sm:$0xff]  }
 0x304   :  { %8403 = vmatpush1.bf16.msra.mxu0 %v11351_v39  ;;  %7888 = vmatprep.subr.bf16.mxu1 %v11356_v53  ;;  %v11422_v38 = vld [vmem:[%s15845_s1 + $0x144c] ss:$24 sps:$4 sm:$0xff]   ;;  %v11420_v53 = vld [vmem:[%s15845_s1 + $0x1448] ss:$24 sps:$4 sm:$0xff]  }
 0x305   :  { %8404 = vmatprep.subr.bf16.mxu0 %v11359_v54  ;;  %7918 = vmatprep.mubr.bf16.mxu1 %v12156_v55  ;;  %v11425_v39 = vld [vmem:[%s15845_s1 + $0x1454] ss:$24 sps:$4 sm:$0xff]   ;;  %v11423_v54 = vld [vmem:[%s15845_s1 + $0x1450] ss:$24 sps:$4 sm:$0xff]  }
 0x306   :  { %8434 = vmatprep.mubr.bf16.mxu0 %v12156_v55  ;;  %v11371_v55 = vld [vmem:[%s15845_s1 + $0x12a4] ss:$24 sps:$4 sm:$0xff]  }
 0x307   :  { %7889 = vmatpush1.bf16.msra.mxu1 %v11354_v6  ;;  %v11428_v6 = vld [vmem:[%s15845_s1 + $0x147c] ss:$24 sps:$4 sm:$0xff]  }
 0x308   :  { %8405 = vmatpush1.bf16.msra.mxu0 %v11357_v56  ;;  %7890 = vmatprep.subr.bf16.mxu1 %v11362_v59  ;;  %v11431_v56 = vld [vmem:[%s15845_s1 + $0x1484] ss:$24 sps:$4 sm:$0xff]   ;;  %v11426_v59 = vld [vmem:[%s15845_s1 + $0x1478] ss:$24 sps:$4 sm:$0xff]  }
 0x309   :  { %8406 = vmatprep.subr.bf16.mxu0 %v11365_v21  ;;  %v11429_v21 = vld [vmem:[%s15845_s1 + $0x1480] ss:$24 sps:$4 sm:$0xff]  }
 0x30b   :  { %7891 = vmatpush1.bf16.msra.mxu1 %v11360_v60  ;;  %v11434_v60 = vld [vmem:[%s15845_s1 + $0x14ac] ss:$24 sps:$4 sm:$0xff]  }
 0x30c   :  { %8407 = vmatpush1.bf16.msra.mxu0 %v11363_v61  ;;  %7892 = vmatprep.subr.bf16.mxu1 %v11368_v8  ;;  %v11437_v61 = vld [vmem:[%s15845_s1 + $0x14b4] ss:$24 sps:$4 sm:$0xff]   ;;  %v11432_v8 = vld [vmem:[%s15845_s1 + $0x14a8] ss:$24 sps:$4 sm:$0xff]  }
 0x30d   :  { %8408 = vmatprep.subr.bf16.mxu0 %v11371_v55  ;;  %v11435_v55 = vld [vmem:[%s15845_s1 + $0x14b0] ss:$24 sps:$4 sm:$0xff]  }
 0x30f   :  { %7893 = vmatpush1.bf16.msra.mxu1 %v11366_v48  ;;  %v11440_v48 = vld [vmem:[%s15845_s1 + $0x14dc] ss:$24 sps:$4 sm:$0xff]  }
 0x310   :  { %8409 = vmatpush1.bf16.msra.mxu0 %v11369_v62  ;;  %7894 = vmatprep.subr.bf16.mxu1 %v11374_v63  ;;  %v11443_v62 = vld [vmem:[%s15845_s1 + $0x14e4] ss:$24 sps:$4 sm:$0xff]   ;;  %v11438_v63 = vld [vmem:[%s15845_s1 + $0x14d8] ss:$24 sps:$4 sm:$0xff]  }
 0x311   :  { %8410 = vmatprep.subr.bf16.mxu0 %v11377_v50  ;;  %v11441_v50 = vld [vmem:[%s15845_s1 + $0x14e0] ss:$24 sps:$4 sm:$0xff]  }
 0x313   :  { %7895 = vmatpush1.bf16.msra.mxu1 %v11372_v0  ;;  %v11446_v0 = vld [vmem:[%s15845_s1 + $0x150c] ss:$24 sps:$4 sm:$0xff]  }
 0x314   :  { %8411 = vmatpush1.bf16.msra.mxu0 %v11375_v1  ;;  %7896 = vmatprep.subr.bf16.mxu1 %v11380_v33  ;;  %v11449_v1 = vld [vmem:[%s15845_s1 + $0x1514] ss:$24 sps:$4 sm:$0xff]   ;;  %v11444_v33 = vld [vmem:[%s15845_s1 + $0x1508] ss:$24 sps:$4 sm:$0xff]  }
 0x315   :  { %8412 = vmatprep.subr.bf16.mxu0 %v11383_v10  ;;  %v11447_v10 = vld [vmem:[%s15845_s1 + $0x1510] ss:$24 sps:$4 sm:$0xff]  }
 0x317   :  { %7897 = vmatpush1.bf16.msra.mxu1 %v11378_v3  ;;  %v11452_v3 = vld [vmem:[%s15845_s1 + $0x153c] ss:$24 sps:$4 sm:$0xff]  }
 0x318   :  { %8413 = vmatpush1.bf16.msra.mxu0 %v11381_v4  ;;  %7898 = vmatprep.subr.bf16.mxu1 %v11386_v5  ;;  %v11455_v4 = vld [vmem:[%s15845_s1 + $0x1544] ss:$24 sps:$4 sm:$0xff]   ;;  %v11450_v5 = vld [vmem:[%s15845_s1 + $0x1538] ss:$24 sps:$4 sm:$0xff]  }
 0x319   :  { %8414 = vmatprep.subr.bf16.mxu0 %v11389_v40  ;;  %v11453_v40 = vld [vmem:[%s15845_s1 + $0x1540] ss:$24 sps:$4 sm:$0xff]  }
 0x31b   :  { %7899 = vmatpush1.bf16.msra.mxu1 %v11384_v47  ;;  %v11458_v47 = vld [vmem:[%s15845_s1 + $0x156c] ss:$24 sps:$4 sm:$0xff]  }
 0x31c   :  { %8415 = vmatpush1.bf16.msra.mxu0 %v11387_v14  ;;  %7900 = vmatprep.subr.bf16.mxu1 %v11392_v16  ;;  %v11456_v14 = vld [vmem:[%s15845_s1 + $0x1568] ss:$24 sps:$4 sm:$0xff]  }
 0x31d   :  { %8416 = vmatprep.subr.bf16.mxu0 %v11395_v17  ;;  %v11459_v16 = vld [vmem:[%s15845_s1 + $0x1570] ss:$24 sps:$4 sm:$0xff]   ;;  %v11464_v17 = vld [vmem:[%s15845_s1 + $0x159c] ss:$24 sps:$4 sm:$0xff]  }
 0x31f   :  { %7901 = vmatpush1.bf16.msra.mxu1 %v11390_v18  ;;  %v11462_v18 = vld [vmem:[%s15845_s1 + $0x1598] ss:$24 sps:$4 sm:$0xff]  }
 0x320   :  { %8417 = vmatpush1.bf16.msra.mxu0 %v11393_v19  ;;  %7902 = vmatprep.subr.bf16.mxu1 %v11398_v24  ;;  %v11465_v19 = vld [vmem:[%s15845_s1 + $0x15a0] ss:$24 sps:$4 sm:$0xff]   ;;  %v11470_v24 = vld [vmem:[%s15845_s1 + $0x15cc] ss:$24 sps:$4 sm:$0xff]  }
 0x321   :  { %8418 = vmatprep.subr.bf16.mxu0 %v11401_v25  ;;  %v11473_v25 = vld [vmem:[%s15845_s1 + $0x15d4] ss:$24 sps:$4 sm:$0xff]  }
 0x323   :  { %7903 = vmatpush1.bf16.msra.mxu1 %v11396_v41  ;;  %v11468_v41 = vld [vmem:[%s15845_s1 + $0x15c8] ss:$24 sps:$4 sm:$0xff]  }
 0x324   :  { %8419 = vmatpush1.bf16.msra.mxu0 %v11399_v28  ;;  %7904 = vmatprep.subr.bf16.mxu1 %v11404_v42  ;;  %v11471_v28 = vld [vmem:[%s15845_s1 + $0x15d0] ss:$24 sps:$4 sm:$0xff]   ;;  %v11476_v42 = vld [vmem:[%s15845_s1 + $0x15fc] ss:$24 sps:$4 sm:$0xff]  }
 0x325   :  { %8420 = vmatprep.subr.bf16.mxu0 %v11407_v44  ;;  %v11479_v44 = vld [vmem:[%s15845_s1 + $0x1604] ss:$24 sps:$4 sm:$0xff]  }
 0x327   :  { %7905 = vmatpush1.bf16.msra.mxu1 %v11402_v45  ;;  %v11474_v45 = vld [vmem:[%s15845_s1 + $0x15f8] ss:$24 sps:$4 sm:$0xff]  }
 0x328   :  { %8421 = vmatpush1.bf16.msra.mxu0 %v11405_v12  ;;  %7906 = vmatprep.subr.bf16.mxu1 %v11410_v26  ;;  %v11477_v12 = vld [vmem:[%s15845_s1 + $0x1600] ss:$24 sps:$4 sm:$0xff]   ;;  %v11482_v26 = vld [vmem:[%s15845_s1 + $0x162c] ss:$24 sps:$4 sm:$0xff]  }
 0x329   :  { %8422 = vmatprep.subr.bf16.mxu0 %v11413_v27  ;;  %v11485_v27 = vld [vmem:[%s15845_s1 + $0x1634] ss:$24 sps:$4 sm:$0xff]  }
 0x32b   :  { %7907 = vmatpush1.bf16.msra.mxu1 %v11408_v20  ;;  %v11480_v20 = vld [vmem:[%s15845_s1 + $0x1628] ss:$24 sps:$4 sm:$0xff]  }
 0x32c   :  { %8423 = vmatpush1.bf16.msra.mxu0 %v11411_v30  ;;  %7908 = vmatprep.subr.bf16.mxu1 %v11416_v31  ;;  %v11483_v30 = vld [vmem:[%s15845_s1 + $0x1630] ss:$24 sps:$4 sm:$0xff]   ;;  %v11488_v31 = vld [vmem:[%s15845_s1 + $0x165c] ss:$24 sps:$4 sm:$0xff]  }
 0x32d   :  { %8424 = vmatprep.subr.bf16.mxu0 %v11419_v36  ;;  %v11491_v36 = vld [vmem:[%s15845_s1 + $0x1664] ss:$24 sps:$4 sm:$0xff]  }
 0x32f   :  { %7909 = vmatpush1.bf16.msra.mxu1 %v11414_v32  ;;  %v11486_v32 = vld [vmem:[%s15845_s1 + $0x1658] ss:$24 sps:$4 sm:$0xff]  }
 0x330   :  { %8425 = vmatpush1.bf16.msra.mxu0 %v11417_v52  ;;  %7910 = vmatprep.subr.bf16.mxu1 %v11422_v38  ;;  %v11489_v52 = vld [vmem:[%s15845_s1 + $0x1660] ss:$24 sps:$4 sm:$0xff]   ;;  %v11494_v38 = vld [vmem:[%s15845_s1 + $0x168c] ss:$24 sps:$4 sm:$0xff]  }
 0x331   :  { %8426 = vmatprep.subr.bf16.mxu0 %v11425_v39  ;;  %v11497_v39 = vld [vmem:[%s15845_s1 + $0x1694] ss:$24 sps:$4 sm:$0xff]  }
 0x333   :  { %7911 = vmatpush1.bf16.msra.mxu1 %v11420_v53  ;;  %v11492_v53 = vld [vmem:[%s15845_s1 + $0x1688] ss:$24 sps:$4 sm:$0xff]  }
 0x334   :  { %8427 = vmatpush1.bf16.msra.mxu0 %v11423_v54  ;;  %7912 = vmatprep.subr.bf16.mxu1 %v11428_v6  ;;  %v11495_v54 = vld [vmem:[%s15845_s1 + $0x1690] ss:$24 sps:$4 sm:$0xff]   ;;  %v11500_v6 = vld [vmem:[%s15845_s1 + $0x16bc] ss:$24 sps:$4 sm:$0xff]  }
 0x335   :  { %8428 = vmatprep.subr.bf16.mxu0 %v11431_v56  ;;  %v11503_v56 = vld [vmem:[%s15845_s1 + $0x16c4] ss:$24 sps:$4 sm:$0xff]  }
 0x337   :  { %7913 = vmatpush1.bf16.msra.mxu1 %v11426_v59  ;;  %v11498_v59 = vld [vmem:[%s15845_s1 + $0x16b8] ss:$24 sps:$4 sm:$0xff]  }
 0x338   :  { %8429 = vmatpush1.bf16.msra.mxu0 %v11429_v21  ;;  %7914 = vmatprep.subr.bf16.mxu1 %v11434_v60  ;;  %v11501_v21 = vld [vmem:[%s15845_s1 + $0x16c0] ss:$24 sps:$4 sm:$0xff]   ;;  %v11506_v60 = vld [vmem:[%s15845_s1 + $0x16ec] ss:$24 sps:$4 sm:$0xff]  }
 0x339   :  { %8430 = vmatprep.subr.bf16.mxu0 %v11437_v61  ;;  %v11509_v61 = vld [vmem:[%s15845_s1 + $0x16f4] ss:$24 sps:$4 sm:$0xff]  }
 0x33b   :  { %7915 = vmatpush1.bf16.msra.mxu1 %v11432_v8  ;;  %v11504_v8 = vld [vmem:[%s15845_s1 + $0x16e8] ss:$24 sps:$4 sm:$0xff]  }
 0x33c   :  { %8431 = vmatpush1.bf16.msra.mxu0 %v11435_v55  ;;  %7916 = vmatprep.subr.bf16.mxu1 %v11440_v48  ;;  %v11507_v55 = vld [vmem:[%s15845_s1 + $0x16f0] ss:$24 sps:$4 sm:$0xff]   ;;  %v11512_v48 = vld [vmem:[%s15845_s1 + $0x171c] ss:$24 sps:$4 sm:$0xff]  }
 0x33d   :  { %8432 = vmatprep.subr.bf16.mxu0 %v11443_v62  ;;  %v11515_v62 = vld [vmem:[%s15845_s1 + $0x1724] ss:$24 sps:$4 sm:$0xff]  }
 0x33f   :  { %7917 = vmatpush1.bf16.msra.mxu1 %v11438_v63  ;;  %v11510_v63 = vld [vmem:[%s15845_s1 + $0x1718] ss:$24 sps:$4 sm:$0xff]  }
 0x340   :  { %8433 = vmatpush1.bf16.msra.mxu0 %v11441_v50  ;;  %7929 = vmatprep.subr.bf16.mxu1 %v11446_v0  ;;  %v11513_v50 = vld [vmem:[%s15845_s1 + $0x1720] ss:$24 sps:$4 sm:$0xff]   ;;  %v11518_v0 = vld [vmem:[%s15845_s1 + $0x174c] ss:$24 sps:$4 sm:$0xff]  }
 0x341   :  { %8445 = vmatprep.subr.bf16.mxu0 %v11449_v1  ;;  %v11521_v1 = vld [vmem:[%s15845_s1 + $0x1754] ss:$24 sps:$4 sm:$0xff]  }
 0x342   :  { %7919 = vmatmul.mubr.bf16.vlgmr.msra.gmra.mrb[4].mxu1 %v12215_v11 }
 0x343   :  { %8435 = vmatmul.mubr.bf16.vlgmr.msra.gmra.mrb[4].mxu0 %v12215_v11  ;;  %7930 = vmatpush1.bf16.msra.mxu1 %v11444_v33  ;;  %v11461_v11 = vld [vmem:[%s15845_s1 + $0x1574] ss:$24 sps:$4 sm:$0xff]   ;;  %v11516_v33 = vld [vmem:[%s15845_s1 + $0x1748] ss:$24 sps:$4 sm:$0xff]  }
 0x344   :  { %8446 = vmatpush1.bf16.msra.mxu0 %v11447_v10  ;;  %7931 = vmatprep.subr.bf16.mxu1 %v11452_v3  ;;  %v11519_v10 = vld [vmem:[%s15845_s1 + $0x1750] ss:$24 sps:$4 sm:$0xff]   ;;  %v11524_v3 = vld [vmem:[%s15845_s1 + $0x177c] ss:$24 sps:$4 sm:$0xff]  }
 0x345   :  { %8447 = vmatprep.subr.bf16.mxu0 %v11455_v4  ;;  %7961 = vmatprep.mubr.bf16.mxu1 %v12324_v43  ;;  %v11527_v4 = vld [vmem:[%s15845_s1 + $0x1784] ss:$24 sps:$4 sm:$0xff]  }
 0x346   :  { %8477 = vmatprep.mubr.bf16.mxu0 %v12324_v43  ;;  %v11467_v43 = vld [vmem:[%s15845_s1 + $0x15a4] ss:$24 sps:$4 sm:$0xff]  }
 0x347   :  { %7932 = vmatpush1.bf16.msra.mxu1 %v11450_v5  ;;  %v11522_v5 = vld [vmem:[%s15845_s1 + $0x1778] ss:$24 sps:$4 sm:$0xff]  }
 0x348   :  { %8448 = vmatpush1.bf16.msra.mxu0 %v11453_v40  ;;  %7933 = vmatprep.subr.bf16.mxu1 %v11458_v47  ;;  %v11525_v40 = vld [vmem:[%s15845_s1 + $0x1780] ss:$24 sps:$4 sm:$0xff]   ;;  %v11530_v47 = vld [vmem:[%s15845_s1 + $0x17ac] ss:$24 sps:$4 sm:$0xff]  }
 0x349   :  { %8449 = vmatprep.subr.bf16.mxu0 %v11461_v11  ;;  %v11533_v11 = vld [vmem:[%s15845_s1 + $0x17b4] ss:$24 sps:$4 sm:$0xff]  }
 0x34b   :  { %7934 = vmatpush1.bf16.msra.mxu1 %v11456_v14  ;;  %v11528_v14 = vld [vmem:[%s15845_s1 + $0x17a8] ss:$24 sps:$4 sm:$0xff]  }
 0x34c   :  { %8450 = vmatpush1.bf16.msra.mxu0 %v11459_v16  ;;  %7935 = vmatprep.subr.bf16.mxu1 %v11464_v17  ;;  %v11531_v16 = vld [vmem:[%s15845_s1 + $0x17b0] ss:$24 sps:$4 sm:$0xff]   ;;  %v11536_v17 = vld [vmem:[%s15845_s1 + $0x17dc] ss:$24 sps:$4 sm:$0xff]  }
 0x34d   :  { %8451 = vmatprep.subr.bf16.mxu0 %v11467_v43  ;;  %v11539_v43 = vld [vmem:[%s15845_s1 + $0x17e4] ss:$24 sps:$4 sm:$0xff]  }
 0x34f   :  { %7936 = vmatpush1.bf16.msra.mxu1 %v11462_v18  ;;  %v11534_v18 = vld [vmem:[%s15845_s1 + $0x17d8] ss:$24 sps:$4 sm:$0xff]  }
 0x350   :  { %8452 = vmatpush1.bf16.msra.mxu0 %v11465_v19  ;;  %7937 = vmatprep.subr.bf16.mxu1 %v11470_v24  ;;  %v11537_v19 = vld [vmem:[%s15845_s1 + $0x17e0] ss:$24 sps:$4 sm:$0xff]   ;;  %v11542_v24 = vld [vmem:[%s15845_s1 + $0x180c] ss:$24 sps:$4 sm:$0xff]  }
 0x351   :  { %8453 = vmatprep.subr.bf16.mxu0 %v11473_v25  ;;  %v11545_v25 = vld [vmem:[%s15845_s1 + $0x1814] ss:$24 sps:$4 sm:$0xff]  }
 0x353   :  { %7938 = vmatpush1.bf16.msra.mxu1 %v11468_v41  ;;  %v11540_v41 = vld [vmem:[%s15845_s1 + $0x1808] ss:$24 sps:$4 sm:$0xff]  }
 0x354   :  { %8454 = vmatpush1.bf16.msra.mxu0 %v11471_v28  ;;  %7939 = vmatprep.subr.bf16.mxu1 %v11476_v42  ;;  %v11543_v28 = vld [vmem:[%s15845_s1 + $0x1810] ss:$24 sps:$4 sm:$0xff]   ;;  %v11548_v42 = vld [vmem:[%s15845_s1 + $0x183c] ss:$24 sps:$4 sm:$0xff]  }
 0x355   :  { %8455 = vmatprep.subr.bf16.mxu0 %v11479_v44  ;;  %v11551_v44 = vld [vmem:[%s15845_s1 + $0x1844] ss:$24 sps:$4 sm:$0xff]  }
 0x357   :  { %7940 = vmatpush1.bf16.msra.mxu1 %v11474_v45  ;;  %v11546_v45 = vld [vmem:[%s15845_s1 + $0x1838] ss:$24 sps:$4 sm:$0xff]  }
 0x358   :  { %8456 = vmatpush1.bf16.msra.mxu0 %v11477_v12  ;;  %7941 = vmatprep.subr.bf16.mxu1 %v11482_v26  ;;  %v11549_v12 = vld [vmem:[%s15845_s1 + $0x1840] ss:$24 sps:$4 sm:$0xff]   ;;  %v11554_v26 = vld [vmem:[%s15845_s1 + $0x186c] ss:$24 sps:$4 sm:$0xff]  }
 0x359   :  { %8457 = vmatprep.subr.bf16.mxu0 %v11485_v27  ;;  %v11552_v27 = vld [vmem:[%s15845_s1 + $0x1868] ss:$24 sps:$4 sm:$0xff]  }
 0x35b   :  { %7942 = vmatpush1.bf16.msra.mxu1 %v11480_v20  ;;  %v11555_v20 = vld [vmem:[%s15845_s1 + $0x1870] ss:$24 sps:$4 sm:$0xff]  }
 0x35c   :  { %8458 = vmatpush1.bf16.msra.mxu0 %v11483_v30  ;;  %7943 = vmatprep.subr.bf16.mxu1 %v11488_v31  ;;  %v11560_v30 = vld [vmem:[%s15845_s1 + $0x189c] ss:$24 sps:$4 sm:$0xff]   ;;  %v11558_v31 = vld [vmem:[%s15845_s1 + $0x1898] ss:$24 sps:$4 sm:$0xff]  }
 0x35d   :  { %8459 = vmatprep.subr.bf16.mxu0 %v11491_v36  ;;  %v11561_v36 = vld [vmem:[%s15845_s1 + $0x18a0] ss:$24 sps:$4 sm:$0xff]  }
 0x35f   :  { %7944 = vmatpush1.bf16.msra.mxu1 %v11486_v32  ;;  %v11566_v32 = vld [vmem:[%s15845_s1 + $0x18cc] ss:$24 sps:$4 sm:$0xff]  }
 0x360   :  { %8460 = vmatpush1.bf16.msra.mxu0 %v11489_v52  ;;  %7945 = vmatprep.subr.bf16.mxu1 %v11494_v38  ;;  %v11569_v52 = vld [vmem:[%s15845_s1 + $0x18d4] ss:$24 sps:$4 sm:$0xff]   ;;  %v11564_v38 = vld [vmem:[%s15845_s1 + $0x18c8] ss:$24 sps:$4 sm:$0xff]  }
 0x361   :  { %8461 = vmatprep.subr.bf16.mxu0 %v11497_v39  ;;  %v11567_v39 = vld [vmem:[%s15845_s1 + $0x18d0] ss:$24 sps:$4 sm:$0xff]  }
 0x363   :  { %7946 = vmatpush1.bf16.msra.mxu1 %v11492_v53  ;;  %v11572_v53 = vld [vmem:[%s15845_s1 + $0x18fc] ss:$24 sps:$4 sm:$0xff]  }
 0x364   :  { %8462 = vmatpush1.bf16.msra.mxu0 %v11495_v54  ;;  %7947 = vmatprep.subr.bf16.mxu1 %v11500_v6  ;;  %v11575_v54 = vld [vmem:[%s15845_s1 + $0x1904] ss:$24 sps:$4 sm:$0xff]   ;;  %v11570_v6 = vld [vmem:[%s15845_s1 + $0x18f8] ss:$24 sps:$4 sm:$0xff]  }
 0x365   :  { %8463 = vmatprep.subr.bf16.mxu0 %v11503_v56  ;;  %v11573_v56 = vld [vmem:[%s15845_s1 + $0x1900] ss:$24 sps:$4 sm:$0xff]  }
 0x367   :  { %7948 = vmatpush1.bf16.msra.mxu1 %v11498_v59  ;;  %v11578_v59 = vld [vmem:[%s15845_s1 + $0x192c] ss:$24 sps:$4 sm:$0xff]  }
 0x368   :  { %8464 = vmatpush1.bf16.msra.mxu0 %v11501_v21  ;;  %7949 = vmatprep.subr.bf16.mxu1 %v11506_v60  ;;  %v11581_v21 = vld [vmem:[%s15845_s1 + $0x1934] ss:$24 sps:$4 sm:$0xff]   ;;  %v11576_v60 = vld [vmem:[%s15845_s1 + $0x1928] ss:$24 sps:$4 sm:$0xff]  }
 0x369   :  { %8465 = vmatprep.subr.bf16.mxu0 %v11509_v61  ;;  %v11579_v61 = vld [vmem:[%s15845_s1 + $0x1930] ss:$24 sps:$4 sm:$0xff]  }
 0x36b   :  { %7950 = vmatpush1.bf16.msra.mxu1 %v11504_v8  ;;  %v11584_v8 = vld [vmem:[%s15845_s1 + $0x195c] ss:$24 sps:$4 sm:$0xff]  }
 0x36c   :  { %8466 = vmatpush1.bf16.msra.mxu0 %v11507_v55  ;;  %7951 = vmatprep.subr.bf16.mxu1 %v11512_v48  ;;  %v11587_v55 = vld [vmem:[%s15845_s1 + $0x1964] ss:$24 sps:$4 sm:$0xff]   ;;  %v11582_v48 = vld [vmem:[%s15845_s1 + $0x1958] ss:$24 sps:$4 sm:$0xff]  }
 0x36d   :  { %8467 = vmatprep.subr.bf16.mxu0 %v11515_v62  ;;  %v11585_v62 = vld [vmem:[%s15845_s1 + $0x1960] ss:$24 sps:$4 sm:$0xff]  }
 0x36f   :  { %7952 = vmatpush1.bf16.msra.mxu1 %v11510_v63  ;;  %v11590_v63 = vld [vmem:[%s15845_s1 + $0x198c] ss:$24 sps:$4 sm:$0xff]  }
 0x370   :  { %8468 = vmatpush1.bf16.msra.mxu0 %v11513_v50  ;;  %7953 = vmatprep.subr.bf16.mxu1 %v11518_v0  ;;  %v11593_v50 = vld [vmem:[%s15845_s1 + $0x1994] ss:$24 sps:$4 sm:$0xff]   ;;  %v11588_v0 = vld [vmem:[%s15845_s1 + $0x1988] ss:$24 sps:$4 sm:$0xff]  }
 0x371   :  { %8469 = vmatprep.subr.bf16.mxu0 %v11521_v1  ;;  %v11591_v1 = vld [vmem:[%s15845_s1 + $0x1990] ss:$24 sps:$4 sm:$0xff]  }
 0x373   :  { %7954 = vmatpush1.bf16.msra.mxu1 %v11516_v33  ;;  %v11596_v33 = vld [vmem:[%s15845_s1 + $0x19bc] ss:$24 sps:$4 sm:$0xff]  }
 0x374   :  { %8470 = vmatpush1.bf16.msra.mxu0 %v11519_v10  ;;  %7955 = vmatprep.subr.bf16.mxu1 %v11524_v3  ;;  %v11599_v10 = vld [vmem:[%s15845_s1 + $0x19c4] ss:$24 sps:$4 sm:$0xff]   ;;  %v11594_v3 = vld [vmem:[%s15845_s1 + $0x19b8] ss:$24 sps:$4 sm:$0xff]  }
 0x375   :  { %8471 = vmatprep.subr.bf16.mxu0 %v11527_v4  ;;  %v11597_v4 = vld [vmem:[%s15845_s1 + $0x19c0] ss:$24 sps:$4 sm:$0xff]  }
 0x377   :  { %7956 = vmatpush1.bf16.msra.mxu1 %v11522_v5  ;;  %v11602_v5 = vld [vmem:[%s15845_s1 + $0x19ec] ss:$24 sps:$4 sm:$0xff]  }
 0x378   :  { %8472 = vmatpush1.bf16.msra.mxu0 %v11525_v40  ;;  %7957 = vmatprep.subr.bf16.mxu1 %v11530_v47  ;;  %v11605_v40 = vld [vmem:[%s15845_s1 + $0x19f4] ss:$24 sps:$4 sm:$0xff]   ;;  %v11600_v47 = vld [vmem:[%s15845_s1 + $0x19e8] ss:$24 sps:$4 sm:$0xff]  }
 0x379   :  { %8473 = vmatprep.subr.bf16.mxu0 %v11533_v11  ;;  %v11603_v11 = vld [vmem:[%s15845_s1 + $0x19f0] ss:$24 sps:$4 sm:$0xff]  }
 0x37b   :  { %7958 = vmatpush1.bf16.msra.mxu1 %v11528_v14  ;;  %v11608_v14 = vld [vmem:[%s15845_s1 + $0x1a1c] ss:$24 sps:$4 sm:$0xff]  }
 0x37c   :  { %8474 = vmatpush1.bf16.msra.mxu0 %v11531_v16  ;;  %7959 = vmatprep.subr.bf16.mxu1 %v11536_v17  ;;  %v11611_v16 = vld [vmem:[%s15845_s1 + $0x1a24] ss:$24 sps:$4 sm:$0xff]   ;;  %v11606_v17 = vld [vmem:[%s15845_s1 + $0x1a18] ss:$24 sps:$4 sm:$0xff]  }
 0x37d   :  { %8475 = vmatprep.subr.bf16.mxu0 %v11539_v43  ;;  %v11609_v43 = vld [vmem:[%s15845_s1 + $0x1a20] ss:$24 sps:$4 sm:$0xff]  }
 0x37f   :  { %7960 = vmatpush1.bf16.msra.mxu1 %v11534_v18  ;;  %v11614_v18 = vld [vmem:[%s15845_s1 + $0x1a4c] ss:$24 sps:$4 sm:$0xff]  }
 0x380   :  { %8476 = vmatpush1.bf16.msra.mxu0 %v11537_v19  ;;  %7972 = vmatprep.subr.bf16.mxu1 %v11542_v24  ;;  %v11617_v19 = vld [vmem:[%s15845_s1 + $0x1a54] ss:$24 sps:$4 sm:$0xff]   ;;  %v11612_v24 = vld [vmem:[%s15845_s1 + $0x1a48] ss:$24 sps:$4 sm:$0xff]  }
 0x381   :  { %8488 = vmatprep.subr.bf16.mxu0 %v11545_v25  ;;  %v11615_v25 = vld [vmem:[%s15845_s1 + $0x1a50] ss:$24 sps:$4 sm:$0xff]  }
 0x382   :  { %7962 = vmatmul.mubr.bf16.vlgmr.msra.gmra.mrb[4].mxu1 %v12444_v22 }
 0x383   :  { %8478 = vmatmul.mubr.bf16.vlgmr.msra.gmra.mrb[4].mxu0 %v12444_v22  ;;  %7973 = vmatpush1.bf16.msra.mxu1 %v11540_v41  ;;  %v11557_v22 = vld [vmem:[%s15845_s1 + $0x1874] ss:$24 sps:$4 sm:$0xff]  }
 0x384   :  { %8489 = vmatpush1.bf16.msra.mxu0 %v11543_v28  ;;  %7974 = vmatprep.subr.bf16.mxu1 %v11548_v42  ;;  %v11620_v41 = vld [vmem:[%s15845_s1 + $0x1a7c] ss:$24 sps:$4 sm:$0xff]   ;;  %v11618_v42 = vld [vmem:[%s15845_s1 + $0x1a78] ss:$24 sps:$4 sm:$0xff]  }
 0x385   :  { %8490 = vmatprep.subr.bf16.mxu0 %v11551_v44  ;;  %8004 = vmatprep.mubr.bf16.mxu1 %v12496_v35  ;;  %v11623_v28 = vld [vmem:[%s15845_s1 + $0x1a84] ss:$24 sps:$4 sm:$0xff]   ;;  %v11621_v44 = vld [vmem:[%s15845_s1 + $0x1a80] ss:$24 sps:$4 sm:$0xff]  }
 0x386   :  { %8520 = vmatprep.mubr.bf16.mxu0 %v12496_v35  ;;  %v11563_v35 = vld [vmem:[%s15845_s1 + $0x18a4] ss:$24 sps:$4 sm:$0xff]  }
 0x387   :  { %7975 = vmatpush1.bf16.msra.mxu1 %v11546_v45  ;;  %v11626_v45 = vld [vmem:[%s15845_s1 + $0x1aac] ss:$24 sps:$4 sm:$0xff]  }
 0x388   :  { %8491 = vmatpush1.bf16.msra.mxu0 %v11549_v12  ;;  %7976 = vmatprep.subr.bf16.mxu1 %v11554_v26  ;;  %v11629_v12 = vld [vmem:[%s15845_s1 + $0x1ab4] ss:$24 sps:$4 sm:$0xff]   ;;  %v11624_v26 = vld [vmem:[%s15845_s1 + $0x1aa8] ss:$24 sps:$4 sm:$0xff]  }
 0x389   :  { %8492 = vmatprep.subr.bf16.mxu0 %v11557_v22  ;;  %v11627_v22 = vld [vmem:[%s15845_s1 + $0x1ab0] ss:$24 sps:$4 sm:$0xff]  }
 0x38b   :  { %7977 = vmatpush1.bf16.msra.mxu1 %v11552_v27  ;;  %v11632_v27 = vld [vmem:[%s15845_s1 + $0x1adc] ss:$24 sps:$4 sm:$0xff]  }
 0x38c   :  { %8493 = vmatpush1.bf16.msra.mxu0 %v11555_v20  ;;  %7978 = vmatprep.subr.bf16.mxu1 %v11560_v30  ;;  %v11635_v20 = vld [vmem:[%s15845_s1 + $0x1ae4] ss:$24 sps:$4 sm:$0xff]   ;;  %v11630_v30 = vld [vmem:[%s15845_s1 + $0x1ad8] ss:$24 sps:$4 sm:$0xff]  }
 0x38d   :  { %8494 = vmatprep.subr.bf16.mxu0 %v11563_v35  ;;  %v11633_v35 = vld [vmem:[%s15845_s1 + $0x1ae0] ss:$24 sps:$4 sm:$0xff]  }
 0x38f   :  { %7979 = vmatpush1.bf16.msra.mxu1 %v11558_v31  ;;  %v11638_v31 = vld [vmem:[%s15845_s1 + $0x1b0c] ss:$24 sps:$4 sm:$0xff]  }
 0x390   :  { %8495 = vmatpush1.bf16.msra.mxu0 %v11561_v36  ;;  %7980 = vmatprep.subr.bf16.mxu1 %v11566_v32  ;;  %v11641_v36 = vld [vmem:[%s15845_s1 + $0x1b14] ss:$24 sps:$4 sm:$0xff]   ;;  %v11636_v32 = vld [vmem:[%s15845_s1 + $0x1b08] ss:$24 sps:$4 sm:$0xff]  }
 0x391   :  { %8496 = vmatprep.subr.bf16.mxu0 %v11569_v52  ;;  %v11639_v52 = vld [vmem:[%s15845_s1 + $0x1b10] ss:$24 sps:$4 sm:$0xff]  }
 0x393   :  { %7981 = vmatpush1.bf16.msra.mxu1 %v11564_v38  ;;  %v11644_v38 = vld [vmem:[%s15845_s1 + $0x1b3c] ss:$24 sps:$4 sm:$0xff]  }
 0x394   :  { %8497 = vmatpush1.bf16.msra.mxu0 %v11567_v39  ;;  %7982 = vmatprep.subr.bf16.mxu1 %v11572_v53  ;;  %v11647_v39 = vld [vmem:[%s15845_s1 + $0x1b44] ss:$24 sps:$4 sm:$0xff]   ;;  %v11642_v53 = vld [vmem:[%s15845_s1 + $0x1b38] ss:$24 sps:$4 sm:$0xff]  }
 0x395   :  { %8498 = vmatprep.subr.bf16.mxu0 %v11575_v54  ;;  %v11645_v54 = vld [vmem:[%s15845_s1 + $0x1b40] ss:$24 sps:$4 sm:$0xff]  }
 0x397   :  { %7983 = vmatpush1.bf16.msra.mxu1 %v11570_v6  ;;  %v11650_v6 = vld [vmem:[%s15845_s1 + $0x1b6c] ss:$24 sps:$4 sm:$0xff]  }
 0x398   :  { %8499 = vmatpush1.bf16.msra.mxu0 %v11573_v56  ;;  %7984 = vmatprep.subr.bf16.mxu1 %v11578_v59  ;;  %v11648_v56 = vld [vmem:[%s15845_s1 + $0x1b68] ss:$24 sps:$4 sm:$0xff]  }
 0x399   :  { %8500 = vmatprep.subr.bf16.mxu0 %v11581_v21  ;;  %v11651_v59 = vld [vmem:[%s15845_s1 + $0x1b70] ss:$24 sps:$4 sm:$0xff]   ;;  %v11656_v21 = vld [vmem:[%s15845_s1 + $0x1b9c] ss:$24 sps:$4 sm:$0xff]  }
 0x39b   :  { %7985 = vmatpush1.bf16.msra.mxu1 %v11576_v60  ;;  %v11654_v60 = vld [vmem:[%s15845_s1 + $0x1b98] ss:$24 sps:$4 sm:$0xff]  }
 0x39c   :  { %8501 = vmatpush1.bf16.msra.mxu0 %v11579_v61  ;;  %7986 = vmatprep.subr.bf16.mxu1 %v11584_v8  ;;  %v11657_v61 = vld [vmem:[%s15845_s1 + $0x1ba0] ss:$24 sps:$4 sm:$0xff]   ;;  %v11662_v8 = vld [vmem:[%s15845_s1 + $0x1bcc] ss:$24 sps:$4 sm:$0xff]  }
 0x39d   :  { %8502 = vmatprep.subr.bf16.mxu0 %v11587_v55  ;;  %v11665_v55 = vld [vmem:[%s15845_s1 + $0x1bd4] ss:$24 sps:$4 sm:$0xff]  }
 0x39f   :  { %7987 = vmatpush1.bf16.msra.mxu1 %v11582_v48  ;;  %v11660_v48 = vld [vmem:[%s15845_s1 + $0x1bc8] ss:$24 sps:$4 sm:$0xff]  }
 0x3a0   :  { %8503 = vmatpush1.bf16.msra.mxu0 %v11585_v62  ;;  %7988 = vmatprep.subr.bf16.mxu1 %v11590_v63  ;;  %v11663_v62 = vld [vmem:[%s15845_s1 + $0x1bd0] ss:$24 sps:$4 sm:$0xff]   ;;  %v11668_v63 = vld [vmem:[%s15845_s1 + $0x1bfc] ss:$24 sps:$4 sm:$0xff]  }
 0x3a1   :  { %8504 = vmatprep.subr.bf16.mxu0 %v11593_v50  ;;  %v11671_v50 = vld [vmem:[%s15845_s1 + $0x1c04] ss:$24 sps:$4 sm:$0xff]  }
 0x3a3   :  { %7989 = vmatpush1.bf16.msra.mxu1 %v11588_v0  ;;  %v11666_v0 = vld [vmem:[%s15845_s1 + $0x1bf8] ss:$24 sps:$4 sm:$0xff]  }
 0x3a4   :  { %8505 = vmatpush1.bf16.msra.mxu0 %v11591_v1  ;;  %7990 = vmatprep.subr.bf16.mxu1 %v11596_v33  ;;  %v11669_v1 = vld [vmem:[%s15845_s1 + $0x1c00] ss:$24 sps:$4 sm:$0xff]   ;;  %v11674_v33 = vld [vmem:[%s15845_s1 + $0x1c2c] ss:$24 sps:$4 sm:$0xff]  }
 0x3a5   :  { %8506 = vmatprep.subr.bf16.mxu0 %v11599_v10  ;;  %v11677_v10 = vld [vmem:[%s15845_s1 + $0x1c34] ss:$24 sps:$4 sm:$0xff]  }
 0x3a7   :  { %7991 = vmatpush1.bf16.msra.mxu1 %v11594_v3  ;;  %v11672_v3 = vld [vmem:[%s15845_s1 + $0x1c28] ss:$24 sps:$4 sm:$0xff]  }
 0x3a8   :  { %8507 = vmatpush1.bf16.msra.mxu0 %v11597_v4  ;;  %7992 = vmatprep.subr.bf16.mxu1 %v11602_v5  ;;  %v11675_v4 = vld [vmem:[%s15845_s1 + $0x1c30] ss:$24 sps:$4 sm:$0xff]   ;;  %v11680_v5 = vld [vmem:[%s15845_s1 + $0x1c5c] ss:$24 sps:$4 sm:$0xff]  }
 0x3a9   :  { %8508 = vmatprep.subr.bf16.mxu0 %v11605_v40  ;;  %v11683_v40 = vld [vmem:[%s15845_s1 + $0x1c64] ss:$24 sps:$4 sm:$0xff]  }
 0x3ab   :  { %7993 = vmatpush1.bf16.msra.mxu1 %v11600_v47  ;;  %v11678_v47 = vld [vmem:[%s15845_s1 + $0x1c58] ss:$24 sps:$4 sm:$0xff]  }
 0x3ac   :  { %8509 = vmatpush1.bf16.msra.mxu0 %v11603_v11  ;;  %7994 = vmatprep.subr.bf16.mxu1 %v11608_v14  ;;  %v11681_v11 = vld [vmem:[%s15845_s1 + $0x1c60] ss:$24 sps:$4 sm:$0xff]   ;;  %v11686_v14 = vld [vmem:[%s15845_s1 + $0x1c8c] ss:$24 sps:$4 sm:$0xff]  }
 0x3ad   :  { %8510 = vmatprep.subr.bf16.mxu0 %v11611_v16  ;;  %v11689_v16 = vld [vmem:[%s15845_s1 + $0x1c94] ss:$24 sps:$4 sm:$0xff]  }
 0x3af   :  { %7995 = vmatpush1.bf16.msra.mxu1 %v11606_v17  ;;  %v11684_v17 = vld [vmem:[%s15845_s1 + $0x1c88] ss:$24 sps:$4 sm:$0xff]  }
 0x3b0   :  { %8511 = vmatpush1.bf16.msra.mxu0 %v11609_v43  ;;  %7996 = vmatprep.subr.bf16.mxu1 %v11614_v18  ;;  %v11687_v43 = vld [vmem:[%s15845_s1 + $0x1c90] ss:$24 sps:$4 sm:$0xff]   ;;  %v11692_v18 = vld [vmem:[%s15845_s1 + $0x1cbc] ss:$24 sps:$4 sm:$0xff]  }
 0x3b1   :  { %8512 = vmatprep.subr.bf16.mxu0 %v11617_v19  ;;  %v11695_v19 = vld [vmem:[%s15845_s1 + $0x1cc4] ss:$24 sps:$4 sm:$0xff]  }
 0x3b3   :  { %7997 = vmatpush1.bf16.msra.mxu1 %v11612_v24  ;;  %v11690_v24 = vld [vmem:[%s15845_s1 + $0x1cb8] ss:$24 sps:$4 sm:$0xff]  }
 0x3b4   :  { %8513 = vmatpush1.bf16.msra.mxu0 %v11615_v25  ;;  %7998 = vmatprep.subr.bf16.mxu1 %v11620_v41  ;;  %v11693_v25 = vld [vmem:[%s15845_s1 + $0x1cc0] ss:$24 sps:$4 sm:$0xff]   ;;  %v11698_v41 = vld [vmem:[%s15845_s1 + $0x1cec] ss:$24 sps:$4 sm:$0xff]  }
 0x3b5   :  { %8514 = vmatprep.subr.bf16.mxu0 %v11623_v28  ;;  %v11701_v28 = vld [vmem:[%s15845_s1 + $0x1cf4] ss:$24 sps:$4 sm:$0xff]  }
 0x3b7   :  { %7999 = vmatpush1.bf16.msra.mxu1 %v11618_v42  ;;  %v11696_v42 = vld [vmem:[%s15845_s1 + $0x1ce8] ss:$24 sps:$4 sm:$0xff]  }
 0x3b8   :  { %8515 = vmatpush1.bf16.msra.mxu0 %v11621_v44  ;;  %8000 = vmatprep.subr.bf16.mxu1 %v11626_v45  ;;  %v11699_v44 = vld [vmem:[%s15845_s1 + $0x1cf0] ss:$24 sps:$4 sm:$0xff]   ;;  %v11704_v45 = vld [vmem:[%s15845_s1 + $0x1d1c] ss:$24 sps:$4 sm:$0xff]  }
 0x3b9   :  { %8516 = vmatprep.subr.bf16.mxu0 %v11629_v12  ;;  %v11707_v12 = vld [vmem:[%s15845_s1 + $0x1d24] ss:$24 sps:$4 sm:$0xff]  }
 0x3bb   :  { %8001 = vmatpush1.bf16.msra.mxu1 %v11624_v26  ;;  %v11702_v26 = vld [vmem:[%s15845_s1 + $0x1d18] ss:$24 sps:$4 sm:$0xff]  }
 0x3bc   :  { %8517 = vmatpush1.bf16.msra.mxu0 %v11627_v22  ;;  %8002 = vmatprep.subr.bf16.mxu1 %v11632_v27  ;;  %v11705_v22 = vld [vmem:[%s15845_s1 + $0x1d20] ss:$24 sps:$4 sm:$0xff]   ;;  %v11710_v27 = vld [vmem:[%s15845_s1 + $0x1d4c] ss:$24 sps:$4 sm:$0xff]  }
 0x3bd   :  { %8518 = vmatprep.subr.bf16.mxu0 %v11635_v20  ;;  %v11713_v20 = vld [vmem:[%s15845_s1 + $0x1d54] ss:$24 sps:$4 sm:$0xff]  }
 0x3bf   :  { %8003 = vmatpush1.bf16.msra.mxu1 %v11630_v30  ;;  %v11708_v30 = vld [vmem:[%s15845_s1 + $0x1d48] ss:$24 sps:$4 sm:$0xff]  }
 0x3c0   :  { %8519 = vmatpush1.bf16.msra.mxu0 %v11633_v35  ;;  %8015 = vmatprep.subr.bf16.mxu1 %v11638_v31  ;;  %v11711_v35 = vld [vmem:[%s15845_s1 + $0x1d50] ss:$24 sps:$4 sm:$0xff]   ;;  %v11716_v31 = vld [vmem:[%s15845_s1 + $0x1d7c] ss:$24 sps:$4 sm:$0xff]  }
 0x3c1   :  { %8531 = vmatprep.subr.bf16.mxu0 %v11641_v36  ;;  %v11719_v36 = vld [vmem:[%s15845_s1 + $0x1d84] ss:$24 sps:$4 sm:$0xff]  }
 0x3c2   :  { %8005 = vmatmul.mubr.bf16.vlgmr.msra.gmra.mrb[4].mxu1 %v12689_v49 }
 0x3c3   :  { %8521 = vmatmul.mubr.bf16.vlgmr.msra.gmra.mrb[4].mxu0 %v12689_v49  ;;  %8016 = vmatpush1.bf16.msra.mxu1 %v11636_v32  ;;  %v11653_v49 = vld [vmem:[%s15845_s1 + $0x1b74] ss:$24 sps:$4 sm:$0xff]   ;;  %v11714_v32 = vld [vmem:[%s15845_s1 + $0x1d78] ss:$24 sps:$4 sm:$0xff]  }
 0x3c4   :  { %8532 = vmatpush1.bf16.msra.mxu0 %v11639_v52  ;;  %8017 = vmatprep.subr.bf16.mxu1 %v11644_v38  ;;  %v11717_v52 = vld [vmem:[%s15845_s1 + $0x1d80] ss:$24 sps:$4 sm:$0xff]   ;;  %v11722_v38 = vld [vmem:[%s15845_s1 + $0x1dac] ss:$24 sps:$4 sm:$0xff]  }
 0x3c5   :  { %8533 = vmatprep.subr.bf16.mxu0 %v11647_v39  ;;  %8047 = vmatprep.mubr.bf16.mxu1 %v12713_v34  ;;  %v11725_v39 = vld [vmem:[%s15845_s1 + $0x1db4] ss:$24 sps:$4 sm:$0xff]  }
 0x3c6   :  { %8563 = vmatprep.mubr.bf16.mxu0 %v12713_v34  ;;  %v11659_v34 = vld [vmem:[%s15845_s1 + $0x1ba4] ss:$24 sps:$4 sm:$0xff]  }
 0x3c7   :  { %8018 = vmatpush1.bf16.msra.mxu1 %v11642_v53  ;;  %v11720_v53 = vld [vmem:[%s15845_s1 + $0x1da8] ss:$24 sps:$4 sm:$0xff]  }
 0x3c8   :  { %8534 = vmatpush1.bf16.msra.mxu0 %v11645_v54  ;;  %8019 = vmatprep.subr.bf16.mxu1 %v11650_v6  ;;  %v11723_v54 = vld [vmem:[%s15845_s1 + $0x1db0] ss:$24 sps:$4 sm:$0xff]   ;;  %v11728_v6 = vld [vmem:[%s15845_s1 + $0x1ddc] ss:$24 sps:$4 sm:$0xff]  }
 0x3c9   :  { %8535 = vmatprep.subr.bf16.mxu0 %v11653_v49  ;;  %v11731_v49 = vld [vmem:[%s15845_s1 + $0x1de4] ss:$24 sps:$4 sm:$0xff]  }
 0x3cb   :  { %8020 = vmatpush1.bf16.msra.mxu1 %v11648_v56  ;;  %v11726_v56 = vld [vmem:[%s15845_s1 + $0x1dd8] ss:$24 sps:$4 sm:$0xff]  }
 0x3cc   :  { %8536 = vmatpush1.bf16.msra.mxu0 %v11651_v59  ;;  %8021 = vmatprep.subr.bf16.mxu1 %v11656_v21  ;;  %v11729_v59 = vld [vmem:[%s15845_s1 + $0x1de0] ss:$24 sps:$4 sm:$0xff]   ;;  %v11734_v21 = vld [vmem:[%s15845_s1 + $0x1e0c] ss:$24 sps:$4 sm:$0xff]  }
 0x3cd   :  { %8537 = vmatprep.subr.bf16.mxu0 %v11659_v34  ;;  %v11737_v34 = vld [vmem:[%s15845_s1 + $0x1e14] ss:$24 sps:$4 sm:$0xff]  }
 0x3cf   :  { %8022 = vmatpush1.bf16.msra.mxu1 %v11654_v60  ;;  %v11732_v60 = vld [vmem:[%s15845_s1 + $0x1e08] ss:$24 sps:$4 sm:$0xff]  }
 0x3d0   :  { %8538 = vmatpush1.bf16.msra.mxu0 %v11657_v61  ;;  %8023 = vmatprep.subr.bf16.mxu1 %v11662_v8  ;;  %v11735_v61 = vld [vmem:[%s15845_s1 + $0x1e10] ss:$24 sps:$4 sm:$0xff]   ;;  %v11740_v8 = vld [vmem:[%s15845_s1 + $0x1e3c] ss:$24 sps:$4 sm:$0xff]  }
 0x3d1   :  { %8539 = vmatprep.subr.bf16.mxu0 %v11665_v55  ;;  %v11743_v55 = vld [vmem:[%s15845_s1 + $0x1e44] ss:$24 sps:$4 sm:$0xff]  }
 0x3d3   :  { %8024 = vmatpush1.bf16.msra.mxu1 %v11660_v48  ;;  %v11738_v48 = vld [vmem:[%s15845_s1 + $0x1e38] ss:$24 sps:$4 sm:$0xff]  }
 0x3d4   :  { %8540 = vmatpush1.bf16.msra.mxu0 %v11663_v62  ;;  %8025 = vmatprep.subr.bf16.mxu1 %v11668_v63  ;;  %v11741_v62 = vld [vmem:[%s15845_s1 + $0x1e40] ss:$24 sps:$4 sm:$0xff]   ;;  %v11746_v63 = vld [vmem:[%s15845_s1 + $0x1e6c] ss:$24 sps:$4 sm:$0xff]  }
 0x3d5   :  { %8541 = vmatprep.subr.bf16.mxu0 %v11671_v50  ;;  %v11744_v50 = vld [vmem:[%s15845_s1 + $0x1e68] ss:$24 sps:$4 sm:$0xff]  }
 0x3d7   :  { %8026 = vmatpush1.bf16.msra.mxu1 %v11666_v0  ;;  %v11747_v0 = vld [vmem:[%s15845_s1 + $0x1e70] ss:$24 sps:$4 sm:$0xff]  }
 0x3d8   :  { %8542 = vmatpush1.bf16.msra.mxu0 %v11669_v1  ;;  %8027 = vmatprep.subr.bf16.mxu1 %v11674_v33  ;;  %v11752_v1 = vld [vmem:[%s15845_s1 + $0x1e9c] ss:$24 sps:$4 sm:$0xff]   ;;  %v11750_v33 = vld [vmem:[%s15845_s1 + $0x1e98] ss:$24 sps:$4 sm:$0xff]  }
 0x3d9   :  { %8543 = vmatprep.subr.bf16.mxu0 %v11677_v10  ;;  %v11753_v10 = vld [vmem:[%s15845_s1 + $0x1ea0] ss:$24 sps:$4 sm:$0xff]  }
 0x3db   :  { %8028 = vmatpush1.bf16.msra.mxu1 %v11672_v3  ;;  %v11758_v3 = vld [vmem:[%s15845_s1 + $0x1ecc] ss:$24 sps:$4 sm:$0xff]  }
 0x3dc   :  { %8544 = vmatpush1.bf16.msra.mxu0 %v11675_v4  ;;  %8029 = vmatprep.subr.bf16.mxu1 %v11680_v5  ;;  %v11761_v4 = vld [vmem:[%s15845_s1 + $0x1ed4] ss:$24 sps:$4 sm:$0xff]   ;;  %v11756_v5 = vld [vmem:[%s15845_s1 + $0x1ec8] ss:$24 sps:$4 sm:$0xff]  }
 0x3dd   :  { %8545 = vmatprep.subr.bf16.mxu0 %v11683_v40  ;;  %v11759_v40 = vld [vmem:[%s15845_s1 + $0x1ed0] ss:$24 sps:$4 sm:$0xff]  }
 0x3df   :  { %8030 = vmatpush1.bf16.msra.mxu1 %v11678_v47  ;;  %v11764_v47 = vld [vmem:[%s15845_s1 + $0x1efc] ss:$24 sps:$4 sm:$0xff]  }
 0x3e0   :  { %8546 = vmatpush1.bf16.msra.mxu0 %v11681_v11  ;;  %8031 = vmatprep.subr.bf16.mxu1 %v11686_v14  ;;  %v11767_v11 = vld [vmem:[%s15845_s1 + $0x1f04] ss:$24 sps:$4 sm:$0xff]   ;;  %v11762_v14 = vld [vmem:[%s15845_s1 + $0x1ef8] ss:$24 sps:$4 sm:$0xff]  }
 0x3e1   :  { %8547 = vmatprep.subr.bf16.mxu0 %v11689_v16  ;;  %v11765_v16 = vld [vmem:[%s15845_s1 + $0x1f00] ss:$24 sps:$4 sm:$0xff]  }
 0x3e3   :  { %8032 = vmatpush1.bf16.msra.mxu1 %v11684_v17  ;;  %v11770_v17 = vld [vmem:[%s15845_s1 + $0x1f2c] ss:$24 sps:$4 sm:$0xff]  }
 0x3e4   :  { %8548 = vmatpush1.bf16.msra.mxu0 %v11687_v43  ;;  %8033 = vmatprep.subr.bf16.mxu1 %v11692_v18  ;;  %v11773_v43 = vld [vmem:[%s15845_s1 + $0x1f34] ss:$24 sps:$4 sm:$0xff]   ;;  %v11768_v18 = vld [vmem:[%s15845_s1 + $0x1f28] ss:$24 sps:$4 sm:$0xff]  }
 0x3e5   :  { %8549 = vmatprep.subr.bf16.mxu0 %v11695_v19  ;;  %v11771_v19 = vld [vmem:[%s15845_s1 + $0x1f30] ss:$24 sps:$4 sm:$0xff]  }
 0x3e7   :  { %8034 = vmatpush1.bf16.msra.mxu1 %v11690_v24  ;;  %v11776_v24 = vld [vmem:[%s15845_s1 + $0x1f5c] ss:$24 sps:$4 sm:$0xff]  }
 0x3e8   :  { %8550 = vmatpush1.bf16.msra.mxu0 %v11693_v25  ;;  %8035 = vmatprep.subr.bf16.mxu1 %v11698_v41  ;;  %v11779_v25 = vld [vmem:[%s15845_s1 + $0x1f64] ss:$24 sps:$4 sm:$0xff]   ;;  %v11774_v41 = vld [vmem:[%s15845_s1 + $0x1f58] ss:$24 sps:$4 sm:$0xff]  }
 0x3e9   :  { %8551 = vmatprep.subr.bf16.mxu0 %v11701_v28  ;;  %v11777_v28 = vld [vmem:[%s15845_s1 + $0x1f60] ss:$24 sps:$4 sm:$0xff]  }
 0x3eb   :  { %8036 = vmatpush1.bf16.msra.mxu1 %v11696_v42  ;;  %v11782_v42 = vld [vmem:[%s15845_s1 + $0x1f8c] ss:$24 sps:$4 sm:$0xff]  }
 0x3ec   :  { %8552 = vmatpush1.bf16.msra.mxu0 %v11699_v44  ;;  %8037 = vmatprep.subr.bf16.mxu1 %v11704_v45  ;;  %v11785_v44 = vld [vmem:[%s15845_s1 + $0x1f94] ss:$24 sps:$4 sm:$0xff]   ;;  %v11780_v45 = vld [vmem:[%s15845_s1 + $0x1f88] ss:$24 sps:$4 sm:$0xff]  }
 0x3ed   :  { %8553 = vmatprep.subr.bf16.mxu0 %v11707_v12  ;;  %v11783_v12 = vld [vmem:[%s15845_s1 + $0x1f90] ss:$24 sps:$4 sm:$0xff]  }
 0x3ef   :  { %8038 = vmatpush1.bf16.msra.mxu1 %v11702_v26  ;;  %v11788_v26 = vld [vmem:[%s15845_s1 + $0x1fbc] ss:$24 sps:$4 sm:$0xff]  }
 0x3f0   :  { %8554 = vmatpush1.bf16.msra.mxu0 %v11705_v22  ;;  %8039 = vmatprep.subr.bf16.mxu1 %v11710_v27  ;;  %v11791_v22 = vld [vmem:[%s15845_s1 + $0x1fc4] ss:$24 sps:$4 sm:$0xff]   ;;  %v11786_v27 = vld [vmem:[%s15845_s1 + $0x1fb8] ss:$24 sps:$4 sm:$0xff]  }
 0x3f1   :  { %8555 = vmatprep.subr.bf16.mxu0 %v11713_v20  ;;  %v11789_v20 = vld [vmem:[%s15845_s1 + $0x1fc0] ss:$24 sps:$4 sm:$0xff]  }
 0x3f3   :  { %8040 = vmatpush1.bf16.msra.mxu1 %v11708_v30  ;;  %v11794_v30 = vld [vmem:[%s15845_s1 + $0x1fec] ss:$24 sps:$4 sm:$0xff]  }
 0x3f4   :  { %8556 = vmatpush1.bf16.msra.mxu0 %v11711_v35  ;;  %8041 = vmatprep.subr.bf16.mxu1 %v11716_v31  ;;  %v11797_v35 = vld [vmem:[%s15845_s1 + $0x1ff4] ss:$24 sps:$4 sm:$0xff]   ;;  %v11792_v31 = vld [vmem:[%s15845_s1 + $0x1fe8] ss:$24 sps:$4 sm:$0xff]  }
 0x3f5   :  { %8557 = vmatprep.subr.bf16.mxu0 %v11719_v36  ;;  %v11795_v36 = vld [vmem:[%s15845_s1 + $0x1ff0] ss:$24 sps:$4 sm:$0xff]  }
 0x3f7   :  { %8042 = vmatpush1.bf16.msra.mxu1 %v11714_v32  ;;  %v11800_v32 = vld [vmem:[%s15845_s1 + $0x201c] ss:$24 sps:$4 sm:$0xff]  }
 0x3f8   :  { %8558 = vmatpush1.bf16.msra.mxu0 %v11717_v52  ;;  %8043 = vmatprep.subr.bf16.mxu1 %v11722_v38  ;;  %v11803_v52 = vld [vmem:[%s15845_s1 + $0x2024] ss:$24 sps:$4 sm:$0xff]   ;;  %v11798_v38 = vld [vmem:[%s15845_s1 + $0x2018] ss:$24 sps:$4 sm:$0xff]  }
 0x3f9   :  { %8559 = vmatprep.subr.bf16.mxu0 %v11725_v39  ;;  %v11801_v39 = vld [vmem:[%s15845_s1 + $0x2020] ss:$24 sps:$4 sm:$0xff]  }
 0x3fb   :  { %8044 = vmatpush1.bf16.msra.mxu1 %v11720_v53  ;;  %v11806_v53 = vld [vmem:[%s15845_s1 + $0x204c] ss:$24 sps:$4 sm:$0xff]  }
 0x3fc   :  { %8560 = vmatpush1.bf16.msra.mxu0 %v11723_v54  ;;  %8045 = vmatprep.subr.bf16.mxu1 %v11728_v6  ;;  %v11809_v54 = vld [vmem:[%s15845_s1 + $0x2054] ss:$24 sps:$4 sm:$0xff]   ;;  %v11804_v6 = vld [vmem:[%s15845_s1 + $0x2048] ss:$24 sps:$4 sm:$0xff]  }
 0x3fd   :  { %8561 = vmatprep.subr.bf16.mxu0 %v11731_v49  ;;  %v11807_v49 = vld [vmem:[%s15845_s1 + $0x2050] ss:$24 sps:$4 sm:$0xff]  }
 0x3ff   :  { %8046 = vmatpush1.bf16.msra.mxu1 %v11726_v56  ;;  %v11812_v56 = vld [vmem:[%s15845_s1 + $0x207c] ss:$24 sps:$4 sm:$0xff]  }
 0x400   :  { %8562 = vmatpush1.bf16.msra.mxu0 %v11729_v59  ;;  %8058 = vmatprep.subr.bf16.mxu1 %v11734_v21  ;;  %v11815_v59 = vld [vmem:[%s15845_s1 + $0x2084] ss:$24 sps:$4 sm:$0xff]   ;;  %v11810_v21 = vld [vmem:[%s15845_s1 + $0x2078] ss:$24 sps:$4 sm:$0xff]  }
 0x401   :  { %8574 = vmatprep.subr.bf16.mxu0 %v11737_v34  ;;  %v11813_v34 = vld [vmem:[%s15845_s1 + $0x2080] ss:$24 sps:$4 sm:$0xff]  }
 0x402   :  { %8048 = vmatmul.mubr.bf16.vlgmr.msra.gmra.mrb[4].mxu1 %v12921_v9 }
 0x403   :  { %8564 = vmatmul.mubr.bf16.vlgmr.msra.gmra.mrb[4].mxu0 %v12921_v9  ;;  %8059 = vmatpush1.bf16.msra.mxu1 %v11732_v60  ;;  %v11749_v9 = vld [vmem:[%s15845_s1 + $0x1e74] ss:$24 sps:$4 sm:$0xff]  }
 0x404   :  { %8575 = vmatpush1.bf16.msra.mxu0 %v11735_v61  ;;  %8060 = vmatprep.subr.bf16.mxu1 %v11740_v8  ;;  %v11818_v60 = vld [vmem:[%s15845_s1 + $0x20ac] ss:$24 sps:$4 sm:$0xff]   ;;  %v11816_v8 = vld [vmem:[%s15845_s1 + $0x20a8] ss:$24 sps:$4 sm:$0xff]  }
 0x405   :  { %8576 = vmatprep.subr.bf16.mxu0 %v11743_v55  ;;  %8090 = vmatprep.mubr.bf16.mxu1 %v12945_v51  ;;  %v11821_v61 = vld [vmem:[%s15845_s1 + $0x20b4] ss:$24 sps:$4 sm:$0xff]   ;;  %v11819_v55 = vld [vmem:[%s15845_s1 + $0x20b0] ss:$24 sps:$4 sm:$0xff]  }
 0x406   :  { %8606 = vmatprep.mubr.bf16.mxu0 %v12945_v51  ;;  %v11755_v51 = vld [vmem:[%s15845_s1 + $0x1ea4] ss:$24 sps:$4 sm:$0xff]  }
 0x407   :  { %8061 = vmatpush1.bf16.msra.mxu1 %v11738_v48  ;;  %v11824_v48 = vld [vmem:[%s15845_s1 + $0x20dc] ss:$24 sps:$4 sm:$0xff]  }
 0x408   :  { %8577 = vmatpush1.bf16.msra.mxu0 %v11741_v62  ;;  %8062 = vmatprep.subr.bf16.mxu1 %v11746_v63  ;;  %v11827_v62 = vld [vmem:[%s15845_s1 + $0x20e4] ss:$24 sps:$4 sm:$0xff]   ;;  %v11822_v63 = vld [vmem:[%s15845_s1 + $0x20d8] ss:$24 sps:$4 sm:$0xff]  }
 0x409   :  { %8578 = vmatprep.subr.bf16.mxu0 %v11749_v9  ;;  %v11825_v9 = vld [vmem:[%s15845_s1 + $0x20e0] ss:$24 sps:$4 sm:$0xff]  }
 0x40b   :  { %8063 = vmatpush1.bf16.msra.mxu1 %v11744_v50  ;;  %v11830_v50 = vld [vmem:[%s15845_s1 + $0x210c] ss:$24 sps:$4 sm:$0xff]  }
 0x40c   :  { %8579 = vmatpush1.bf16.msra.mxu0 %v11747_v0  ;;  %8064 = vmatprep.subr.bf16.mxu1 %v11752_v1  ;;  %v11833_v0 = vld [vmem:[%s15845_s1 + $0x2114] ss:$24 sps:$4 sm:$0xff]   ;;  %v11828_v1 = vld [vmem:[%s15845_s1 + $0x2108] ss:$24 sps:$4 sm:$0xff]  }
 0x40d   :  { %8580 = vmatprep.subr.bf16.mxu0 %v11755_v51  ;;  %v11831_v51 = vld [vmem:[%s15845_s1 + $0x2110] ss:$24 sps:$4 sm:$0xff]  }
 0x40f   :  { %8065 = vmatpush1.bf16.msra.mxu1 %v11750_v33  ;;  %v11836_v33 = vld [vmem:[%s15845_s1 + $0x213c] ss:$24 sps:$4 sm:$0xff]  }
 0x410   :  { %8581 = vmatpush1.bf16.msra.mxu0 %v11753_v10  ;;  %8066 = vmatprep.subr.bf16.mxu1 %v11758_v3  ;;  %v11839_v10 = vld [vmem:[%s15845_s1 + $0x2144] ss:$24 sps:$4 sm:$0xff]   ;;  %v11834_v3 = vld [vmem:[%s15845_s1 + $0x2138] ss:$24 sps:$4 sm:$0xff]  }
 0x411   :  { %8582 = vmatprep.subr.bf16.mxu0 %v11761_v4  ;;  %v11837_v4 = vld [vmem:[%s15845_s1 + $0x2140] ss:$24 sps:$4 sm:$0xff]  }
 0x413   :  { %8067 = vmatpush1.bf16.msra.mxu1 %v11756_v5  ;;  %v11842_v5 = vld [vmem:[%s15845_s1 + $0x216c] ss:$24 sps:$4 sm:$0xff]  }
 0x414   :  { %8583 = vmatpush1.bf16.msra.mxu0 %v11759_v40  ;;  %8068 = vmatprep.subr.bf16.mxu1 %v11764_v47  ;;  %v11840_v40 = vld [vmem:[%s15845_s1 + $0x2168] ss:$24 sps:$4 sm:$0xff]  }
 0x415   :  { %8584 = vmatprep.subr.bf16.mxu0 %v11767_v11  ;;  %v11843_v47 = vld [vmem:[%s15845_s1 + $0x2170] ss:$24 sps:$4 sm:$0xff]   ;;  %v11848_v11 = vld [vmem:[%s15845_s1 + $0x219c] ss:$24 sps:$4 sm:$0xff]  }
 0x417   :  { %8069 = vmatpush1.bf16.msra.mxu1 %v11762_v14  ;;  %v11846_v14 = vld [vmem:[%s15845_s1 + $0x2198] ss:$24 sps:$4 sm:$0xff]  }
 0x418   :  { %8585 = vmatpush1.bf16.msra.mxu0 %v11765_v16  ;;  %8070 = vmatprep.subr.bf16.mxu1 %v11770_v17  ;;  %v11849_v16 = vld [vmem:[%s15845_s1 + $0x21a0] ss:$24 sps:$4 sm:$0xff]   ;;  %v11854_v17 = vld [vmem:[%s15845_s1 + $0x21cc] ss:$24 sps:$4 sm:$0xff]  }
 0x419   :  { %8586 = vmatprep.subr.bf16.mxu0 %v11773_v43  ;;  %v11857_v43 = vld [vmem:[%s15845_s1 + $0x21d4] ss:$24 sps:$4 sm:$0xff]  }
 0x41b   :  { %8071 = vmatpush1.bf16.msra.mxu1 %v11768_v18  ;;  %v11852_v18 = vld [vmem:[%s15845_s1 + $0x21c8] ss:$24 sps:$4 sm:$0xff]  }
 0x41c   :  { %8587 = vmatpush1.bf16.msra.mxu0 %v11771_v19  ;;  %8072 = vmatprep.subr.bf16.mxu1 %v11776_v24  ;;  %v11855_v19 = vld [vmem:[%s15845_s1 + $0x21d0] ss:$24 sps:$4 sm:$0xff]   ;;  %v11860_v24 = vld [vmem:[%s15845_s1 + $0x21fc] ss:$24 sps:$4 sm:$0xff]  }
 0x41d   :  { %8588 = vmatprep.subr.bf16.mxu0 %v11779_v25  ;;  %v11863_v25 = vld [vmem:[%s15845_s1 + $0x2204] ss:$24 sps:$4 sm:$0xff]  }
 0x41f   :  { %8073 = vmatpush1.bf16.msra.mxu1 %v11774_v41  ;;  %v11858_v41 = vld [vmem:[%s15845_s1 + $0x21f8] ss:$24 sps:$4 sm:$0xff]  }
 0x420   :  { %8589 = vmatpush1.bf16.msra.mxu0 %v11777_v28  ;;  %8074 = vmatprep.subr.bf16.mxu1 %v11782_v42  ;;  %v11861_v28 = vld [vmem:[%s15845_s1 + $0x2200] ss:$24 sps:$4 sm:$0xff]   ;;  %v11866_v42 = vld [vmem:[%s15845_s1 + $0x222c] ss:$24 sps:$4 sm:$0xff]  }
 0x421   :  { %8590 = vmatprep.subr.bf16.mxu0 %v11785_v44  ;;  %v11869_v44 = vld [vmem:[%s15845_s1 + $0x2234] ss:$24 sps:$4 sm:$0xff]  }
 0x423   :  { %8075 = vmatpush1.bf16.msra.mxu1 %v11780_v45  ;;  %v11864_v45 = vld [vmem:[%s15845_s1 + $0x2228] ss:$24 sps:$4 sm:$0xff]  }
 0x424   :  { %8591 = vmatpush1.bf16.msra.mxu0 %v11783_v12  ;;  %8076 = vmatprep.subr.bf16.mxu1 %v11788_v26  ;;  %v11867_v12 = vld [vmem:[%s15845_s1 + $0x2230] ss:$24 sps:$4 sm:$0xff]   ;;  %v11872_v26 = vld [vmem:[%s15845_s1 + $0x225c] ss:$24 sps:$4 sm:$0xff]  }
 0x425   :  { %8592 = vmatprep.subr.bf16.mxu0 %v11791_v22  ;;  %v11875_v22 = vld [vmem:[%s15845_s1 + $0x2264] ss:$24 sps:$4 sm:$0xff]  }
 0x427   :  { %8077 = vmatpush1.bf16.msra.mxu1 %v11786_v27  ;;  %v11870_v27 = vld [vmem:[%s15845_s1 + $0x2258] ss:$24 sps:$4 sm:$0xff]  }
 0x428   :  { %8593 = vmatpush1.bf16.msra.mxu0 %v11789_v20  ;;  %8078 = vmatprep.subr.bf16.mxu1 %v11794_v30  ;;  %v11873_v20 = vld [vmem:[%s15845_s1 + $0x2260] ss:$24 sps:$4 sm:$0xff]   ;;  %v11878_v30 = vld [vmem:[%s15845_s1 + $0x228c] ss:$24 sps:$4 sm:$0xff]  }
 0x429   :  { %8594 = vmatprep.subr.bf16.mxu0 %v11797_v35  ;;  %v11881_v35 = vld [vmem:[%s15845_s1 + $0x2294] ss:$24 sps:$4 sm:$0xff]  }
 0x42b   :  { %8079 = vmatpush1.bf16.msra.mxu1 %v11792_v31  ;;  %v11876_v31 = vld [vmem:[%s15845_s1 + $0x2288] ss:$24 sps:$4 sm:$0xff]  }
 0x42c   :  { %8595 = vmatpush1.bf16.msra.mxu0 %v11795_v36  ;;  %8080 = vmatprep.subr.bf16.mxu1 %v11800_v32  ;;  %v11879_v36 = vld [vmem:[%s15845_s1 + $0x2290] ss:$24 sps:$4 sm:$0xff]   ;;  %v11884_v32 = vld [vmem:[%s15845_s1 + $0x22bc] ss:$24 sps:$4 sm:$0xff]  }
 0x42d   :  { %8596 = vmatprep.subr.bf16.mxu0 %v11803_v52  ;;  %v11887_v52 = vld [vmem:[%s15845_s1 + $0x22c4] ss:$24 sps:$4 sm:$0xff]  }
 0x42f   :  { %8081 = vmatpush1.bf16.msra.mxu1 %v11798_v38  ;;  %v11882_v38 = vld [vmem:[%s15845_s1 + $0x22b8] ss:$24 sps:$4 sm:$0xff]  }
 0x430   :  { %8597 = vmatpush1.bf16.msra.mxu0 %v11801_v39  ;;  %8082 = vmatprep.subr.bf16.mxu1 %v11806_v53  ;;  %v11885_v39 = vld [vmem:[%s15845_s1 + $0x22c0] ss:$24 sps:$4 sm:$0xff]   ;;  %v11890_v53 = vld [vmem:[%s15845_s1 + $0x22ec] ss:$24 sps:$4 sm:$0xff]  }
 0x431   :  { %8598 = vmatprep.subr.bf16.mxu0 %v11809_v54  ;;  %v11893_v54 = vld [vmem:[%s15845_s1 + $0x22f4] ss:$24 sps:$4 sm:$0xff]  }
 0x433   :  { %8083 = vmatpush1.bf16.msra.mxu1 %v11804_v6  ;;  %v11888_v6 = vld [vmem:[%s15845_s1 + $0x22e8] ss:$24 sps:$4 sm:$0xff]  }
 0x434   :  { %8599 = vmatpush1.bf16.msra.mxu0 %v11807_v49  ;;  %8084 = vmatprep.subr.bf16.mxu1 %v11812_v56  ;;  %v11891_v49 = vld [vmem:[%s15845_s1 + $0x22f0] ss:$24 sps:$4 sm:$0xff]   ;;  %v11896_v56 = vld [vmem:[%s15845_s1 + $0x231c] ss:$24 sps:$4 sm:$0xff]  }
 0x435   :  { %8600 = vmatprep.subr.bf16.mxu0 %v11815_v59  ;;  %v11899_v59 = vld [vmem:[%s15845_s1 + $0x2324] ss:$24 sps:$4 sm:$0xff]  }
 0x437   :  { %8085 = vmatpush1.bf16.msra.mxu1 %v11810_v21  ;;  %v11894_v21 = vld [vmem:[%s15845_s1 + $0x2318] ss:$24 sps:$4 sm:$0xff]  }
 0x438   :  { %8601 = vmatpush1.bf16.msra.mxu0 %v11813_v34  ;;  %8086 = vmatprep.subr.bf16.mxu1 %v11818_v60  ;;  %v11897_v34 = vld [vmem:[%s15845_s1 + $0x2320] ss:$24 sps:$4 sm:$0xff]   ;;  %v11902_v60 = vld [vmem:[%s15845_s1 + $0x234c] ss:$24 sps:$4 sm:$0xff]  }
 0x439   :  { %8602 = vmatprep.subr.bf16.mxu0 %v11821_v61  ;;  %v11905_v61 = vld [vmem:[%s15845_s1 + $0x2354] ss:$24 sps:$4 sm:$0xff]  }
 0x43b   :  { %8087 = vmatpush1.bf16.msra.mxu1 %v11816_v8  ;;  %v11900_v8 = vld [vmem:[%s15845_s1 + $0x2348] ss:$24 sps:$4 sm:$0xff]  }
 0x43c   :  { %8603 = vmatpush1.bf16.msra.mxu0 %v11819_v55  ;;  %8088 = vmatprep.subr.bf16.mxu1 %v11824_v48  ;;  %v11903_v55 = vld [vmem:[%s15845_s1 + $0x2350] ss:$24 sps:$4 sm:$0xff]   ;;  %v11908_v48 = vld [vmem:[%s15845_s1 + $0x237c] ss:$24 sps:$4 sm:$0xff]  }
 0x43d   :  { %8604 = vmatprep.subr.bf16.mxu0 %v11827_v62  ;;  %v11911_v62 = vld [vmem:[%s15845_s1 + $0x2384] ss:$24 sps:$4 sm:$0xff]  }
 0x43f   :  { %8089 = vmatpush1.bf16.msra.mxu1 %v11822_v63  ;;  %v11906_v63 = vld [vmem:[%s15845_s1 + $0x2378] ss:$24 sps:$4 sm:$0xff]  }
 0x440   :  { %8605 = vmatpush1.bf16.msra.mxu0 %v11825_v9  ;;  %8101 = vmatprep.subr.bf16.mxu1 %v11830_v50  ;;  %v11909_v9 = vld [vmem:[%s15845_s1 + $0x2380] ss:$24 sps:$4 sm:$0xff]   ;;  %v11914_v50 = vld [vmem:[%s15845_s1 + $0x23ac] ss:$24 sps:$4 sm:$0xff]  }
 0x441   :  { %8617 = vmatprep.subr.bf16.mxu0 %v11833_v0  ;;  %v11917_v0 = vld [vmem:[%s15845_s1 + $0x23b4] ss:$24 sps:$4 sm:$0xff]  }
 0x442   :  { %8091 = vmatmul.mubr.bf16.vlgmr.msra.gmra.mrb[4].mxu1 %v13157_v29 }
 0x443   :  { %8607 = vmatmul.mubr.bf16.vlgmr.msra.gmra.mrb[4].mxu0 %v13157_v29  ;;  %8102 = vmatpush1.bf16.msra.mxu1 %v11828_v1  ;;  %v11845_v29 = vld [vmem:[%s15845_s1 + $0x2174] ss:$24 sps:$4 sm:$0xff]   ;;  %v11912_v1 = vld [vmem:[%s15845_s1 + $0x23a8] ss:$24 sps:$4 sm:$0xff]  }
 0x444   :  { %8618 = vmatpush1.bf16.msra.mxu0 %v11831_v51  ;;  %8103 = vmatprep.subr.bf16.mxu1 %v11836_v33  ;;  %v11915_v51 = vld [vmem:[%s15845_s1 + $0x23b0] ss:$24 sps:$4 sm:$0xff]   ;;  %v11920_v33 = vld [vmem:[%s15845_s1 + $0x23dc] ss:$24 sps:$4 sm:$0xff]  }
 0x445   :  { %8619 = vmatprep.subr.bf16.mxu0 %v11839_v10  ;;  %8133 = vmatprep.mubr.bf16.mxu1 %v13177_v13  ;;  %v11923_v10 = vld [vmem:[%s15845_s1 + $0x23e4] ss:$24 sps:$4 sm:$0xff]  }
 0x446   :  { %8649 = vmatprep.mubr.bf16.mxu0 %v13177_v13  ;;  %v11851_v13 = vld [vmem:[%s15845_s1 + $0x21a4] ss:$24 sps:$4 sm:$0xff]  }
 0x447   :  { %8104 = vmatpush1.bf16.msra.mxu1 %v11834_v3  ;;  %v11918_v3 = vld [vmem:[%s15845_s1 + $0x23d8] ss:$24 sps:$4 sm:$0xff]  }
 0x448   :  { %8620 = vmatpush1.bf16.msra.mxu0 %v11837_v4  ;;  %8105 = vmatprep.subr.bf16.mxu1 %v11842_v5  ;;  %v11921_v4 = vld [vmem:[%s15845_s1 + $0x23e0] ss:$24 sps:$4 sm:$0xff]   ;;  %v15741_v5 = vsub.s32 2, %v13999_v2 }
 0x449   :  { %8621 = vmatprep.subr.bf16.mxu0 %v11845_v29  ;;  %v15744_v29 = vsub.s32 3, %v13999_v2 }
 0x44b   :  { %8106 = vmatpush1.bf16.msra.mxu1 %v11840_v40  ;;  %v15747_v40 = vsub.s32 4, %v13999_v2 }
 0x44c   :  { %8622 = vmatpush1.bf16.msra.mxu0 %v11843_v47  ;;  %8107 = vmatprep.subr.bf16.mxu1 %v11848_v11  ;;  %v8660_v47 = vld [vmem:[%s15847_s3] sm:$0xff]  ;;  %v8661_v11 = vld [vmem:[%s15847_s3 + $0x8] sm:$0xff] }
 0x44d   :  { %8623 = vmatprep.subr.bf16.mxu0 %v11851_v13  ;;  %v8667_v13 = vld [vmem:[%s15847_s3 + $0x38] sm:$0xff] }
 0x44f   :  { %8108 = vmatpush1.bf16.msra.mxu1 %v11846_v14  ;;  %v11928_v14 = vld [vmem:[%s15846_s2] sm:$0x3f] }
 0x450   :  { %8624 = vmatpush1.bf16.msra.mxu0 %v11849_v16  ;;  %8109 = vmatprep.subr.bf16.mxu1 %v11854_v17  ;;  %v1213_v16 = vrot.slane %v11928_v14, %v15741_v5  ;;  %v15766_v17 = vsub.s32 5, %v13999_v2 }
 0x451   :  { %8625 = vmatprep.subr.bf16.mxu0 %v11857_v43  ;;  %v1217_v43 = vrot.slane %v11928_v14, %v15744_v29 }
 0x453   :  { %8110 = vmatpush1.bf16.msra.mxu1 %v11852_v18  ;;  %v8672_v18 = vadd.f32 %v14054_v37, %v8660_v47  ;;  %v8663_v37 = vld [vmem:[%s15847_s3 + $0x18] sm:$0xff] }
 0x454   :  { %8626 = vmatpush1.bf16.msra.mxu0 %v11855_v19  ;;  %8111 = vmatprep.subr.bf16.mxu1 %v11860_v24  ;;  %v8673_v19 = vadd.f32 %v14062_v7, %v8661_v11  ;;  %v1221_v24 = vrot.slane %v11928_v14, %v15747_v40  ;;  %v1225_v7 = vrot.slane %v11928_v14, %v15766_v17 }
 0x455   :  { %8627 = vmatprep.subr.bf16.mxu0 %v11863_v25 }
 0x457   :  { %8112 = vmatpush1.bf16.msra.mxu1 %v11858_v41  ;;  %v8679_v41 = vadd.f32 %v14066_v58, %v8667_v13 }
 0x458   :  { %8628 = vmatpush1.bf16.msra.mxu0 %v11861_v28  ;;  %8113 = vmatprep.subr.bf16.mxu1 %v11866_v42  ;;  %v8662_v42 = vld [vmem:[%s15847_s3 + $0x10] sm:$0xff] }
 0x459   :  { %8629 = vmatprep.subr.bf16.mxu0 %v11869_v44 }
 0x45b   :  { %8114 = vmatpush1.bf16.msra.mxu1 %v11864_v45 }
 0x45c   :  { %8630 = vmatpush1.bf16.msra.mxu0 %v11867_v12  ;;  %8115 = vmatprep.subr.bf16.mxu1 %v11872_v26 }
 0x45d   :  { %8631 = vmatprep.subr.bf16.mxu0 %v11875_v22 }
 0x45f   :  { %8116 = vmatpush1.bf16.msra.mxu1 %v11870_v27  ;;  %v8684_v27 = vadd.f32 %v8673_v19, %v8672_v18 }
 0x460   :  { %8632 = vmatpush1.bf16.msra.mxu0 %v11873_v20  ;;  %8117 = vmatprep.subr.bf16.mxu1 %v11878_v30 }
 0x461   :  { %8633 = vmatprep.subr.bf16.mxu0 %v11881_v35 }
 0x463   :  { %8118 = vmatpush1.bf16.msra.mxu1 %v11876_v31 }
 0x464   :  { %8634 = vmatpush1.bf16.msra.mxu0 %v11879_v36  ;;  %8119 = vmatprep.subr.bf16.mxu1 %v11884_v32  ;;  %v8669_v36 = vld [vmem:[%s15847_s3 + $0x48] sm:$0xff] }
 0x465   :  { %8635 = vmatprep.subr.bf16.mxu0 %v11887_v52 }
 0x467   :  { %8120 = vmatpush1.bf16.msra.mxu1 %v11882_v38  ;;  %v8664_v38 = vld [vmem:[%s15847_s3 + $0x20] sm:$0xff] }
 0x468   :  { %8636 = vmatpush1.bf16.msra.mxu0 %v11885_v39  ;;  %8121 = vmatprep.subr.bf16.mxu1 %v11890_v53 }
 0x469   :  { %8637 = vmatprep.subr.bf16.mxu0 %v11893_v54 }
 0x46b   :  { %8122 = vmatpush1.bf16.msra.mxu1 %v11888_v6 }
 0x46c   :  { %8638 = vmatpush1.bf16.msra.mxu0 %v11891_v49  ;;  %8123 = vmatprep.subr.bf16.mxu1 %v11896_v56 }
 0x46d   :  { %8639 = vmatprep.subr.bf16.mxu0 %v11899_v59  ;;  %v8670_v59 = vld [vmem:[%s15847_s3 + $0x50] sm:$0xff] }
 0x46f   :  { %8124 = vmatpush1.bf16.msra.mxu1 %v11894_v21 }
 0x470   :  { %8640 = vmatpush1.bf16.msra.mxu0 %v11897_v34  ;;  %8125 = vmatprep.subr.bf16.mxu1 %v11902_v60  ;;  %v8665_v34 = vld [vmem:[%s15847_s3 + $0x28] sm:$0xff] }
 0x471   :  { %8641 = vmatprep.subr.bf16.mxu0 %v11905_v61 }
 0x473   :  { %8126 = vmatpush1.bf16.msra.mxu1 %v11900_v8 }
 0x474   :  { %8642 = vmatpush1.bf16.msra.mxu0 %v11903_v55  ;;  %8127 = vmatprep.subr.bf16.mxu1 %v11908_v48 }
 0x475   :  { %8643 = vmatprep.subr.bf16.mxu0 %v11911_v62 }
 0x477   :  { %8128 = vmatpush1.bf16.msra.mxu1 %v11906_v63 }
 0x478   :  { %8644 = vmatpush1.bf16.msra.mxu0 %v11909_v9  ;;  %8129 = vmatprep.subr.bf16.mxu1 %v11914_v50  ;;  %v8671_v50 = vld [vmem:[%s15847_s3 + $0x58] sm:$0xff] }
 0x479   :  { %8645 = vmatprep.subr.bf16.mxu0 %v11917_v0 }
 0x47b   :  { %8130 = vmatpush1.bf16.msra.mxu1 %v11912_v1 }
 0x47c   :  { %8646 = vmatpush1.bf16.msra.mxu0 %v11915_v51  ;;  %8131 = vmatprep.subr.bf16.mxu1 %v11920_v33 }
 0x47d   :  { %8647 = vmatprep.subr.bf16.mxu0 %v11923_v10 }
 0x47f   :  { %8132 = vmatpush1.bf16.msra.mxu1 %v11918_v3 }
 0x480   :  { %8648 = vmatpush1.bf16.msra.mxu0 %v11921_v4 }
 0x482   :  { %8134 = vmatmul.mubr.bf16.vlgmr.msra.gmra.mrb[4].mxu1 %v13369_v23 }
 0x483   :  { %8650 = vmatmul.mubr.bf16.vlgmr.msra.gmra.mrb[4].mxu0 %v13369_v23  ;;  %v8666_v23 = vld [vmem:[%s15847_s3 + $0x30] sm:$0xff] }
 0x484   :  { %v8678_v25 = vadd.f32 %v14064_v57, %v8666_v23  ;;  %v8668_v57 = vld [vmem:[%s15847_s3 + $0x40] sm:$0xff] }
 0x486   :  { %v8691_v52 = vadd.f32 %v8679_v41, %v8678_v25 }
 0x555   :  { %v8135_v28 = vpop.f32.mrb[4].mxu1 }
 0x556   :  { %v8651_v44 = vpop.f32.mrb[4].mxu0  ;;  %v10057_v2 = vadd.f32 %v8135_v28, %v1213_v16  ;;  %v8137_v45 = vpop.f32.mrb[5].mxu1 }
 0x557   :  { %v8653_v12 = vpop.f32.mrb[5].mxu0  ;;  %v10058_v26 = vadd.f32 %v8137_v45, %v1217_v43  ;;  %v8139_v22 = vpop.f32.mrb[6].mxu1  ;;  %v10061_v30 = vadd.f32 %v8651_v44, %v1221_v24 }
 0x558   :  { %v8655_v58 = vpop.f32.mrb[6].mxu0  ;;  %v8674_v20 = vadd.f32 %v10057_v2, %v8662_v42  ;;  %v10059_v35 = vadd.f32 %v8139_v22, %v1213_v16  ;;  %v8141_v31 = vpop.f32.mrb[7].mxu1  ;;  %v10062_v6 = vadd.f32 %v8653_v12, %v1225_v7 }
 0x559   :  { %v8657_v32 = vpop.f32.mrb[7].mxu0  ;;  %v8675_v39 = vadd.f32 %v10058_v26, %v8663_v37  ;;  %v10060_v53 = vadd.f32 %v8141_v31, %v1217_v43  ;;  %v10063_v56 = vadd.f32 %v8655_v58, %v1221_v24  ;;  %v8676_v60 = vadd.f32 %v10061_v30, %v8664_v38 }
 0x55a   :  { %v8685_v54 = vadd.f32 %v8684_v27, %v8674_v20  ;;  %v8680_v49 = vadd.f32 %v10059_v35, %v8668_v57  ;;  %v10064_v55 = vadd.f32 %v8657_v32, %v1225_v7  ;;  %v8677_v63 = vadd.f32 %v10062_v6, %v8665_v34  ;;  %v8757_v34 = vld [vmem:[%s15848_s4] sm:$0x3f]  ;;  %s11953_s4 = smov [#allocation2]  }
 0x55b   :  { %v8681_v21 = vadd.f32 %v10060_v53, %v8669_v36  ;;  %v8682_v48 = vadd.f32 %v10063_v56, %v8670_v59 }
 0x55c   :  { %v8692_v61 = vadd.f32 %v8691_v52, %v8680_v49  ;;  %v8686_v8 = vadd.f32 %v8685_v54, %v8675_v39  ;;  %v8683_v51 = vadd.f32 %v10064_v55, %v8671_v50  ;;  %v8766_v55 = vrot.slane %v8757_v34, %v14026_v15 }
 0x55d   :  { %v8774_v50 = vrot.slane %v8757_v34, %v15744_v29 }
 0x55e   :  { %v8693_v62 = vadd.f32 %v8692_v61, %v8681_v21  ;;  %v8687_v9 = vadd.f32 %v8686_v8, %v8676_v60  ;;  %v8762_v61 = vrot.slane %v8757_v34, %v14017_v46 }
 0x560   :  { %v8688_v0 = vadd.f32 %v8687_v9, %v8677_v63  ;;  %v8694_v1 = vadd.f32 %v8693_v62, %v8682_v48  ;;  %v8778_v9 = vrot.slane %v8757_v34, %v15747_v40 }
 0x562   :  { %8689 = vadd.xlane.f32.xlu0 %v8688_v0  ;;  %v8695_v33 = vadd.f32 %v8694_v1, %v8683_v51  ;;  %v8782_v0 = vrot.slane %v8757_v34, %v15766_v17 }
 0x566   :  { %8696 = vadd.xlane.f32.xlu0 %v8695_v33 }
 0x5ef   :  { %v8690_v10 = vpop.xlane.xlu0 %8689 }
 0x5f0   :  { %v8699_v3 = vmul.f32 0.0013020834, %v8690_v10 }
 0x5f2   :  { %v8701_v4 = vsub.f32 %v8672_v18, %v8699_v3  ;;  %v8702_v47 = vsub.f32 %v8673_v19, %v8699_v3  ;;  %v8703_v11 = vsub.f32 %v8674_v20, %v8699_v3  ;;  %v8704_v13 = vsub.f32 %v8675_v39, %v8699_v3 }
 0x5f3   :  { %v8697_v23 = vpop.xlane.xlu0 %8696  ;;  %v8705_v24 = vsub.f32 %v8676_v60, %v8699_v3  ;;  %v8706_v37 = vsub.f32 %v8677_v63, %v8699_v3  ;;  %v8801_v60 = vld [vmem:[%s15849_s5] sm:$0x3f]  ;;  %v8770_v63 = vrot.slane %v8757_v34, %v15741_v5  ;;  %s8862_s5 = sshll.u32 %s11953_s4, 4  ;;  %s8863_s5 = int_to_ptr.vmem [resolvable:$true] %s8862_s5 }
 0x5f4   :  { %v8700_v14 = vmul.f32 0.0013020834, %v8697_v23  ;;  %v8713_v16 = vmul.f32 %v8701_v4, %v8701_v4  ;;  %v8714_v43 = vmul.f32 %v8702_v47, %v8702_v47  ;;  %v8715_v28 = vmul.f32 %v8703_v11, %v8703_v11  ;;  %s11929_s1 = scalar_lea.vmem %s8863_s5, 1536  ;;  %p11934_p1 = scmp.lt.s32.totalorder %s8863_s5, %s8863_s5 }
 0x5f5   :  { %v8716_v7 = vmul.f32 %v8704_v13, %v8704_v13  ;;  %v8717_v22 = vmul.f32 %v8705_v24, %v8705_v24  ;;  %v8718_v27 = vmul.f32 %v8706_v37, %v8706_v37  ;;  %v8806_v8 = vrot.slane %v8801_v60, %v14017_v46  ;;  %p11930_p0 = scmp.ne.s32.totalorder %s8863_s5, %s11929_s1  ;;  %p11935_p2 = scmp.lt.s32.totalorder %s11929_s1, %s11929_s1 }
 0x5f6   :  { %v8725_v42 = vadd.f32 %v8714_v43, %v8713_v16  ;;  %v15799_v44 = vsub.f32 %v8678_v25, %v8700_v14  ;;  %v15801_v2 = vsub.f32 %v8679_v41, %v8700_v14  ;;  %v15803_v45 = vsub.f32 %v8680_v49, %v8700_v14 }
 0x5f7   :  { %v8710_v18 = vsub.f32 %v8681_v21, %v8700_v14  ;;  %v8711_v58 = vsub.f32 %v8682_v48, %v8700_v14  ;;  %v8712_v30 = vsub.f32 %v8683_v51, %v8700_v14  ;;  %v8810_v48 = vrot.slane %v8801_v60, %v14026_v15  ;;  %p11936_p3 = por %p11935_p2, %p11934_p1 }
 0x5f8   :  { %v8726_v12 = vadd.f32 %v8725_v42, %v8715_v28  ;;  %v8719_v19 = vmul.f32 %v15799_v44, %v15799_v44  ;;  %v8720_v26 = vmul.f32 %v15801_v2, %v15801_v2  ;;  %v8721_v25 = vmul.f32 %v15803_v45, %v15803_v45 }
 0x5f9   :  { %v8722_v35 = vmul.f32 %v8710_v18, %v8710_v18  ;;  %v8723_v32 = vmul.f32 %v8711_v58, %v8711_v58  ;;  %v8724_v38 = vmul.f32 %v8712_v30, %v8712_v30  ;;  %v8814_v3 = vrot.slane %v8801_v60, %v15741_v5  ;;  %p11937_p4 = pnand %p11936_p3, %p11930_p0 }
 0x5fa   :  { %v8727_v57 = vadd.f32 %v8726_v12, %v8716_v7  ;;  %v8732_v41 = vadd.f32 %v8720_v26, %v8719_v19  ;;  %v8822_v46 = vrot.slane %v8801_v60, %v15747_v40  ;;  %v8818_v15 = vrot.slane %v8801_v60, %v15744_v29 }
 0x5fb   :  { %v8826_v16 = vrot.slane %v8801_v60, %v15766_v17 }
 0x5fc   :  { %v8728_v20 = vadd.f32 %v8727_v57, %v8717_v22  ;;  %v8733_v31 = vadd.f32 %v8732_v41, %v8721_v25 }
 0x5fe   :  { %v8729_v36 = vadd.f32 %v8728_v20, %v8718_v27  ;;  %v8734_v52 = vadd.f32 %v8733_v31, %v8722_v35 }
 0x600   :  { %8730 = vadd.xlane.f32.xlu1 %v8729_v36  ;;  %v8735_v39 = vadd.f32 %v8734_v52, %v8723_v32 }
 0x602   :  { %v8736_v53 = vadd.f32 %v8735_v39, %v8724_v38 }
 0x604   :  { %8737 = vadd.xlane.f32.xlu1 %v8736_v53 }
 0x68d   :  { %v8731_v54 = vpop.xlane.xlu1 %8730 }
 0x68e   :  { %v8739_v6 = vmul.f32 0.0013020834, %v8731_v54 }
 0x690   :  { %v8741_v49 = vadd.f32 1e-12, %v8739_v6 }
 0x691   :  { %v8738_v56 = vpop.xlane.xlu1 %8737 }
 0x692   :  { %11924 = vrsqrt.f32 %v8741_v49  ;;  %v8740_v59 = vmul.f32 0.0013020834, %v8738_v56 }
 0x694   :  { %v8742_v21 = vadd.f32 1e-12, %v8740_v59 }
 0x696   :  { %11926 = vrsqrt.f32 %v8742_v21 }
 0x69c   :  { %v11925_v62 = vpop.eup %11924 }
 0x69d   :  { %v8745_v1 = vmul.f32 %v11925_v62, %v8701_v4  ;;  %v8746_v51 = vmul.f32 %v11925_v62, %v8702_v47  ;;  %v8747_v33 = vmul.f32 %v11925_v62, %v8703_v11  ;;  %v8748_v10 = vmul.f32 %v11925_v62, %v8704_v13 }
 0x69e   :  { %v8749_v23 = vmul.f32 %v11925_v62, %v8705_v24  ;;  %v8750_v14 = vmul.f32 %v11925_v62, %v8706_v37 }
 0x69f   :  { %v8789_v43 = vmul.f32 %v8762_v61, %v8745_v1  ;;  %v8790_v28 = vmul.f32 %v8766_v55, %v8746_v51  ;;  %v8791_v7 = vmul.f32 %v8770_v63, %v8747_v33  ;;  %v8792_v12 = vmul.f32 %v8774_v50, %v8748_v10 }
 0x6a0   :  { %v11927_v42 = vpop.eup %11926  ;;  %v8793_v19 = vmul.f32 %v8778_v9, %v8749_v23  ;;  %v8794_v4 = vmul.f32 %v8782_v0, %v8750_v14 }
 0x6a1   :  { %v8751_v47 = vmul.f32 %v11927_v42, %v15799_v44  ;;  %v8752_v11 = vmul.f32 %v11927_v42, %v15801_v2  ;;  %v8753_v5 = vmul.f32 %v11927_v42, %v15803_v45  ;;  %v8754_v40 = vmul.f32 %v11927_v42, %v8710_v18 }
 0x6a2   :  { %v8755_v13 = vmul.f32 %v11927_v42, %v8711_v58  ;;  %v8756_v24 = vmul.f32 %v11927_v42, %v8712_v30  ;;  %v8833_v37 = vadd.f32 %v8806_v8, %v8789_v43  ;;  %v8834_v29 = vadd.f32 %v8810_v48, %v8790_v28 }
 0x6a3   :  { %v8795_v26 = vmul.f32 %v8762_v61, %v8751_v47  ;;  %v8796_v17 = vmul.f32 %v8766_v55, %v8752_v11  ;;  %v8797_v22 = vmul.f32 %v8770_v63, %v8753_v5  ;;  %v8798_v57 = vmul.f32 %v8774_v50, %v8754_v40 }
 0x6a4   :  { %v8799_v25 = vmul.f32 %v8778_v9, %v8755_v13  ;;  %v8800_v41 = vmul.f32 %v8782_v0, %v8756_v24  ;;  %v8835_v27 = vadd.f32 %v8814_v3, %v8791_v7  ;;  %v8836_v20 = vadd.f32 %v8818_v15, %v8792_v12  ;;  %8845 = vst [vmem:[#allocation2] sm:$0xff] %v8833_v37 }
 0x6a5   :  { %8846 = vst [vmem:[#allocation2 + $0x8] sm:$0xff] %v8834_v29  ;;  %v8837_v44 = vadd.f32 %v8822_v46, %v8793_v19  ;;  %v8838_v2 = vadd.f32 %v8826_v16, %v8794_v4  ;;  %v8839_v45 = vadd.f32 %v8806_v8, %v8795_v26  ;;  %v8840_v18 = vadd.f32 %v8810_v48, %v8796_v17 }
 0x6a6   :  { %v8841_v58 = vadd.f32 %v8814_v3, %v8797_v22  ;;  %v8842_v30 = vadd.f32 %v8818_v15, %v8798_v57  ;;  %v8843_v35 = vadd.f32 %v8822_v46, %v8799_v25  ;;  %v8844_v31 = vadd.f32 %v8826_v16, %v8800_v41  ;;  %8847 = vst [vmem:[#allocation2 + $0x10] sm:$0xff] %v8835_v27 }
 0x6a7   :  { %8848 = vst [vmem:[#allocation2 + $0x18] sm:$0xff] %v8836_v20  ;;  %8849 = vst [vmem:[#allocation2 + $0x20] sm:$0xff] %v8837_v44 }
 0x6a8   :  { %8850 = vst [vmem:[#allocation2 + $0x28] sm:$0xff] %v8838_v2  ;;  %8851 = vst [vmem:[#allocation2 + $0x30] sm:$0xff] %v8839_v45 }
 0x6a9   :  { %8852 = vst [vmem:[#allocation2 + $0x38] sm:$0xff] %v8840_v18  ;;  %8853 = vst [vmem:[#allocation2 + $0x40] sm:$0xff] %v8841_v58 }
 0x6aa   :  { %8854 = vst [vmem:[#allocation2 + $0x48] sm:$0xff] %v8842_v30  ;;  %8855 = vst [vmem:[#allocation2 + $0x50] sm:$0xff] %v8843_v35 }
 0x6ab   :  { %8856 = vst [vmem:[#allocation2 + $0x58] sm:$0xff] %v8844_v31 }
 0x6ac   :  { %11940 = shalt.err (!%p11937_p4)
}
 0x6ad   :  { %s11941_s8 = scalar_lea.hbm %s15850_s6, 1536 }
 0x6ae   :  { %p11942_p5 = scmp.ne.s32.totalorder %s15850_s6, %s11941_s8  ;;  %p11945_p6 = scmp.lt.u32.totalorder %s11941_s8, %s15850_s6 }
 0x6b0   :  { %p11947_p7 = pnand %p11945_p6, %p11942_p5 }
 0x6b2   :  { %11950 = shalt.err (!%p11947_p7)
}
 0x6b3   :  { %s11954_s13 = smov 768   ;;  %s11955_s2 = smov 48  }
 0x6b4   :  { %8868 = dma.vmem_to_hbm [thread:$0]  %s8863_s5, 1536, %s15850_s6, [#allocation3], %s11954_s13, %s11954_s13, %s11955_s2  }
 0x6b5   :  { %11951 = dma.done.wait [#allocation3], 1536  }
 0x6b6   :  { %11952 = vsyncadd [#allocation3], 4294965760 }
 0x6b7   :  { %8872 = vsyncpa [#allocation3], 1 }

</bundles_post_ra>
